<compile_context>
chip_gen: v6e
topology: v6e:2x2x1
jax: 0.10.0
libtpu: 0.0.40
codegen_flags: <defaults>
</compile_context>

<pallas_src>
import math

import jax
import jax.numpy as jnp
from jax.experimental import pallas as pl
from jax.experimental.pallas import tpu as pltpu

# ---------------- configuration (small, consistent with the module) ----------
STATE_DIM = 4
ACT_DIM = 3
HIDDEN = 32
N_LAYER = 2
N_HEAD = 2
HEAD_DIM = HIDDEN // N_HEAD
FF = 4 * HIDDEN
MAX_EP_LEN = 1000
B = 2
T = 8                                   # trajectory length -> L = 3*T tokens per batch
EPS = 1e-5
OUT_W = 1 + STATE_DIM + ACT_DIM         # packed head width (8): [return | state | action]
EMB_IN = 1 + STATE_DIM + ACT_DIM + 3    # augmented embedding input width (11)
LANES = 128

# ---- vec-slab row layout (all rows lane-padded to 128) -----------------------
ROW_LNE_G = 0
ROW_LNE_B = 1
ROW_LNF_G = 2
ROW_LNF_B = 3
ROW_LAYER = 4
ROWS_PER_LAYER = 8   # +0 ln1_g, +1 ln1_b, +2 ln2_g, +3 ln2_b, +4 b_qkv, +5 b_o, +6 b_fc, +7 b_pr
ROW_BHEAD = ROW_LAYER + N_LAYER * ROWS_PER_LAYER          # 20: [b_ret|b_st|b_ac] (8 lanes)
ROW_WEMB = ROW_BHEAD + 1                                  # 21..31: fused embedding weight (11, H)
ROW_WHEAD = ROW_WEMB + EMB_IN                             # 32..63: fused head weight (H, 128)
N_VEC_ROWS = ROW_WHEAD + HIDDEN                           # 64


def _layernorm(x, g, b):
    mu = jnp.mean(x, axis=-1, keepdims=True)
    var = jnp.mean((x - mu) ** 2, axis=-1, keepdims=True)
    return (x - mu) * jax.lax.rsqrt(var + EPS) * g + b


def dt_kernel(act_ref, bias_ref, w_attn_ref, w_fc_ref, w_pr_ref, vec_ref, out_ref):
    Bsz = bias_ref.shape[0]
    Lb = bias_ref.shape[1]              # per-batch sequence length (3*T)

    def vrow(r, w=HIDDEN):              # one packed parameter row (static slice)
        return vec_ref[r:r + 1, 0:w]

    act = act_ref[...]                                   # (B*L, EMB_IN + H)
    in_aug = act[:, 0:EMB_IN]
    te = act[:, EMB_IN:EMB_IN + HIDDEN]

    # fused modality embedding (+ per-modality bias via one-hot cols) + time emb
    w_emb = vec_ref[ROW_WEMB:ROW_WEMB + EMB_IN, 0:HIDDEN]          # (11, H)
    x = jnp.dot(in_aug, w_emb, preferred_element_type=jnp.float32) + te
    x = _layernorm(x, vrow(ROW_LNE_G), vrow(ROW_LNE_B))

    inv_sqrt_hd = 1.0 / math.sqrt(HEAD_DIM)

    # --- GPT-2 blocks (static python loops, tiny model) -----------------------
    for l in range(N_LAYER):
        base = ROW_LAYER + l * ROWS_PER_LAYER
        w_l = w_attn_ref[l]                              # (H, 128) = [Wq|Wk|Wv|Wo]

        h = _layernorm(x, vrow(base + 0), vrow(base + 1))
        # one fused QKV matmul per layer (96/128 lane fill)
        qkv = (jnp.dot(h, w_l[:, 0:3 * HIDDEN], preferred_element_type=jnp.float32)
               + vrow(base + 4, 3 * HIDDEN))             # (B*L, 3H)

        ctx_parts = []
        for b in range(Bsz):                             # per-batch (L,L) attention blocks
            lo = b * Lb
            qkv_b = qkv[lo:lo + Lb, :]                   # (L, 3H), sublane-aligned slice
            bias_b = bias_ref[b]                         # (L, L) causal + key padding
            heads = []
            for hh in range(N_HEAD):
                q = qkv_b[:, hh * HEAD_DIM:(hh + 1) * HEAD_DIM]
                k = qkv_b[:, HIDDEN + hh * HEAD_DIM:HIDDEN + (hh + 1) * HEAD_DIM]
                v = qkv_b[:, 2 * HIDDEN + hh * HEAD_DIM:2 * HIDDEN + (hh + 1) * HEAD_DIM]
                sc = jax.lax.dot_general(q, k, (((1,), (1,)), ((), ())),
                                         preferred_element_type=jnp.float32)
                sc = sc * inv_sqrt_hd + bias_b
                sc_max = jnp.max(sc, axis=-1, keepdims=True)
                e = jnp.exp(sc - sc_max)
                p = e * pl.reciprocal(jnp.sum(e, axis=-1, keepdims=True), approx=True)
                heads.append(jnp.dot(p, v, preferred_element_type=jnp.float32))   # (L, HD)
            ctx_parts.append(jnp.concatenate(heads, axis=-1))                     # (L, H)
        ctx = jnp.concatenate(ctx_parts, axis=0)                                  # (B*L, H)

        # single fused out-projection
        x = (x + jnp.dot(ctx, w_l[:, 3 * HIDDEN:4 * HIDDEN],
                         preferred_element_type=jnp.float32) + vrow(base + 5))

        h2 = _layernorm(x, vrow(base + 2), vrow(base + 3))
        m = jax.nn.gelu(
            jnp.dot(h2, w_fc_ref[l], preferred_element_type=jnp.float32)
            + vrow(base + 6, FF),
            approximate=True)                             # gelu_new (tanh approx)
        x = x + jnp.dot(m, w_pr_ref[l], preferred_element_type=jnp.float32) + vrow(base + 7)

    x = _layernorm(x, vrow(ROW_LNF_G), vrow(ROW_LNF_B))

    # fused prediction heads on ALL tokens, lane-dense (128-wide) store;
    # row (token) selection happens in the wrapper with static strided slices.
    w_head = vec_ref[ROW_WHEAD:ROW_WHEAD + HIDDEN, :]     # (H, 128), cols 0:8 live
    y = (jnp.dot(x, w_head, preferred_element_type=jnp.float32)
         + vec_ref[ROW_BHEAD:ROW_BHEAD + 1, :])
    col = jax.lax.broadcasted_iota(jnp.int32, y.shape, 1)
    is_ac = (col >= 1 + STATE_DIM) & (col < OUT_W)        # tanh only on action columns
    out_ref[...] = jnp.where(is_ac, jnp.tanh(y), y)


def init_params(key):
    std = 0.02
    ks = jax.random.split(key, 12)
    p = {}
    p['time_emb'] = jax.random.normal(ks[0], (MAX_EP_LEN, HIDDEN), jnp.float32) * std
    p['w_es'] = jax.random.normal(ks[1], (STATE_DIM, HIDDEN), jnp.float32) * std
    p['b_es'] = jnp.zeros((1, HIDDEN), jnp.float32)
    p['w_ea'] = jax.random.normal(ks[2], (ACT_DIM, HIDDEN), jnp.float32) * std
    p['b_ea'] = jnp.zeros((1, HIDDEN), jnp.float32)
    p['w_er'] = jax.random.normal(ks[3], (1, HIDDEN), jnp.float32) * std
    p['b_er'] = jnp.zeros((1, HIDDEN), jnp.float32)
    p['lne_g'] = jnp.ones((1, HIDDEN), jnp.float32)
    p['lne_b'] = jnp.zeros((1, HIDDEN), jnp.float32)
    p['ln1_g'] = jnp.ones((N_LAYER, 1, HIDDEN), jnp.float32)
    p['ln1_b'] = jnp.zeros((N_LAYER, 1, HIDDEN), jnp.float32)
    p['w_qkv'] = jax.random.normal(ks[4], (N_LAYER, HIDDEN, 3 * HIDDEN), jnp.float32) * std
    p['b_qkv'] = jnp.zeros((N_LAYER, 1, 3 * HIDDEN), jnp.float32)
    p['w_o'] = jax.random.normal(ks[5], (N_LAYER, HIDDEN, HIDDEN), jnp.float32) * std
    p['b_o'] = jnp.zeros((N_LAYER, 1, HIDDEN), jnp.float32)
    p['ln2_g'] = jnp.ones((N_LAYER, 1, HIDDEN), jnp.float32)
    p['ln2_b'] = jnp.zeros((N_LAYER, 1, HIDDEN), jnp.float32)
    p['w_fc'] = jax.random.normal(ks[6], (N_LAYER, HIDDEN, FF), jnp.float32) * std
    p['b_fc'] = jnp.zeros((N_LAYER, 1, FF), jnp.float32)
    p['w_pr'] = jax.random.normal(ks[7], (N_LAYER, FF, HIDDEN), jnp.float32) * std
    p['b_pr'] = jnp.zeros((N_LAYER, 1, HIDDEN), jnp.float32)
    p['lnf_g'] = jnp.ones((1, HIDDEN), jnp.float32)
    p['lnf_b'] = jnp.zeros((1, HIDDEN), jnp.float32)
    p['w_ret'] = jax.random.normal(ks[8], (HIDDEN, 1), jnp.float32) * std
    p['b_ret'] = jnp.zeros((1, 1), jnp.float32)
    p['w_st'] = jax.random.normal(ks[9], (HIDDEN, STATE_DIM), jnp.float32) * std
    p['b_st'] = jnp.zeros((1, STATE_DIM), jnp.float32)
    p['w_ac'] = jax.random.normal(ks[10], (HIDDEN, ACT_DIM), jnp.float32) * std
    p['b_ac'] = jnp.zeros((1, ACT_DIM), jnp.float32)
    return p


def dt_forward(params, states, actions, returns_to_go, timesteps, attention_mask=None):
    """Mirrors DT.forward (rewards unused). Returns (state_preds, action_preds, return_preds)."""
    Bsz, Tsz = states.shape[0], states.shape[1]
    Lsz = 3 * Tsz
    Ltot = Bsz * Lsz
    if attention_mask is None:
        attention_mask = jnp.ones((Bsz, Tsz), dtype=jnp.float32)
    attention_mask = attention_mask.astype(jnp.float32)

    states = states.astype(jnp.float32)
    actions = actions.astype(jnp.float32)
    returns_to_go = returns_to_go.astype(jnp.float32)

    # ---- wrapper-side layout plumbing (no compute) --------------------------
    # time embeddings, repeated for each (r, s, a) token of a timestep
    temb = jnp.take(params['time_emb'], timesteps, axis=0)                 # (B, T, H)
    te_int = jnp.repeat(temb, 3, axis=1).reshape(Ltot, HIDDEN)             # (B*L, H)

    # pre-interleaved augmented input: [rtg | state | action | onehot(modality)]
    def z(n):
        return jnp.zeros((Bsz, Tsz, n), jnp.float32)
    one = jnp.ones((Bsz, Tsz, 1), jnp.float32)
    row_r = jnp.concatenate([returns_to_go, z(STATE_DIM + ACT_DIM), one, z(2)], axis=-1)
    row_s = jnp.concatenate([z(1), states, z(ACT_DIM), z(1), one, z(1)], axis=-1)
    row_a = jnp.concatenate([z(1 + STATE_DIM), actions, z(2), one], axis=-1)
    in_aug = jnp.stack([row_r, row_s, row_a], axis=2).reshape(Ltot, EMB_IN)   # (B*L, 11)

    # single activation slab: [augmented input | time embedding]
    act_slab = jnp.concatenate([in_aug, te_int], axis=-1)                  # (B*L, 11+H)

    # per-batch additive attention bias: causal + key padding, shape (B, L, L)
    mask3 = jnp.repeat(attention_mask, 3, axis=1)                          # (B, L)
    pos = jnp.arange(Lsz)
    causal = pos[:, None] >= pos[None, :]
    attn_bias = (jnp.where(causal, 0.0, -1e9)[None, :, :]
                 + (1.0 - mask3)[:, None, :] * (-1e9)).astype(jnp.float32)

    # packed per-layer attention weights [Wq | Wk | Wv | Wo] -> (NL, H, 128)
    w_attn = jnp.concatenate([params['w_qkv'], params['w_o']], axis=-1)

    # one (64, 128) "vec slab" holding every small parameter (one DMA)
    def pad_lanes(a):
        return jnp.pad(a, ((0, 0), (0, LANES - a.shape[-1])))

    rows = [params['lne_g'], params['lne_b'], params['lnf_g'], params['lnf_b']]
    for l in range(N_LAYER):
        rows += [params['ln1_g'][l], params['ln1_b'][l],
                 params['ln2_g'][l], params['ln2_b'][l],
                 params['b_qkv'][l], params['b_o'][l],
                 params['b_fc'][l], params['b_pr'][l]]
    rows += [jnp.concatenate([params['b_ret'], params['b_st'], params['b_ac']], axis=1)]
    w_emb = jnp.concatenate([params['w_er'], params['w_es'], params['w_ea'],
                             params['b_er'], params['b_es'], params['b_ea']], axis=0)  # (11, H)
    rows += [w_emb]
    w_head = jnp.concatenate([params['w_ret'], params['w_st'], params['w_ac']], axis=1)  # (H, 8)
    rows += [w_head]
    vec_slab = jnp.concatenate([pad_lanes(r) for r in rows], axis=0)       # (64, 128)
    assert vec_slab.shape == (N_VEC_ROWS, LANES)

    inputs = [act_slab, attn_bias, w_attn, params['w_fc'], params['w_pr'], vec_slab]

    def fullspec(arr):   # whole-array resident block, single grid step
        nd = arr.ndim
        return pl.BlockSpec(arr.shape, lambda i, nd=nd: (0,) * nd)

    fn = pl.pallas_call(
        dt_kernel,
        grid=(1,),
        in_specs=[fullspec(a) for a in inputs],
        out_specs=pl.BlockSpec((Ltot, LANES), lambda i: (0, 0)),
        out_shape=jax.ShapeDtypeStruct((Ltot, LANES), jnp.float32),
        compiler_params=pltpu.CompilerParams(dimension_semantics=("arbitrary",)),
    )
    out = fn(*inputs).reshape(Bsz, Tsz, 3, LANES)

    # token / head selection (pure wrapper slicing; rows per step are (r, s, a))
    return_preds = out[:, :, 2, 0:1]                       # action tokens -> return head
    state_preds = out[:, :, 2, 1:1 + STATE_DIM]            # action tokens -> state head
    action_preds = out[:, :, 1, 1 + STATE_DIM:OUT_W]       # state tokens  -> tanh(action)
    return state_preds, action_preds, return_preds


if __name__ == "__main__":
    key = jax.random.PRNGKey(0)
    kp, k1, k2, k3, k4 = jax.random.split(key, 5)
    params = init_params(kp)

    states = jax.random.normal(k1, (B, T, STATE_DIM), jnp.float32)
    actions = jax.random.normal(k2, (B, T, ACT_DIM), jnp.float32)
    rewards = None  # unused by forward, matching the PyTorch module
    returns_to_go = jax.random.normal(k3, (B, T, 1), jnp.float32)
    timesteps = jax.random.randint(k4, (B, T), 0, MAX_EP_LEN, dtype=jnp.int32)

    state_preds, action_preds, return_preds = dt_forward(
        params, states, actions, returns_to_go, timesteps)
    jax.block_until_ready((state_preds, action_preds, return_preds))

    assert state_preds.shape == (B, T, STATE_DIM)
    assert action_preds.shape == (B, T, ACT_DIM)
    assert return_preds.shape == (B, T, 1)
    print("KERNEL_OK")
</pallas_src>

<mosaic_0001>
module attributes {stable_mosaic.version = 11 : i64} {
  func.func @dt_kernel(%arg0: i32, %arg1: memref<48x43xf32, #tpu.memory_space<vmem>>, %arg2: memref<2x24x24xf32, #tpu.memory_space<vmem>>, %arg3: memref<2x32x128xf32, #tpu.memory_space<vmem>>, %arg4: memref<2x32x128xf32, #tpu.memory_space<vmem>>, %arg5: memref<2x128x32xf32, #tpu.memory_space<vmem>>, %arg6: memref<64x128xf32, #tpu.memory_space<vmem>>, %arg7: memref<48x128xf32, #tpu.memory_space<vmem>>) attributes {dimension_semantics = [#tpu.dimension_semantics<arbitrary>], iteration_bounds = array<i64: 1>, scalar_prefetch = 0 : i64, scratch_operands = 0 : i64, tpu.core_type = #tpu.core_type<tc>, window_params = [{pipeline_mode = #tpu.pipeline_mode<synchronous>, transform_indices = @transform_0, window_bounds = array<i64: 48, 43>}, {pipeline_mode = #tpu.pipeline_mode<synchronous>, transform_indices = @transform_1, window_bounds = array<i64: 2, 24, 24>}, {pipeline_mode = #tpu.pipeline_mode<synchronous>, transform_indices = @transform_2, window_bounds = array<i64: 2, 32, 128>}, {pipeline_mode = #tpu.pipeline_mode<synchronous>, transform_indices = @transform_3, window_bounds = array<i64: 2, 32, 128>}, {pipeline_mode = #tpu.pipeline_mode<synchronous>, transform_indices = @transform_4, window_bounds = array<i64: 2, 128, 32>}, {pipeline_mode = #tpu.pipeline_mode<synchronous>, transform_indices = @transform_5, window_bounds = array<i64: 64, 128>}, {pipeline_mode = #tpu.pipeline_mode<synchronous>, transform_indices = @transform_6, window_bounds = array<i64: 48, 128>}]} {
    %c0 = arith.constant 0 : index
    %c0_0 = arith.constant 0 : index
    %0 = vector.load %arg1[%c0, %c0_0] : memref<48x43xf32, #tpu.memory_space<vmem>>, vector<48x43xf32>
    %1 = vector.extract_strided_slice %0 {offsets = [0, 0], sizes = [48, 11], strides = [1, 1]} : vector<48x43xf32> to vector<48x11xf32>
    %2 = vector.extract_strided_slice %0 {offsets = [0, 11], sizes = [48, 32], strides = [1, 1]} : vector<48x43xf32> to vector<48x32xf32>
    %c21 = arith.constant 21 : index
    %c0_1 = arith.constant 0 : index
    %3 = vector.load %arg6[%c21, %c0_1] : memref<64x128xf32, #tpu.memory_space<vmem>>, vector<11x32xf32>
    %cst = arith.constant dense<0.000000e+00> : vector<48x32xf32>
    %4 = tpu.matmul %1, %3, %cst {dimension_numbers = #tpu.dot_dimension_numbers<[1], [0], [0], [1], [0, 0, 1, 1], [], []>} : vector<48x11xf32>, vector<11x32xf32>, vector<48x32xf32> -> vector<48x32xf32>
    %5 = arith.addf %4, %2 : vector<48x32xf32>
    %c0_2 = arith.constant 0 : index
    %c0_3 = arith.constant 0 : index
    %6 = vector.load %arg6[%c0_2, %c0_3] : memref<64x128xf32, #tpu.memory_space<vmem>>, vector<1x32xf32>
    %c1 = arith.constant 1 : index
    %c0_4 = arith.constant 0 : index
    %7 = vector.load %arg6[%c1, %c0_4] : memref<64x128xf32, #tpu.memory_space<vmem>>, vector<1x32xf32>
    %cst_5 = arith.constant dense<0.000000e+00> : vector<48xf32>
    %8 = vector.multi_reduction <add>, %5, %cst_5 [1] : vector<48x32xf32> to vector<48xf32>
    %9 = vector.shape_cast %8 : vector<48xf32> to vector<48x1xf32>
    %cst_6 = arith.constant 3.200000e+01 : f32
    %10 = vector.broadcast %cst_6 : f32 to vector<48x1xf32>
    %11 = arith.divf %9, %10 : vector<48x1xf32>
    %12 = vector.broadcast %11 : vector<48x1xf32> to vector<48x32xf32>
    %13 = arith.subf %5, %12 : vector<48x32xf32>
    %14 = arith.mulf %13, %13 : vector<48x32xf32>
    %cst_7 = arith.constant dense<0.000000e+00> : vector<48xf32>
    %15 = vector.multi_reduction <add>, %14, %cst_7 [1] : vector<48x32xf32> to vector<48xf32>
    %16 = vector.shape_cast %15 : vector<48xf32> to vector<48x1xf32>
    %cst_8 = arith.constant 3.200000e+01 : f32
    %17 = vector.broadcast %cst_8 : f32 to vector<48x1xf32>
    %18 = arith.divf %16, %17 : vector<48x1xf32>
    %19 = vector.broadcast %11 : vector<48x1xf32> to vector<48x32xf32>
    %20 = arith.subf %5, %19 : vector<48x32xf32>
    %cst_9 = arith.constant 9.99999974E-6 : f32
    %21 = vector.broadcast %cst_9 : f32 to vector<48x1xf32>
    %22 = arith.addf %18, %21 : vector<48x1xf32>
    %23 = math.rsqrt %22 : vector<48x1xf32>
    %24 = vector.broadcast %23 : vector<48x1xf32> to vector<48x32xf32>
    %25 = arith.mulf %20, %24 : vector<48x32xf32>
    %26 = vector.broadcast %6 : vector<1x32xf32> to vector<48x32xf32>
    %27 = arith.mulf %25, %26 : vector<48x32xf32>
    %28 = vector.broadcast %7 : vector<1x32xf32> to vector<48x32xf32>
    %29 = arith.addf %27, %28 : vector<48x32xf32>
    %c0_10 = arith.constant 0 : index
    %c0_11 = arith.constant 0 : index
    %c0_12 = arith.constant 0 : index
    %30 = vector.load %arg3[%c0_10, %c0_11, %c0_12] : memref<2x32x128xf32, #tpu.memory_space<vmem>>, vector<1x32x128xf32>
    %31 = vector.shape_cast %30 : vector<1x32x128xf32> to vector<32x128xf32>
    %c4 = arith.constant 4 : index
    %c0_13 = arith.constant 0 : index
    %32 = vector.load %arg6[%c4, %c0_13] : memref<64x128xf32, #tpu.memory_space<vmem>>, vector<1x32xf32>
    %c5 = arith.constant 5 : index
    %c0_14 = arith.constant 0 : index
    %33 = vector.load %arg6[%c5, %c0_14] : memref<64x128xf32, #tpu.memory_space<vmem>>, vector<1x32xf32>
    %cst_15 = arith.constant dense<0.000000e+00> : vector<48xf32>
    %34 = vector.multi_reduction <add>, %29, %cst_15 [1] : vector<48x32xf32> to vector<48xf32>
    %35 = vector.shape_cast %34 : vector<48xf32> to vector<48x1xf32>
    %cst_16 = arith.constant 3.200000e+01 : f32
    %36 = vector.broadcast %cst_16 : f32 to vector<48x1xf32>
    %37 = arith.divf %35, %36 : vector<48x1xf32>
    %38 = vector.broadcast %37 : vector<48x1xf32> to vector<48x32xf32>
    %39 = arith.subf %29, %38 : vector<48x32xf32>
    %40 = arith.mulf %39, %39 : vector<48x32xf32>
    %cst_17 = arith.constant dense<0.000000e+00> : vector<48xf32>
    %41 = vector.multi_reduction <add>, %40, %cst_17 [1] : vector<48x32xf32> to vector<48xf32>
    %42 = vector.shape_cast %41 : vector<48xf32> to vector<48x1xf32>
    %cst_18 = arith.constant 3.200000e+01 : f32
    %43 = vector.broadcast %cst_18 : f32 to vector<48x1xf32>
    %44 = arith.divf %42, %43 : vector<48x1xf32>
    %45 = vector.broadcast %37 : vector<48x1xf32> to vector<48x32xf32>
    %46 = arith.subf %29, %45 : vector<48x32xf32>
    %cst_19 = arith.constant 9.99999974E-6 : f32
    %47 = vector.broadcast %cst_19 : f32 to vector<48x1xf32>
    %48 = arith.addf %44, %47 : vector<48x1xf32>
    %49 = math.rsqrt %48 : vector<48x1xf32>
    %50 = vector.broadcast %49 : vector<48x1xf32> to vector<48x32xf32>
    %51 = arith.mulf %46, %50 : vector<48x32xf32>
    %52 = vector.broadcast %32 : vector<1x32xf32> to vector<48x32xf32>
    %53 = arith.mulf %51, %52 : vector<48x32xf32>
    %54 = vector.broadcast %33 : vector<1x32xf32> to vector<48x32xf32>
    %55 = arith.addf %53, %54 : vector<48x32xf32>
    %56 = vector.extract_strided_slice %31 {offsets = [0, 0], sizes = [32, 96], strides = [1, 1]} : vector<32x128xf32> to vector<32x96xf32>
    %cst_20 = arith.constant dense<0.000000e+00> : vector<48x96xf32>
    %57 = tpu.matmul %55, %56, %cst_20 {dimension_numbers = #tpu.dot_dimension_numbers<[1], [0], [0], [1], [0, 0, 1, 1], [], []>} : vector<48x32xf32>, vector<32x96xf32>, vector<48x96xf32> -> vector<48x96xf32>
    %c8 = arith.constant 8 : index
    %c0_21 = arith.constant 0 : index
    %58 = vector.load %arg6[%c8, %c0_21] : memref<64x128xf32, #tpu.memory_space<vmem>>, vector<1x96xf32>
    %59 = vector.broadcast %58 : vector<1x96xf32> to vector<48x96xf32>
    %60 = arith.addf %57, %59 : vector<48x96xf32>
    %61 = vector.extract_strided_slice %60 {offsets = [0, 0], sizes = [24, 96], strides = [1, 1]} : vector<48x96xf32> to vector<24x96xf32>
    %c0_22 = arith.constant 0 : index
    %c0_23 = arith.constant 0 : index
    %c0_24 = arith.constant 0 : index
    %62 = vector.load %arg2[%c0_22, %c0_23, %c0_24] : memref<2x24x24xf32, #tpu.memory_space<vmem>>, vector<1x24x24xf32>
    %63 = vector.shape_cast %62 : vector<1x24x24xf32> to vector<24x24xf32>
    %64 = vector.extract_strided_slice %61 {offsets = [0, 0], sizes = [24, 16], strides = [1, 1]} : vector<24x96xf32> to vector<24x16xf32>
    %65 = vector.extract_strided_slice %61 {offsets = [0, 32], sizes = [24, 16], strides = [1, 1]} : vector<24x96xf32> to vector<24x16xf32>
    %66 = vector.extract_strided_slice %61 {offsets = [0, 64], sizes = [24, 16], strides = [1, 1]} : vector<24x96xf32> to vector<24x16xf32>
    %cst_25 = arith.constant dense<0.000000e+00> : vector<24x24xf32>
    %67 = tpu.matmul %64, %65, %cst_25 {dimension_numbers = #tpu.dot_dimension_numbers<[1], [1], [0], [0], [0, 0, 1, 0], [], []>} : vector<24x16xf32>, vector<24x16xf32>, vector<24x24xf32> -> vector<24x24xf32>
    %cst_26 = arith.constant 2.500000e-01 : f32
    %68 = vector.broadcast %cst_26 : f32 to vector<24x24xf32>
    %69 = arith.mulf %67, %68 : vector<24x24xf32>
    %70 = arith.addf %69, %63 : vector<24x24xf32>
    %cst_27 = arith.constant dense<0xFF800000> : vector<24xf32>
    %71 = vector.multi_reduction <maximumf>, %70, %cst_27 [1] : vector<24x24xf32> to vector<24xf32>
    %72 = vector.shape_cast %71 : vector<24xf32> to vector<24x1xf32>
    %73 = vector.broadcast %72 : vector<24x1xf32> to vector<24x24xf32>
    %74 = arith.subf %70, %73 : vector<24x24xf32>
    %75 = math.exp %74 : vector<24x24xf32>
    %cst_28 = arith.constant dense<0.000000e+00> : vector<24xf32>
    %76 = vector.multi_reduction <add>, %75, %cst_28 [1] : vector<24x24xf32> to vector<24xf32>
    %77 = vector.shape_cast %76 : vector<24xf32> to vector<24x1xf32>
    %78 = tpu.reciprocal %77 {approx = true} : vector<24x1xf32> -> vector<24x1xf32>
    %79 = vector.broadcast %78 : vector<24x1xf32> to vector<24x24xf32>
    %80 = arith.mulf %75, %79 : vector<24x24xf32>
    %cst_29 = arith.constant dense<0.000000e+00> : vector<24x16xf32>
    %81 = tpu.matmul %80, %66, %cst_29 {dimension_numbers = #tpu.dot_dimension_numbers<[1], [0], [0], [1], [0, 0, 1, 1], [], []>} : vector<24x24xf32>, vector<24x16xf32>, vector<24x16xf32> -> vector<24x16xf32>
    %82 = vector.extract_strided_slice %61 {offsets = [0, 16], sizes = [24, 16], strides = [1, 1]} : vector<24x96xf32> to vector<24x16xf32>
    %83 = vector.extract_strided_slice %61 {offsets = [0, 48], sizes = [24, 16], strides = [1, 1]} : vector<24x96xf32> to vector<24x16xf32>
    %84 = vector.extract_strided_slice %61 {offsets = [0, 80], sizes = [24, 16], strides = [1, 1]} : vector<24x96xf32> to vector<24x16xf32>
    %cst_30 = arith.constant dense<0.000000e+00> : vector<24x24xf32>
    %85 = tpu.matmul %82, %83, %cst_30 {dimension_numbers = #tpu.dot_dimension_numbers<[1], [1], [0], [0], [0, 0, 1, 0], [], []>} : vector<24x16xf32>, vector<24x16xf32>, vector<24x24xf32> -> vector<24x24xf32>
    %cst_31 = arith.constant 2.500000e-01 : f32
    %86 = vector.broadcast %cst_31 : f32 to vector<24x24xf32>
    %87 = arith.mulf %85, %86 : vector<24x24xf32>
    %88 = arith.addf %87, %63 : vector<24x24xf32>
    %cst_32 = arith.constant dense<0xFF800000> : vector<24xf32>
    %89 = vector.multi_reduction <maximumf>, %88, %cst_32 [1] : vector<24x24xf32> to vector<24xf32>
    %90 = vector.shape_cast %89 : vector<24xf32> to vector<24x1xf32>
    %91 = vector.broadcast %90 : vector<24x1xf32> to vector<24x24xf32>
    %92 = arith.subf %88, %91 : vector<24x24xf32>
    %93 = math.exp %92 : vector<24x24xf32>
    %cst_33 = arith.constant dense<0.000000e+00> : vector<24xf32>
    %94 = vector.multi_reduction <add>, %93, %cst_33 [1] : vector<24x24xf32> to vector<24xf32>
    %95 = vector.shape_cast %94 : vector<24xf32> to vector<24x1xf32>
    %96 = tpu.reciprocal %95 {approx = true} : vector<24x1xf32> -> vector<24x1xf32>
    %97 = vector.broadcast %96 : vector<24x1xf32> to vector<24x24xf32>
    %98 = arith.mulf %93, %97 : vector<24x24xf32>
    %cst_34 = arith.constant dense<0.000000e+00> : vector<24x16xf32>
    %99 = tpu.matmul %98, %84, %cst_34 {dimension_numbers = #tpu.dot_dimension_numbers<[1], [0], [0], [1], [0, 0, 1, 1], [], []>} : vector<24x24xf32>, vector<24x16xf32>, vector<24x16xf32> -> vector<24x16xf32>
    %100 = tpu.concatenate %81, %99 in 1 : vector<24x16xf32>, vector<24x16xf32> -> vector<24x32xf32>
    %101 = vector.extract_strided_slice %60 {offsets = [24, 0], sizes = [24, 96], strides = [1, 1]} : vector<48x96xf32> to vector<24x96xf32>
    %c1_35 = arith.constant 1 : index
    %c0_36 = arith.constant 0 : index
    %c0_37 = arith.constant 0 : index
    %102 = vector.load %arg2[%c1_35, %c0_36, %c0_37] : memref<2x24x24xf32, #tpu.memory_space<vmem>>, vector<1x24x24xf32>
    %103 = vector.shape_cast %102 : vector<1x24x24xf32> to vector<24x24xf32>
    %104 = vector.extract_strided_slice %101 {offsets = [0, 0], sizes = [24, 16], strides = [1, 1]} : vector<24x96xf32> to vector<24x16xf32>
    %105 = vector.extract_strided_slice %101 {offsets = [0, 32], sizes = [24, 16], strides = [1, 1]} : vector<24x96xf32> to vector<24x16xf32>
    %106 = vector.extract_strided_slice %101 {offsets = [0, 64], sizes = [24, 16], strides = [1, 1]} : vector<24x96xf32> to vector<24x16xf32>
    %cst_38 = arith.constant dense<0.000000e+00> : vector<24x24xf32>
    %107 = tpu.matmul %104, %105, %cst_38 {dimension_numbers = #tpu.dot_dimension_numbers<[1], [1], [0], [0], [0, 0, 1, 0], [], []>} : vector<24x16xf32>, vector<24x16xf32>, vector<24x24xf32> -> vector<24x24xf32>
    %cst_39 = arith.constant 2.500000e-01 : f32
    %108 = vector.broadcast %cst_39 : f32 to vector<24x24xf32>
    %109 = arith.mulf %107, %108 : vector<24x24xf32>
    %110 = arith.addf %109, %103 : vector<24x24xf32>
    %cst_40 = arith.constant dense<0xFF800000> : vector<24xf32>
    %111 = vector.multi_reduction <maximumf>, %110, %cst_40 [1] : vector<24x24xf32> to vector<24xf32>
    %112 = vector.shape_cast %111 : vector<24xf32> to vector<24x1xf32>
    %113 = vector.broadcast %112 : vector<24x1xf32> to vector<24x24xf32>
    %114 = arith.subf %110, %113 : vector<24x24xf32>
    %115 = math.exp %114 : vector<24x24xf32>
    %cst_41 = arith.constant dense<0.000000e+00> : vector<24xf32>
    %116 = vector.multi_reduction <add>, %115, %cst_41 [1] : vector<24x24xf32> to vector<24xf32>
    %117 = vector.shape_cast %116 : vector<24xf32> to vector<24x1xf32>
    %118 = tpu.reciprocal %117 {approx = true} : vector<24x1xf32> -> vector<24x1xf32>
    %119 = vector.broadcast %118 : vector<24x1xf32> to vector<24x24xf32>
    %120 = arith.mulf %115, %119 : vector<24x24xf32>
    %cst_42 = arith.constant dense<0.000000e+00> : vector<24x16xf32>
    %121 = tpu.matmul %120, %106, %cst_42 {dimension_numbers = #tpu.dot_dimension_numbers<[1], [0], [0], [1], [0, 0, 1, 1], [], []>} : vector<24x24xf32>, vector<24x16xf32>, vector<24x16xf32> -> vector<24x16xf32>
    %122 = vector.extract_strided_slice %101 {offsets = [0, 16], sizes = [24, 16], strides = [1, 1]} : vector<24x96xf32> to vector<24x16xf32>
    %123 = vector.extract_strided_slice %101 {offsets = [0, 48], sizes = [24, 16], strides = [1, 1]} : vector<24x96xf32> to vector<24x16xf32>
    %124 = vector.extract_strided_slice %101 {offsets = [0, 80], sizes = [24, 16], strides = [1, 1]} : vector<24x96xf32> to vector<24x16xf32>
    %cst_43 = arith.constant dense<0.000000e+00> : vector<24x24xf32>
    %125 = tpu.matmul %122, %123, %cst_43 {dimension_numbers = #tpu.dot_dimension_numbers<[1], [1], [0], [0], [0, 0, 1, 0], [], []>} : vector<24x16xf32>, vector<24x16xf32>, vector<24x24xf32> -> vector<24x24xf32>
    %cst_44 = arith.constant 2.500000e-01 : f32
    %126 = vector.broadcast %cst_44 : f32 to vector<24x24xf32>
    %127 = arith.mulf %125, %126 : vector<24x24xf32>
    %128 = arith.addf %127, %103 : vector<24x24xf32>
    %cst_45 = arith.constant dense<0xFF800000> : vector<24xf32>
    %129 = vector.multi_reduction <maximumf>, %128, %cst_45 [1] : vector<24x24xf32> to vector<24xf32>
    %130 = vector.shape_cast %129 : vector<24xf32> to vector<24x1xf32>
    %131 = vector.broadcast %130 : vector<24x1xf32> to vector<24x24xf32>
    %132 = arith.subf %128, %131 : vector<24x24xf32>
    %133 = math.exp %132 : vector<24x24xf32>
    %cst_46 = arith.constant dense<0.000000e+00> : vector<24xf32>
    %134 = vector.multi_reduction <add>, %133, %cst_46 [1] : vector<24x24xf32> to vector<24xf32>
    %135 = vector.shape_cast %134 : vector<24xf32> to vector<24x1xf32>
    %136 = tpu.reciprocal %135 {approx = true} : vector<24x1xf32> -> vector<24x1xf32>
    %137 = vector.broadcast %136 : vector<24x1xf32> to vector<24x24xf32>
    %138 = arith.mulf %133, %137 : vector<24x24xf32>
    %cst_47 = arith.constant dense<0.000000e+00> : vector<24x16xf32>
    %139 = tpu.matmul %138, %124, %cst_47 {dimension_numbers = #tpu.dot_dimension_numbers<[1], [0], [0], [1], [0, 0, 1, 1], [], []>} : vector<24x24xf32>, vector<24x16xf32>, vector<24x16xf32> -> vector<24x16xf32>
    %140 = tpu.concatenate %121, %139 in 1 : vector<24x16xf32>, vector<24x16xf32> -> vector<24x32xf32>
    %141 = tpu.concatenate %100, %140 in 0 : vector<24x32xf32>, vector<24x32xf32> -> vector<48x32xf32>
    %142 = vector.extract_strided_slice %31 {offsets = [0, 96], sizes = [32, 32], strides = [1, 1]} : vector<32x128xf32> to vector<32x32xf32>
    %cst_48 = arith.constant dense<0.000000e+00> : vector<48x32xf32>
    %143 = tpu.matmul %141, %142, %cst_48 {dimension_numbers = #tpu.dot_dimension_numbers<[1], [0], [0], [1], [0, 0, 1, 1], [], []>} : vector<48x32xf32>, vector<32x32xf32>, vector<48x32xf32> -> vector<48x32xf32>
    %144 = arith.addf %29, %143 : vector<48x32xf32>
    %c9 = arith.constant 9 : index
    %c0_49 = arith.constant 0 : index
    %145 = vector.load %arg6[%c9, %c0_49] : memref<64x128xf32, #tpu.memory_space<vmem>>, vector<1x32xf32>
    %146 = vector.broadcast %145 : vector<1x32xf32> to vector<48x32xf32>
    %147 = arith.addf %144, %146 : vector<48x32xf32>
    %c6 = arith.constant 6 : index
    %c0_50 = arith.constant 0 : index
    %148 = vector.load %arg6[%c6, %c0_50] : memref<64x128xf32, #tpu.memory_space<vmem>>, vector<1x32xf32>
    %c7 = arith.constant 7 : index
    %c0_51 = arith.constant 0 : index
    %149 = vector.load %arg6[%c7, %c0_51] : memref<64x128xf32, #tpu.memory_space<vmem>>, vector<1x32xf32>
    %cst_52 = arith.constant dense<0.000000e+00> : vector<48xf32>
    %150 = vector.multi_reduction <add>, %147, %cst_52 [1] : vector<48x32xf32> to vector<48xf32>
    %151 = vector.shape_cast %150 : vector<48xf32> to vector<48x1xf32>
    %cst_53 = arith.constant 3.200000e+01 : f32
    %152 = vector.broadcast %cst_53 : f32 to vector<48x1xf32>
    %153 = arith.divf %151, %152 : vector<48x1xf32>
    %154 = vector.broadcast %153 : vector<48x1xf32> to vector<48x32xf32>
    %155 = arith.subf %147, %154 : vector<48x32xf32>
    %156 = arith.mulf %155, %155 : vector<48x32xf32>
    %cst_54 = arith.constant dense<0.000000e+00> : vector<48xf32>
    %157 = vector.multi_reduction <add>, %156, %cst_54 [1] : vector<48x32xf32> to vector<48xf32>
    %158 = vector.shape_cast %157 : vector<48xf32> to vector<48x1xf32>
    %cst_55 = arith.constant 3.200000e+01 : f32
    %159 = vector.broadcast %cst_55 : f32 to vector<48x1xf32>
    %160 = arith.divf %158, %159 : vector<48x1xf32>
    %161 = vector.broadcast %153 : vector<48x1xf32> to vector<48x32xf32>
    %162 = arith.subf %147, %161 : vector<48x32xf32>
    %cst_56 = arith.constant 9.99999974E-6 : f32
    %163 = vector.broadcast %cst_56 : f32 to vector<48x1xf32>
    %164 = arith.addf %160, %163 : vector<48x1xf32>
    %165 = math.rsqrt %164 : vector<48x1xf32>
    %166 = vector.broadcast %165 : vector<48x1xf32> to vector<48x32xf32>
    %167 = arith.mulf %162, %166 : vector<48x32xf32>
    %168 = vector.broadcast %148 : vector<1x32xf32> to vector<48x32xf32>
    %169 = arith.mulf %167, %168 : vector<48x32xf32>
    %170 = vector.broadcast %149 : vector<1x32xf32> to vector<48x32xf32>
    %171 = arith.addf %169, %170 : vector<48x32xf32>
    %c0_57 = arith.constant 0 : index
    %c0_58 = arith.constant 0 : index
    %c0_59 = arith.constant 0 : index
    %172 = vector.load %arg4[%c0_57, %c0_58, %c0_59] : memref<2x32x128xf32, #tpu.memory_space<vmem>>, vector<1x32x128xf32>
    %173 = vector.shape_cast %172 : vector<1x32x128xf32> to vector<32x128xf32>
    %cst_60 = arith.constant dense<0.000000e+00> : vector<48x128xf32>
    %174 = tpu.matmul %171, %173, %cst_60 {dimension_numbers = #tpu.dot_dimension_numbers<[1], [0], [0], [1], [0, 0, 1, 1], [], []>} : vector<48x32xf32>, vector<32x128xf32>, vector<48x128xf32> -> vector<48x128xf32>
    %c10 = arith.constant 10 : index
    %c0_61 = arith.constant 0 : index
    %175 = vector.load %arg6[%c10, %c0_61] : memref<64x128xf32, #tpu.memory_space<vmem>>, vector<1x128xf32>
    %176 = vector.broadcast %175 : vector<1x128xf32> to vector<48x128xf32>
    %177 = arith.addf %174, %176 : vector<48x128xf32>
    %178 = arith.mulf %177, %177 : vector<48x128xf32>
    %179 = arith.mulf %177, %178 : vector<48x128xf32>
    %cst_62 = arith.constant 4.471500e-02 : f32
    %180 = vector.broadcast %cst_62 : f32 to vector<48x128xf32>
    %181 = arith.mulf %180, %179 : vector<48x128xf32>
    %182 = arith.addf %177, %181 : vector<48x128xf32>
    %cst_63 = arith.constant 0.797884583 : f32
    %183 = vector.broadcast %cst_63 : f32 to vector<48x128xf32>
    %184 = arith.mulf %183, %182 : vector<48x128xf32>
    %185 = math.tanh %184 : vector<48x128xf32>
    %cst_64 = arith.constant 1.000000e+00 : f32
    %186 = vector.broadcast %cst_64 : f32 to vector<48x128xf32>
    %187 = arith.addf %186, %185 : vector<48x128xf32>
    %cst_65 = arith.constant 5.000000e-01 : f32
    %188 = vector.broadcast %cst_65 : f32 to vector<48x128xf32>
    %189 = arith.mulf %188, %187 : vector<48x128xf32>
    %190 = arith.mulf %177, %189 : vector<48x128xf32>
    %c0_66 = arith.constant 0 : index
    %c0_67 = arith.constant 0 : index
    %c0_68 = arith.constant 0 : index
    %191 = vector.load %arg5[%c0_66, %c0_67, %c0_68] : memref<2x128x32xf32, #tpu.memory_space<vmem>>, vector<1x128x32xf32>
    %192 = vector.shape_cast %191 : vector<1x128x32xf32> to vector<128x32xf32>
    %cst_69 = arith.constant dense<0.000000e+00> : vector<48x32xf32>
    %193 = tpu.matmul %190, %192, %cst_69 {dimension_numbers = #tpu.dot_dimension_numbers<[1], [0], [0], [1], [0, 0, 1, 1], [], []>} : vector<48x128xf32>, vector<128x32xf32>, vector<48x32xf32> -> vector<48x32xf32>
    %194 = arith.addf %147, %193 : vector<48x32xf32>
    %c11 = arith.constant 11 : index
    %c0_70 = arith.constant 0 : index
    %195 = vector.load %arg6[%c11, %c0_70] : memref<64x128xf32, #tpu.memory_space<vmem>>, vector<1x32xf32>
    %196 = vector.broadcast %195 : vector<1x32xf32> to vector<48x32xf32>
    %197 = arith.addf %194, %196 : vector<48x32xf32>
    %c1_71 = arith.constant 1 : index
    %c0_72 = arith.constant 0 : index
    %c0_73 = arith.constant 0 : index
    %198 = vector.load %arg3[%c1_71, %c0_72, %c0_73] : memref<2x32x128xf32, #tpu.memory_space<vmem>>, vector<1x32x128xf32>
    %199 = vector.shape_cast %198 : vector<1x32x128xf32> to vector<32x128xf32>
    %c12 = arith.constant 12 : index
    %c0_74 = arith.constant 0 : index
    %200 = vector.load %arg6[%c12, %c0_74] : memref<64x128xf32, #tpu.memory_space<vmem>>, vector<1x32xf32>
    %c13 = arith.constant 13 : index
    %c0_75 = arith.constant 0 : index
    %201 = vector.load %arg6[%c13, %c0_75] : memref<64x128xf32, #tpu.memory_space<vmem>>, vector<1x32xf32>
    %cst_76 = arith.constant dense<0.000000e+00> : vector<48xf32>
    %202 = vector.multi_reduction <add>, %197, %cst_76 [1] : vector<48x32xf32> to vector<48xf32>
    %203 = vector.shape_cast %202 : vector<48xf32> to vector<48x1xf32>
    %cst_77 = arith.constant 3.200000e+01 : f32
    %204 = vector.broadcast %cst_77 : f32 to vector<48x1xf32>
    %205 = arith.divf %203, %204 : vector<48x1xf32>
    %206 = vector.broadcast %205 : vector<48x1xf32> to vector<48x32xf32>
    %207 = arith.subf %197, %206 : vector<48x32xf32>
    %208 = arith.mulf %207, %207 : vector<48x32xf32>
    %cst_78 = arith.constant dense<0.000000e+00> : vector<48xf32>
    %209 = vector.multi_reduction <add>, %208, %cst_78 [1] : vector<48x32xf32> to vector<48xf32>
    %210 = vector.shape_cast %209 : vector<48xf32> to vector<48x1xf32>
    %cst_79 = arith.constant 3.200000e+01 : f32
    %211 = vector.broadcast %cst_79 : f32 to vector<48x1xf32>
    %212 = arith.divf %210, %211 : vector<48x1xf32>
    %213 = vector.broadcast %205 : vector<48x1xf32> to vector<48x32xf32>
    %214 = arith.subf %197, %213 : vector<48x32xf32>
    %cst_80 = arith.constant 9.99999974E-6 : f32
    %215 = vector.broadcast %cst_80 : f32 to vector<48x1xf32>
    %216 = arith.addf %212, %215 : vector<48x1xf32>
    %217 = math.rsqrt %216 : vector<48x1xf32>
    %218 = vector.broadcast %217 : vector<48x1xf32> to vector<48x32xf32>
    %219 = arith.mulf %214, %218 : vector<48x32xf32>
    %220 = vector.broadcast %200 : vector<1x32xf32> to vector<48x32xf32>
    %221 = arith.mulf %219, %220 : vector<48x32xf32>
    %222 = vector.broadcast %201 : vector<1x32xf32> to vector<48x32xf32>
    %223 = arith.addf %221, %222 : vector<48x32xf32>
    %224 = vector.extract_strided_slice %199 {offsets = [0, 0], sizes = [32, 96], strides = [1, 1]} : vector<32x128xf32> to vector<32x96xf32>
    %cst_81 = arith.constant dense<0.000000e+00> : vector<48x96xf32>
    %225 = tpu.matmul %223, %224, %cst_81 {dimension_numbers = #tpu.dot_dimension_numbers<[1], [0], [0], [1], [0, 0, 1, 1], [], []>} : vector<48x32xf32>, vector<32x96xf32>, vector<48x96xf32> -> vector<48x96xf32>
    %c16 = arith.constant 16 : index
    %c0_82 = arith.constant 0 : index
    %226 = vector.load %arg6[%c16, %c0_82] : memref<64x128xf32, #tpu.memory_space<vmem>>, vector<1x96xf32>
    %227 = vector.broadcast %226 : vector<1x96xf32> to vector<48x96xf32>
    %228 = arith.addf %225, %227 : vector<48x96xf32>
    %229 = vector.extract_strided_slice %228 {offsets = [0, 0], sizes = [24, 96], strides = [1, 1]} : vector<48x96xf32> to vector<24x96xf32>
    %c0_83 = arith.constant 0 : index
    %c0_84 = arith.constant 0 : index
    %c0_85 = arith.constant 0 : index
    %230 = vector.load %arg2[%c0_83, %c0_84, %c0_85] : memref<2x24x24xf32, #tpu.memory_space<vmem>>, vector<1x24x24xf32>
    %231 = vector.shape_cast %230 : vector<1x24x24xf32> to vector<24x24xf32>
    %232 = vector.extract_strided_slice %229 {offsets = [0, 0], sizes = [24, 16], strides = [1, 1]} : vector<24x96xf32> to vector<24x16xf32>
    %233 = vector.extract_strided_slice %229 {offsets = [0, 32], sizes = [24, 16], strides = [1, 1]} : vector<24x96xf32> to vector<24x16xf32>
    %234 = vector.extract_strided_slice %229 {offsets = [0, 64], sizes = [24, 16], strides = [1, 1]} : vector<24x96xf32> to vector<24x16xf32>
    %cst_86 = arith.constant dense<0.000000e+00> : vector<24x24xf32>
    %235 = tpu.matmul %232, %233, %cst_86 {dimension_numbers = #tpu.dot_dimension_numbers<[1], [1], [0], [0], [0, 0, 1, 0], [], []>} : vector<24x16xf32>, vector<24x16xf32>, vector<24x24xf32> -> vector<24x24xf32>
    %cst_87 = arith.constant 2.500000e-01 : f32
    %236 = vector.broadcast %cst_87 : f32 to vector<24x24xf32>
    %237 = arith.mulf %235, %236 : vector<24x24xf32>
    %238 = arith.addf %237, %231 : vector<24x24xf32>
    %cst_88 = arith.constant dense<0xFF800000> : vector<24xf32>
    %239 = vector.multi_reduction <maximumf>, %238, %cst_88 [1] : vector<24x24xf32> to vector<24xf32>
    %240 = vector.shape_cast %239 : vector<24xf32> to vector<24x1xf32>
    %241 = vector.broadcast %240 : vector<24x1xf32> to vector<24x24xf32>
    %242 = arith.subf %238, %241 : vector<24x24xf32>
    %243 = math.exp %242 : vector<24x24xf32>
    %cst_89 = arith.constant dense<0.000000e+00> : vector<24xf32>
    %244 = vector.multi_reduction <add>, %243, %cst_89 [1] : vector<24x24xf32> to vector<24xf32>
    %245 = vector.shape_cast %244 : vector<24xf32> to vector<24x1xf32>
    %246 = tpu.reciprocal %245 {approx = true} : vector<24x1xf32> -> vector<24x1xf32>
    %247 = vector.broadcast %246 : vector<24x1xf32> to vector<24x24xf32>
    %248 = arith.mulf %243, %247 : vector<24x24xf32>
    %cst_90 = arith.constant dense<0.000000e+00> : vector<24x16xf32>
    %249 = tpu.matmul %248, %234, %cst_90 {dimension_numbers = #tpu.dot_dimension_numbers<[1], [0], [0], [1], [0, 0, 1, 1], [], []>} : vector<24x24xf32>, vector<24x16xf32>, vector<24x16xf32> -> vector<24x16xf32>
    %250 = vector.extract_strided_slice %229 {offsets = [0, 16], sizes = [24, 16], strides = [1, 1]} : vector<24x96xf32> to vector<24x16xf32>
    %251 = vector.extract_strided_slice %229 {offsets = [0, 48], sizes = [24, 16], strides = [1, 1]} : vector<24x96xf32> to vector<24x16xf32>
    %252 = vector.extract_strided_slice %229 {offsets = [0, 80], sizes = [24, 16], strides = [1, 1]} : vector<24x96xf32> to vector<24x16xf32>
    %cst_91 = arith.constant dense<0.000000e+00> : vector<24x24xf32>
    %253 = tpu.matmul %250, %251, %cst_91 {dimension_numbers = #tpu.dot_dimension_numbers<[1], [1], [0], [0], [0, 0, 1, 0], [], []>} : vector<24x16xf32>, vector<24x16xf32>, vector<24x24xf32> -> vector<24x24xf32>
    %cst_92 = arith.constant 2.500000e-01 : f32
    %254 = vector.broadcast %cst_92 : f32 to vector<24x24xf32>
    %255 = arith.mulf %253, %254 : vector<24x24xf32>
    %256 = arith.addf %255, %231 : vector<24x24xf32>
    %cst_93 = arith.constant dense<0xFF800000> : vector<24xf32>
    %257 = vector.multi_reduction <maximumf>, %256, %cst_93 [1] : vector<24x24xf32> to vector<24xf32>
    %258 = vector.shape_cast %257 : vector<24xf32> to vector<24x1xf32>
    %259 = vector.broadcast %258 : vector<24x1xf32> to vector<24x24xf32>
    %260 = arith.subf %256, %259 : vector<24x24xf32>
    %261 = math.exp %260 : vector<24x24xf32>
    %cst_94 = arith.constant dense<0.000000e+00> : vector<24xf32>
    %262 = vector.multi_reduction <add>, %261, %cst_94 [1] : vector<24x24xf32> to vector<24xf32>
    %263 = vector.shape_cast %262 : vector<24xf32> to vector<24x1xf32>
    %264 = tpu.reciprocal %263 {approx = true} : vector<24x1xf32> -> vector<24x1xf32>
    %265 = vector.broadcast %264 : vector<24x1xf32> to vector<24x24xf32>
    %266 = arith.mulf %261, %265 : vector<24x24xf32>
    %cst_95 = arith.constant dense<0.000000e+00> : vector<24x16xf32>
    %267 = tpu.matmul %266, %252, %cst_95 {dimension_numbers = #tpu.dot_dimension_numbers<[1], [0], [0], [1], [0, 0, 1, 1], [], []>} : vector<24x24xf32>, vector<24x16xf32>, vector<24x16xf32> -> vector<24x16xf32>
    %268 = tpu.concatenate %249, %267 in 1 : vector<24x16xf32>, vector<24x16xf32> -> vector<24x32xf32>
    %269 = vector.extract_strided_slice %228 {offsets = [24, 0], sizes = [24, 96], strides = [1, 1]} : vector<48x96xf32> to vector<24x96xf32>
    %c1_96 = arith.constant 1 : index
    %c0_97 = arith.constant 0 : index
    %c0_98 = arith.constant 0 : index
    %270 = vector.load %arg2[%c1_96, %c0_97, %c0_98] : memref<2x24x24xf32, #tpu.memory_space<vmem>>, vector<1x24x24xf32>
    %271 = vector.shape_cast %270 : vector<1x24x24xf32> to vector<24x24xf32>
    %272 = vector.extract_strided_slice %269 {offsets = [0, 0], sizes = [24, 16], strides = [1, 1]} : vector<24x96xf32> to vector<24x16xf32>
    %273 = vector.extract_strided_slice %269 {offsets = [0, 32], sizes = [24, 16], strides = [1, 1]} : vector<24x96xf32> to vector<24x16xf32>
    %274 = vector.extract_strided_slice %269 {offsets = [0, 64], sizes = [24, 16], strides = [1, 1]} : vector<24x96xf32> to vector<24x16xf32>
    %cst_99 = arith.constant dense<0.000000e+00> : vector<24x24xf32>
    %275 = tpu.matmul %272, %273, %cst_99 {dimension_numbers = #tpu.dot_dimension_numbers<[1], [1], [0], [0], [0, 0, 1, 0], [], []>} : vector<24x16xf32>, vector<24x16xf32>, vector<24x24xf32> -> vector<24x24xf32>
    %cst_100 = arith.constant 2.500000e-01 : f32
    %276 = vector.broadcast %cst_100 : f32 to vector<24x24xf32>
    %277 = arith.mulf %275, %276 : vector<24x24xf32>
    %278 = arith.addf %277, %271 : vector<24x24xf32>
    %cst_101 = arith.constant dense<0xFF800000> : vector<24xf32>
    %279 = vector.multi_reduction <maximumf>, %278, %cst_101 [1] : vector<24x24xf32> to vector<24xf32>
    %280 = vector.shape_cast %279 : vector<24xf32> to vector<24x1xf32>
    %281 = vector.broadcast %280 : vector<24x1xf32> to vector<24x24xf32>
    %282 = arith.subf %278, %281 : vector<24x24xf32>
    %283 = math.exp %282 : vector<24x24xf32>
    %cst_102 = arith.constant dense<0.000000e+00> : vector<24xf32>
    %284 = vector.multi_reduction <add>, %283, %cst_102 [1] : vector<24x24xf32> to vector<24xf32>
    %285 = vector.shape_cast %284 : vector<24xf32> to vector<24x1xf32>
    %286 = tpu.reciprocal %285 {approx = true} : vector<24x1xf32> -> vector<24x1xf32>
    %287 = vector.broadcast %286 : vector<24x1xf32> to vector<24x24xf32>
    %288 = arith.mulf %283, %287 : vector<24x24xf32>
    %cst_103 = arith.constant dense<0.000000e+00> : vector<24x16xf32>
    %289 = tpu.matmul %288, %274, %cst_103 {dimension_numbers = #tpu.dot_dimension_numbers<[1], [0], [0], [1], [0, 0, 1, 1], [], []>} : vector<24x24xf32>, vector<24x16xf32>, vector<24x16xf32> -> vector<24x16xf32>
    %290 = vector.extract_strided_slice %269 {offsets = [0, 16], sizes = [24, 16], strides = [1, 1]} : vector<24x96xf32> to vector<24x16xf32>
    %291 = vector.extract_strided_slice %269 {offsets = [0, 48], sizes = [24, 16], strides = [1, 1]} : vector<24x96xf32> to vector<24x16xf32>
    %292 = vector.extract_strided_slice %269 {offsets = [0, 80], sizes = [24, 16], strides = [1, 1]} : vector<24x96xf32> to vector<24x16xf32>
    %cst_104 = arith.constant dense<0.000000e+00> : vector<24x24xf32>
    %293 = tpu.matmul %290, %291, %cst_104 {dimension_numbers = #tpu.dot_dimension_numbers<[1], [1], [0], [0], [0, 0, 1, 0], [], []>} : vector<24x16xf32>, vector<24x16xf32>, vector<24x24xf32> -> vector<24x24xf32>
    %cst_105 = arith.constant 2.500000e-01 : f32
    %294 = vector.broadcast %cst_105 : f32 to vector<24x24xf32>
    %295 = arith.mulf %293, %294 : vector<24x24xf32>
    %296 = arith.addf %295, %271 : vector<24x24xf32>
    %cst_106 = arith.constant dense<0xFF800000> : vector<24xf32>
    %297 = vector.multi_reduction <maximumf>, %296, %cst_106 [1] : vector<24x24xf32> to vector<24xf32>
    %298 = vector.shape_cast %297 : vector<24xf32> to vector<24x1xf32>
    %299 = vector.broadcast %298 : vector<24x1xf32> to vector<24x24xf32>
    %300 = arith.subf %296, %299 : vector<24x24xf32>
    %301 = math.exp %300 : vector<24x24xf32>
    %cst_107 = arith.constant dense<0.000000e+00> : vector<24xf32>
    %302 = vector.multi_reduction <add>, %301, %cst_107 [1] : vector<24x24xf32> to vector<24xf32>
    %303 = vector.shape_cast %302 : vector<24xf32> to vector<24x1xf32>
    %304 = tpu.reciprocal %303 {approx = true} : vector<24x1xf32> -> vector<24x1xf32>
    %305 = vector.broadcast %304 : vector<24x1xf32> to vector<24x24xf32>
    %306 = arith.mulf %301, %305 : vector<24x24xf32>
    %cst_108 = arith.constant dense<0.000000e+00> : vector<24x16xf32>
    %307 = tpu.matmul %306, %292, %cst_108 {dimension_numbers = #tpu.dot_dimension_numbers<[1], [0], [0], [1], [0, 0, 1, 1], [], []>} : vector<24x24xf32>, vector<24x16xf32>, vector<24x16xf32> -> vector<24x16xf32>
    %308 = tpu.concatenate %289, %307 in 1 : vector<24x16xf32>, vector<24x16xf32> -> vector<24x32xf32>
    %309 = tpu.concatenate %268, %308 in 0 : vector<24x32xf32>, vector<24x32xf32> -> vector<48x32xf32>
    %310 = vector.extract_strided_slice %199 {offsets = [0, 96], sizes = [32, 32], strides = [1, 1]} : vector<32x128xf32> to vector<32x32xf32>
    %cst_109 = arith.constant dense<0.000000e+00> : vector<48x32xf32>
    %311 = tpu.matmul %309, %310, %cst_109 {dimension_numbers = #tpu.dot_dimension_numbers<[1], [0], [0], [1], [0, 0, 1, 1], [], []>} : vector<48x32xf32>, vector<32x32xf32>, vector<48x32xf32> -> vector<48x32xf32>
    %312 = arith.addf %197, %311 : vector<48x32xf32>
    %c17 = arith.constant 17 : index
    %c0_110 = arith.constant 0 : index
    %313 = vector.load %arg6[%c17, %c0_110] : memref<64x128xf32, #tpu.memory_space<vmem>>, vector<1x32xf32>
    %314 = vector.broadcast %313 : vector<1x32xf32> to vector<48x32xf32>
    %315 = arith.addf %312, %314 : vector<48x32xf32>
    %c14 = arith.constant 14 : index
    %c0_111 = arith.constant 0 : index
    %316 = vector.load %arg6[%c14, %c0_111] : memref<64x128xf32, #tpu.memory_space<vmem>>, vector<1x32xf32>
    %c15 = arith.constant 15 : index
    %c0_112 = arith.constant 0 : index
    %317 = vector.load %arg6[%c15, %c0_112] : memref<64x128xf32, #tpu.memory_space<vmem>>, vector<1x32xf32>
    %cst_113 = arith.constant dense<0.000000e+00> : vector<48xf32>
    %318 = vector.multi_reduction <add>, %315, %cst_113 [1] : vector<48x32xf32> to vector<48xf32>
    %319 = vector.shape_cast %318 : vector<48xf32> to vector<48x1xf32>
    %cst_114 = arith.constant 3.200000e+01 : f32
    %320 = vector.broadcast %cst_114 : f32 to vector<48x1xf32>
    %321 = arith.divf %319, %320 : vector<48x1xf32>
    %322 = vector.broadcast %321 : vector<48x1xf32> to vector<48x32xf32>
    %323 = arith.subf %315, %322 : vector<48x32xf32>
    %324 = arith.mulf %323, %323 : vector<48x32xf32>
    %cst_115 = arith.constant dense<0.000000e+00> : vector<48xf32>
    %325 = vector.multi_reduction <add>, %324, %cst_115 [1] : vector<48x32xf32> to vector<48xf32>
    %326 = vector.shape_cast %325 : vector<48xf32> to vector<48x1xf32>
    %cst_116 = arith.constant 3.200000e+01 : f32
    %327 = vector.broadcast %cst_116 : f32 to vector<48x1xf32>
    %328 = arith.divf %326, %327 : vector<48x1xf32>
    %329 = vector.broadcast %321 : vector<48x1xf32> to vector<48x32xf32>
    %330 = arith.subf %315, %329 : vector<48x32xf32>
    %cst_117 = arith.constant 9.99999974E-6 : f32
    %331 = vector.broadcast %cst_117 : f32 to vector<48x1xf32>
    %332 = arith.addf %328, %331 : vector<48x1xf32>
    %333 = math.rsqrt %332 : vector<48x1xf32>
    %334 = vector.broadcast %333 : vector<48x1xf32> to vector<48x32xf32>
    %335 = arith.mulf %330, %334 : vector<48x32xf32>
    %336 = vector.broadcast %316 : vector<1x32xf32> to vector<48x32xf32>
    %337 = arith.mulf %335, %336 : vector<48x32xf32>
    %338 = vector.broadcast %317 : vector<1x32xf32> to vector<48x32xf32>
    %339 = arith.addf %337, %338 : vector<48x32xf32>
    %c1_118 = arith.constant 1 : index
    %c0_119 = arith.constant 0 : index
    %c0_120 = arith.constant 0 : index
    %340 = vector.load %arg4[%c1_118, %c0_119, %c0_120] : memref<2x32x128xf32, #tpu.memory_space<vmem>>, vector<1x32x128xf32>
    %341 = vector.shape_cast %340 : vector<1x32x128xf32> to vector<32x128xf32>
    %cst_121 = arith.constant dense<0.000000e+00> : vector<48x128xf32>
    %342 = tpu.matmul %339, %341, %cst_121 {dimension_numbers = #tpu.dot_dimension_numbers<[1], [0], [0], [1], [0, 0, 1, 1], [], []>} : vector<48x32xf32>, vector<32x128xf32>, vector<48x128xf32> -> vector<48x128xf32>
    %c18 = arith.constant 18 : index
    %c0_122 = arith.constant 0 : index
    %343 = vector.load %arg6[%c18, %c0_122] : memref<64x128xf32, #tpu.memory_space<vmem>>, vector<1x128xf32>
    %344 = vector.broadcast %343 : vector<1x128xf32> to vector<48x128xf32>
    %345 = arith.addf %342, %344 : vector<48x128xf32>
    %346 = arith.mulf %345, %345 : vector<48x128xf32>
    %347 = arith.mulf %345, %346 : vector<48x128xf32>
    %cst_123 = arith.constant 4.471500e-02 : f32
    %348 = vector.broadcast %cst_123 : f32 to vector<48x128xf32>
    %349 = arith.mulf %348, %347 : vector<48x128xf32>
    %350 = arith.addf %345, %349 : vector<48x128xf32>
    %cst_124 = arith.constant 0.797884583 : f32
    %351 = vector.broadcast %cst_124 : f32 to vector<48x128xf32>
    %352 = arith.mulf %351, %350 : vector<48x128xf32>
    %353 = math.tanh %352 : vector<48x128xf32>
    %cst_125 = arith.constant 1.000000e+00 : f32
    %354 = vector.broadcast %cst_125 : f32 to vector<48x128xf32>
    %355 = arith.addf %354, %353 : vector<48x128xf32>
    %cst_126 = arith.constant 5.000000e-01 : f32
    %356 = vector.broadcast %cst_126 : f32 to vector<48x128xf32>
    %357 = arith.mulf %356, %355 : vector<48x128xf32>
    %358 = arith.mulf %345, %357 : vector<48x128xf32>
    %c1_127 = arith.constant 1 : index
    %c0_128 = arith.constant 0 : index
    %c0_129 = arith.constant 0 : index
    %359 = vector.load %arg5[%c1_127, %c0_128, %c0_129] : memref<2x128x32xf32, #tpu.memory_space<vmem>>, vector<1x128x32xf32>
    %360 = vector.shape_cast %359 : vector<1x128x32xf32> to vector<128x32xf32>
    %cst_130 = arith.constant dense<0.000000e+00> : vector<48x32xf32>
    %361 = tpu.matmul %358, %360, %cst_130 {dimension_numbers = #tpu.dot_dimension_numbers<[1], [0], [0], [1], [0, 0, 1, 1], [], []>} : vector<48x128xf32>, vector<128x32xf32>, vector<48x32xf32> -> vector<48x32xf32>
    %362 = arith.addf %315, %361 : vector<48x32xf32>
    %c19 = arith.constant 19 : index
    %c0_131 = arith.constant 0 : index
    %363 = vector.load %arg6[%c19, %c0_131] : memref<64x128xf32, #tpu.memory_space<vmem>>, vector<1x32xf32>
    %364 = vector.broadcast %363 : vector<1x32xf32> to vector<48x32xf32>
    %365 = arith.addf %362, %364 : vector<48x32xf32>
    %c2 = arith.constant 2 : index
    %c0_132 = arith.constant 0 : index
    %366 = vector.load %arg6[%c2, %c0_132] : memref<64x128xf32, #tpu.memory_space<vmem>>, vector<1x32xf32>
    %c3 = arith.constant 3 : index
    %c0_133 = arith.constant 0 : index
    %367 = vector.load %arg6[%c3, %c0_133] : memref<64x128xf32, #tpu.memory_space<vmem>>, vector<1x32xf32>
    %cst_134 = arith.constant dense<0.000000e+00> : vector<48xf32>
    %368 = vector.multi_reduction <add>, %365, %cst_134 [1] : vector<48x32xf32> to vector<48xf32>
    %369 = vector.shape_cast %368 : vector<48xf32> to vector<48x1xf32>
    %cst_135 = arith.constant 3.200000e+01 : f32
    %370 = vector.broadcast %cst_135 : f32 to vector<48x1xf32>
    %371 = arith.divf %369, %370 : vector<48x1xf32>
    %372 = vector.broadcast %371 : vector<48x1xf32> to vector<48x32xf32>
    %373 = arith.subf %365, %372 : vector<48x32xf32>
    %374 = arith.mulf %373, %373 : vector<48x32xf32>
    %cst_136 = arith.constant dense<0.000000e+00> : vector<48xf32>
    %375 = vector.multi_reduction <add>, %374, %cst_136 [1] : vector<48x32xf32> to vector<48xf32>
    %376 = vector.shape_cast %375 : vector<48xf32> to vector<48x1xf32>
    %cst_137 = arith.constant 3.200000e+01 : f32
    %377 = vector.broadcast %cst_137 : f32 to vector<48x1xf32>
    %378 = arith.divf %376, %377 : vector<48x1xf32>
    %379 = vector.broadcast %371 : vector<48x1xf32> to vector<48x32xf32>
    %380 = arith.subf %365, %379 : vector<48x32xf32>
    %cst_138 = arith.constant 9.99999974E-6 : f32
    %381 = vector.broadcast %cst_138 : f32 to vector<48x1xf32>
    %382 = arith.addf %378, %381 : vector<48x1xf32>
    %383 = math.rsqrt %382 : vector<48x1xf32>
    %384 = vector.broadcast %383 : vector<48x1xf32> to vector<48x32xf32>
    %385 = arith.mulf %380, %384 : vector<48x32xf32>
    %386 = vector.broadcast %366 : vector<1x32xf32> to vector<48x32xf32>
    %387 = arith.mulf %385, %386 : vector<48x32xf32>
    %388 = vector.broadcast %367 : vector<1x32xf32> to vector<48x32xf32>
    %389 = arith.addf %387, %388 : vector<48x32xf32>
    %c32 = arith.constant 32 : index
    %c0_139 = arith.constant 0 : index
    %390 = vector.load %arg6[%c32, %c0_139] : memref<64x128xf32, #tpu.memory_space<vmem>>, vector<32x128xf32>
    %cst_140 = arith.constant dense<0.000000e+00> : vector<48x128xf32>
    %391 = tpu.matmul %389, %390, %cst_140 {dimension_numbers = #tpu.dot_dimension_numbers<[1], [0], [0], [1], [0, 0, 1, 1], [], []>} : vector<48x32xf32>, vector<32x128xf32>, vector<48x128xf32> -> vector<48x128xf32>
    %c20 = arith.constant 20 : index
    %c0_141 = arith.constant 0 : index
    %392 = vector.load %arg6[%c20, %c0_141] : memref<64x128xf32, #tpu.memory_space<vmem>>, vector<1x128xf32>
    %393 = vector.broadcast %392 : vector<1x128xf32> to vector<48x128xf32>
    %394 = arith.addf %391, %393 : vector<48x128xf32>
    %395 = tpu.iota {dimensions = array<i32: 1>} : vector<48x128xi32>
    %c5_i32 = arith.constant 5 : i32
    %396 = vector.broadcast %c5_i32 : i32 to vector<48x128xi32>
    %397 = arith.cmpi sge, %395, %396 : vector<48x128xi32>
    %c8_i32 = arith.constant 8 : i32
    %398 = vector.broadcast %c8_i32 : i32 to vector<48x128xi32>
    %399 = arith.cmpi slt, %395, %398 : vector<48x128xi32>
    %400 = arith.andi %397, %399 : vector<48x128xi1>
    %401 = math.tanh %394 : vector<48x128xf32>
    %402 = arith.select %400, %401, %394 : vector<48x128xi1>, vector<48x128xf32>
    %c0_142 = arith.constant 0 : index
    %c0_143 = arith.constant 0 : index
    %403 = vector.load %arg7[%c0_142, %c0_143] : memref<48x128xf32, #tpu.memory_space<vmem>>, vector<48x128xf32>
    tpu.vector_store %arg7[%c0_142, %c0_143], %402 {strides = array<i32>} : memref<48x128xf32, #tpu.memory_space<vmem>>, vector<48x128xf32>,
    return
  }
  func.func @transform_0(%arg0: i32) -> (i32, i32) {
    %c0_i32 = arith.constant 0 : i32
    %c0_i32_0 = arith.constant 0 : i32
    %c0_i32_1 = arith.constant 0 : i32
    return %c0_i32, %c0_i32_0 : i32, i32
  }
  func.func @transform_1(%arg0: i32) -> (i32, i32, i32) {
    %c0_i32 = arith.constant 0 : i32
    %c0_i32_0 = arith.constant 0 : i32
    %c0_i32_1 = arith.constant 0 : i32
    %c0_i32_2 = arith.constant 0 : i32
    return %c0_i32, %c0_i32_0, %c0_i32_1 : i32, i32, i32
  }
  func.func @transform_2(%arg0: i32) -> (i32, i32, i32) {
    %c0_i32 = arith.constant 0 : i32
    %c0_i32_0 = arith.constant 0 : i32
    %c0_i32_1 = arith.constant 0 : i32
    %c0_i32_2 = arith.constant 0 : i32
    return %c0_i32, %c0_i32_0, %c0_i32_1 : i32, i32, i32
  }
  func.func @transform_3(%arg0: i32) -> (i32, i32, i32) {
    %c0_i32 = arith.constant 0 : i32
    %c0_i32_0 = arith.constant 0 : i32
    %c0_i32_1 = arith.constant 0 : i32
    %c0_i32_2 = arith.constant 0 : i32
    return %c0_i32, %c0_i32_0, %c0_i32_1 : i32, i32, i32
  }
  func.func @transform_4(%arg0: i32) -> (i32, i32, i32) {
    %c0_i32 = arith.constant 0 : i32
    %c0_i32_0 = arith.constant 0 : i32
    %c0_i32_1 = arith.constant 0 : i32
    %c0_i32_2 = arith.constant 0 : i32
    return %c0_i32, %c0_i32_0, %c0_i32_1 : i32, i32, i32
  }
  func.func @transform_5(%arg0: i32) -> (i32, i32) {
    %c0_i32 = arith.constant 0 : i32
    %c0_i32_0 = arith.constant 0 : i32
    %c0_i32_1 = arith.constant 0 : i32
    return %c0_i32, %c0_i32_0 : i32, i32
  }
  func.func @transform_6(%arg0: i32) -> (i32, i32) {
    %c0_i32 = arith.constant 0 : i32
    %c0_i32_0 = arith.constant 0 : i32
    %c0_i32_1 = arith.constant 0 : i32
    return %c0_i32, %c0_i32_0 : i32, i32
  }
}

</mosaic_0001>

<bundles_post_ra>
// kernel: tpu_custom_call.1
= control target key start
LH: loop header
LB: loop body
LE: loop exit
PB: predicated region body
PF: predicated region fallthrough
CT: control target
= control target key end

     0   :  { %vm69_vm0 = vcmask 1042432   ;;  %vm56_vm1 = vcmask 89088   ;;  %s5149_s7 = smov 117   ;;  %s6469_s0 = inlined_call_operand.vmem [shape: f32[48,43], index: 0, kind: input, shape index: {}]   ;;  %s6470_s1 = inlined_call_operand.vmem [shape: f32[2,24,24], index: 1, kind: input, shape index: {}]   ;;  %s6471_s2 = inlined_call_operand.vmem [shape: f32[2,32,128], index: 2, kind: input, shape index: {}]   ;;  %s6472_s3 = inlined_call_operand.vmem [shape: f32[2,32,128], index: 3, kind: input, shape index: {}]   ;;  %s6473_s4 = inlined_call_operand.vmem [shape: f32[2,128,32], index: 4, kind: input, shape index: {}]   ;;  %s6474_s5 = inlined_call_operand.vmem [shape: f32[64,128], index: 5, kind: input, shape index: {}]   ;;  %s6475_s6 = inlined_call_operand.hbm [shape: f32[48,128], index: 6, kind: output, shape index: {}]  }
   0x1   :  { %v31_v0 = vld [vmem:[%s6474_s5 + $0x1d] sm:$0x7]  ;;  %v30_v1 = vld [vmem:[%s6474_s5 + $0x15] sm:$0xff]  ;;  %v24_v2 = vld [vmem:[%s6469_s0] sm:$0xff] }
   0x2   :  { %4450 = vmatprep.subr.msk.mxu1 %vm69_vm0, %v31_v0  ;;  %4454 = vmatprep.mubr.msk.f32.mxu1 %vm56_vm1, %v24_v2  ;;  %v25_v3 = vld [vmem:[%s6469_s0 + $0x8] sm:$0xff]  ;;  %v26_v4 = vld [vmem:[%s6469_s0 + $0x10] sm:$0xff] }
   0x3   :  { %4451 = vmatpush3.msk.msra.mxu1 %vm69_vm0, %v31_v0  ;;  %38 = vrot.lane.b32.xlu0 %v24_v2, %s5149_s7 }
   0x4   :  { %11 = vsyncpa [#allocation3], 0  ;;  %4452 = vmatprep.subr.mxu1 %v30_v1  ;;  %42 = vrot.lane.b32.xlu1 %v26_v4, %s5149_s7  ;;  %v27_v5 = vld [vmem:[%s6469_s0 + $0x18] sm:$0xff]  ;;  %v28_v6 = vld [vmem:[%s6469_s0 + $0x20] sm:$0xff]  ;;  %vm170_vm2 = vcmask 261120   ;;  %s5152_s8 = smov 80  }
   0x5   :  { %4453 = vmatpush3.msra.mxu1 %v30_v1  ;;  %v29_v7 = vld [vmem:[%s6469_s0 + $0x28] sm:$0xff]  ;;  %vm5153_vm3 = vmmov 0   ;;  %s5154_s9 = smov 112   ;;  %s5155_s10 = smov 64   ;;  %vm504_vm4 = vcmask 130048   ;;  %vm603_vm5 = vcmask 195584  }
   0x6   :  { %4455 = vmatmul.mubr.msk.f32.vlgmr.msra.gmra.mxu1 %vm56_vm1, %v25_v3  ;;  %s5156_s11 = smov 48   ;;  %s5157_s23 = smov 32  }
   0x7   :  { %4457 = vmatprep.mubr.msk.f32.mxu1 %vm56_vm1, %v26_v4  ;;  %40 = vrot.lane.b32.xlu0 %v25_v3, %s5149_s7  ;;  %s5158_s24 = smov 16  }
   0x8   :  { %44 = vrot.lane.b32.xlu1 %v27_v5, %s5149_s7 }
   0xa   :  { %4458 = vmatmul.mubr.msk.f32.gmra.mxu1 %vm56_vm1, %v27_v5 }
   0xb   :  { %4460 = vmatprep.mubr.msk.f32.mxu1 %vm56_vm1, %v28_v6  ;;  %46 = vrot.lane.b32.xlu0 %v28_v6, %s5149_s7 }
   0xc   :  { %48 = vrot.lane.b32.xlu1 %v29_v7, %s5149_s7  ;;  %s5151_s7 = smov 96  }
   0xe   :  { %4461 = vmatmul.mubr.msk.f32.gmra.mxu1 %vm56_vm1, %v29_v7 }
  0x75   :  { %v39_v8 = vpop.permute.xlu0 %38 }
  0x76   :  { %v43_v9 = vpop.permute.xlu1 %42 }
  0x79   :  { %v41_v10 = vpop.permute.xlu0 %40 }
  0x7a   :  { %v45_v16 = vpop.permute.xlu1 %44 }
  0x7d   :  { %v47_v21 = vpop.permute.xlu0 %46 }
  0x7e   :  { %v49_v23 = vpop.permute.xlu1 %48 }
  0xc6   :  { %v4456_v11 = vpop.f32.mrf.mxu1 }
  0xc7   :  { %v145_v12 = vadd.f32 %v4456_v11, %v41_v10 }
  0xc8   :  { %v139_v13 = vpop.f32.mrf.mxu1 }
  0xc9   :  { %v140_v14 = vadd.f32 %v139_v13, %v39_v8  ;;  %v174_v15 = vsel %vm170_vm2, %v145_v12, 0.0 }
  0xca   :  { %175 = vadd.xlane.f32.xlu1 %v174_v15  ;;  %v4459_v17 = vpop.f32.mrf.mxu1 }
  0xcb   :  { %v171_v18 = vsel %vm170_vm2, %v140_v14, 0.0  ;;  %v155_v24 = vadd.f32 %v4459_v17, %v45_v16  ;;  %v4070_v17 = vld [vmem:[%s6474_s5] ss:$0 sm:$0xff] }
  0xcc   :  { %v149_v19 = vpop.f32.mrf.mxu1  ;;  %172 = vadd.xlane.f32.xlu0 %v171_v18 }
  0xcd   :  { %v150_v20 = vadd.f32 %v149_v19, %v43_v9  ;;  %v180_v30 = vsel %vm170_vm2, %v155_v24, 0.0 }
  0xce   :  { %v4462_v22 = vpop.f32.mrf.mxu1 }
  0xcf   :  { %v177_v25 = vsel %vm170_vm2, %v150_v20, 0.0  ;;  %v165_v28 = vadd.f32 %v4462_v22, %v49_v23 }
  0xd0   :  { %v159_v26 = vpop.f32.mrf.mxu1  ;;  %178 = vadd.xlane.f32.xlu0 %v177_v25 }
  0xd1   :  { %v160_v27 = vadd.f32 %v159_v26, %v47_v21  ;;  %v186_v31 = vsel %vm170_vm2, %v165_v28, 0.0 }
  0xd3   :  { %v183_v29 = vsel %vm170_vm2, %v160_v27, 0.0 }
  0xd4   :  { %184 = vadd.xlane.f32.xlu1 %v183_v29  ;;  %181 = vadd.xlane.f32.xlu0 %v180_v30 }
  0xd8   :  { %187 = vadd.xlane.f32.xlu0 %v186_v31 }
 0x153   :  { %v176_v32 = vpop.xlane.xlu1 %175 }
 0x154   :  { %v191_v33 = vmul.f32 0.03125, %v176_v32 }
 0x155   :  { %v173_v34 = vpop.xlane.xlu0 %172 }
 0x156   :  { %v197_v35 = vsub.f32 %v145_v12, %v191_v33  ;;  %v190_v36 = vmul.f32 0.03125, %v173_v34 }
 0x158   :  { %v196_v37 = vsub.f32 %v140_v14, %v190_v36  ;;  %v203_v38 = vmul.f32 %v197_v35, %v197_v35 }
 0x159   :  { %v179_v39 = vpop.xlane.xlu0 %178 }
 0x15a   :  { %v192_v40 = vmul.f32 0.03125, %v179_v39  ;;  %v211_v41 = vsel %vm170_vm2, %v203_v38, 0.0  ;;  %v202_v42 = vmul.f32 %v196_v37, %v196_v37 }
 0x15b   :  { %212 = vadd.xlane.f32.xlu0 %v211_v41 }
 0x15c   :  { %v198_v43 = vsub.f32 %v150_v20, %v192_v40  ;;  %v208_v44 = vsel %vm170_vm2, %v202_v42, 0.0  ;;  %v4071_v20 = vld [vmem:[%s6474_s5 + $0x1] ss:$0 sm:$0xff] }
 0x15d   :  { %v185_v45 = vpop.xlane.xlu1 %184  ;;  %209 = vadd.xlane.f32.xlu1 %v208_v44  ;;  %v182_v46 = vpop.xlane.xlu0 %181 }
 0x15e   :  { %v194_v47 = vmul.f32 0.03125, %v185_v45  ;;  %v193_v48 = vmul.f32 0.03125, %v182_v46  ;;  %v204_v49 = vmul.f32 %v198_v43, %v198_v43 }
 0x160   :  { %v200_v50 = vsub.f32 %v160_v27, %v194_v47  ;;  %v199_v51 = vsub.f32 %v155_v24, %v193_v48  ;;  %v214_v52 = vsel %vm170_vm2, %v204_v49, 0.0 }
 0x161   :  { %215 = vadd.xlane.f32.xlu1 %v214_v52  ;;  %v188_v53 = vpop.xlane.xlu0 %187 }
 0x162   :  { %v195_v54 = vmul.f32 0.03125, %v188_v53  ;;  %v206_v55 = vmul.f32 %v200_v50, %v200_v50  ;;  %v205_v56 = vmul.f32 %v199_v51, %v199_v51 }
 0x164   :  { %v201_v57 = vsub.f32 %v165_v28, %v195_v54  ;;  %v220_v58 = vsel %vm170_vm2, %v206_v55, 0.0  ;;  %v217_v59 = vsel %vm170_vm2, %v205_v56, 0.0 }
 0x165   :  { %221 = vadd.xlane.f32.xlu1 %v220_v58  ;;  %218 = vadd.xlane.f32.xlu0 %v217_v59 }
 0x166   :  { %v207_v60 = vmul.f32 %v201_v57, %v201_v57 }
 0x168   :  { %v223_v61 = vsel %vm170_vm2, %v207_v60, 0.0 }
 0x169   :  { %224 = vadd.xlane.f32.xlu0 %v223_v61 }
 0x1e4   :  { %v213_v62 = vpop.xlane.xlu0 %212 }
 0x1e5   :  { %v227_v63 = vmul.f32 0.03125, %v213_v62 }
 0x1e6   :  { %v210_v0 = vpop.xlane.xlu1 %209 }
 0x1e7   :  { %v233_v1 = vadd.f32 1e-05, %v227_v63  ;;  %v226_v2 = vmul.f32 0.03125, %v210_v0 }
 0x1e9   :  { %4917 = vrsqrt.f32 %v233_v1  ;;  %v232_v3 = vadd.f32 1e-05, %v226_v2 }
 0x1ea   :  { %v216_v4 = vpop.xlane.xlu1 %215 }
 0x1eb   :  { %4919 = vrsqrt.f32 %v232_v3  ;;  %v228_v5 = vmul.f32 0.03125, %v216_v4 }
 0x1ed   :  { %v234_v6 = vadd.f32 1e-05, %v228_v5 }
 0x1ee   :  { %v222_v7 = vpop.xlane.xlu1 %221  ;;  %v219_v8 = vpop.xlane.xlu0 %218 }
 0x1ef   :  { %4921 = vrsqrt.f32 %v234_v6  ;;  %v230_v9 = vmul.f32 0.03125, %v222_v7  ;;  %v229_v10 = vmul.f32 0.03125, %v219_v8 }
 0x1f1   :  { %v236_v11 = vadd.f32 1e-05, %v230_v9  ;;  %v235_v12 = vadd.f32 1e-05, %v229_v10 }
 0x1f2   :  { %v225_v13 = vpop.xlane.xlu0 %224 }
 0x1f3   :  { %4923 = vrsqrt.f32 %v236_v11  ;;  %v231_v14 = vmul.f32 0.03125, %v225_v13 }
 0x1f4   :  { %4925 = vrsqrt.f32 %v235_v12 }
 0x1f5   :  { %v237_v15 = vadd.f32 1e-05, %v231_v14  ;;  %v5308_v14 = vld [vmem:[%s6471_s2 + $0x18] sm:$0xff] }
 0x1f6   :  { %v4918_v16 = vpop.eup %4917  ;;  %4463 = vmatprep.subr.mxu1 %v5308_v14 }
 0x1f7   :  { %4927 = vrsqrt.f32 %v237_v15  ;;  %v245_v18 = vmul.f32 %v4918_v16, %v197_v35  ;;  %v5313_v15 = vld [vmem:[%s6471_s2 + $0x10] sm:$0xff]  ;;  %4464 = vmatpush3.msra.mxu1 %v5308_v14  ;;  %v5320_v16 = vld [vmem:[%s6471_s2 + $0x8] sm:$0xff] }
 0x1f8   :  { %v4920_v19 = vpop.eup %4919  ;;  %4465 = vmatprep.subr.mxu1 %v5313_v15 }
 0x1f9   :  { %v255_v21 = vmul.f32 %v4070_v17, %v245_v18  ;;  %v244_v22 = vmul.f32 %v4920_v19, %v196_v37  ;;  %4466 = vmatpush3.msra.mxu1 %v5313_v15 }
 0x1fa   :  { %4467 = vmatprep.subr.mxu1 %v5320_v16 }
 0x1fb   :  { %v5245_v23 = vadd.f32 %v4071_v20, %v255_v21  ;;  %v254_v24 = vmul.f32 %v4070_v17, %v244_v22  ;;  %4468 = vmatpush3.msra.mxu1 %v5320_v16 }
 0x1fc   :  { %v4922_v25 = vpop.eup %4921 }
 0x1fd   :  { %v279_v26 = vsel %vm170_vm2, %v5245_v23, 0.0  ;;  %v5249_v27 = vadd.f32 %v4071_v20, %v254_v24  ;;  %v246_v28 = vmul.f32 %v4922_v25, %v198_v43 }
 0x1fe   :  { %280 = vadd.xlane.f32.xlu0 %v279_v26 }
 0x1ff   :  { %v276_v29 = vsel %vm170_vm2, %v5249_v27, 0.0  ;;  %v256_v30 = vmul.f32 %v4070_v17, %v246_v28 }
 0x200   :  { %v4924_v31 = vpop.eup %4923  ;;  %277 = vadd.xlane.f32.xlu1 %v276_v29 }
 0x201   :  { %v4926_v32 = vpop.eup %4925  ;;  %v5253_v33 = vadd.f32 %v4071_v20, %v256_v30  ;;  %v248_v34 = vmul.f32 %v4924_v31, %v200_v50 }
 0x202   :  { %v247_v35 = vmul.f32 %v4926_v32, %v199_v51 }
 0x203   :  { %v282_v36 = vsel %vm170_vm2, %v5253_v33, 0.0  ;;  %v258_v37 = vmul.f32 %v4070_v17, %v248_v34 }
 0x204   :  { %v4928_v38 = vpop.eup %4927  ;;  %283 = vadd.xlane.f32.xlu1 %v282_v36  ;;  %v257_v39 = vmul.f32 %v4070_v17, %v247_v35 }
 0x205   :  { %v5257_v40 = vadd.f32 %v4071_v20, %v258_v37  ;;  %v249_v41 = vmul.f32 %v4928_v38, %v201_v57 }
 0x206   :  { %v5259_v42 = vadd.f32 %v4071_v20, %v257_v39 }
 0x207   :  { %v288_v43 = vsel %vm170_vm2, %v5257_v40, 0.0  ;;  %v259_v44 = vmul.f32 %v4070_v17, %v249_v41  ;;  %v5327_v17 = vld [vmem:[%s6471_s2] sm:$0xff] }
 0x208   :  { %289 = vadd.xlane.f32.xlu1 %v288_v43  ;;  %v285_v45 = vsel %vm170_vm2, %v5259_v42, 0.0  ;;  %4469 = vmatprep.subr.mxu1 %v5327_v17  ;;  %v4072_v43 = vld [vmem:[%s6474_s5 + $0x4] ss:$0 sm:$0xff] }
 0x209   :  { %286 = vadd.xlane.f32.xlu0 %v285_v45  ;;  %v5265_v46 = vadd.f32 %v4071_v20, %v259_v44  ;;  %4470 = vmatpush3.msra.mxu1 %v5327_v17 }
 0x20b   :  { %v291_v47 = vsel %vm170_vm2, %v5265_v46, 0.0 }
 0x20d   :  { %292 = vadd.xlane.f32.xlu0 %v291_v47 }
 0x287   :  { %v281_v48 = vpop.xlane.xlu0 %280 }
 0x288   :  { %v295_v49 = vmul.f32 0.03125, %v281_v48  ;;  %v4073_v48 = vld [vmem:[%s6474_s5 + $0x5] ss:$0 sm:$0xff] }
 0x289   :  { %v278_v50 = vpop.xlane.xlu1 %277 }
 0x28a   :  { %v5270_v51 = vsub.f32 %v5245_v23, %v295_v49  ;;  %v294_v52 = vmul.f32 0.03125, %v278_v50 }
 0x28c   :  { %v5273_v53 = vsub.f32 %v5249_v27, %v294_v52  ;;  %v307_v54 = vmul.f32 %v5270_v51, %v5270_v51 }
 0x28d   :  { %v284_v55 = vpop.xlane.xlu1 %283 }
 0x28e   :  { %v296_v56 = vmul.f32 0.03125, %v284_v55  ;;  %v315_v57 = vsel %vm170_vm2, %v307_v54, 0.0  ;;  %v306_v58 = vmul.f32 %v5273_v53, %v5273_v53 }
 0x28f   :  { %316 = vadd.xlane.f32.xlu0 %v315_v57 }
 0x290   :  { %v5281_v59 = vsub.f32 %v5253_v33, %v296_v56  ;;  %v312_v60 = vsel %vm170_vm2, %v306_v58, 0.0 }
 0x291   :  { %313 = vadd.xlane.f32.xlu1 %v312_v60  ;;  %v290_v61 = vpop.xlane.xlu1 %289 }
 0x292   :  { %v298_v62 = vmul.f32 0.03125, %v290_v61  ;;  %v287_v63 = vpop.xlane.xlu0 %286  ;;  %v308_v0 = vmul.f32 %v5281_v59, %v5281_v59 }
 0x293   :  { %v297_v1 = vmul.f32 0.03125, %v287_v63 }
 0x294   :  { %v5287_v2 = vsub.f32 %v5257_v40, %v298_v62  ;;  %v318_v3 = vsel %vm170_vm2, %v308_v0, 0.0 }
 0x295   :  { %v5291_v4 = vsub.f32 %v5259_v42, %v297_v1  ;;  %319 = vadd.xlane.f32.xlu1 %v318_v3 }
 0x296   :  { %v293_v5 = vpop.xlane.xlu0 %292  ;;  %v310_v6 = vmul.f32 %v5287_v2, %v5287_v2 }
 0x297   :  { %v299_v7 = vmul.f32 0.03125, %v293_v5  ;;  %v309_v8 = vmul.f32 %v5291_v4, %v5291_v4 }
 0x298   :  { %v324_v9 = vsel %vm170_vm2, %v310_v6, 0.0 }
 0x299   :  { %v5299_v10 = vsub.f32 %v5265_v46, %v299_v7  ;;  %325 = vadd.xlane.f32.xlu1 %v324_v9  ;;  %v321_v11 = vsel %vm170_vm2, %v309_v8, 0.0 }
 0x29a   :  { %322 = vadd.xlane.f32.xlu0 %v321_v11 }
 0x29b   :  { %v311_v12 = vmul.f32 %v5299_v10, %v5299_v10 }
 0x29d   :  { %v327_v13 = vsel %vm170_vm2, %v311_v12, 0.0 }
 0x29e   :  { %328 = vadd.xlane.f32.xlu0 %v327_v13 }
 0x318   :  { %v317_v18 = vpop.xlane.xlu0 %316 }
 0x319   :  { %v331_v19 = vmul.f32 0.03125, %v317_v18 }
 0x31a   :  { %v314_v20 = vpop.xlane.xlu1 %313 }
 0x31b   :  { %v337_v21 = vadd.f32 1e-05, %v331_v19  ;;  %v330_v22 = vmul.f32 0.03125, %v314_v20 }
 0x31d   :  { %4929 = vrsqrt.f32 %v337_v21  ;;  %v336_v24 = vadd.f32 1e-05, %v330_v22 }
 0x31e   :  { %v320_v25 = vpop.xlane.xlu1 %319 }
 0x31f   :  { %4931 = vrsqrt.f32 %v336_v24  ;;  %v332_v26 = vmul.f32 0.03125, %v320_v25 }
 0x321   :  { %v338_v28 = vadd.f32 1e-05, %v332_v26 }
 0x322   :  { %v326_v29 = vpop.xlane.xlu1 %325 }
 0x323   :  { %4933 = vrsqrt.f32 %v338_v28  ;;  %v334_v30 = vmul.f32 0.03125, %v326_v29  ;;  %v323_v31 = vpop.xlane.xlu0 %322 }
 0x324   :  { %v333_v32 = vmul.f32 0.03125, %v323_v31 }
 0x325   :  { %v340_v34 = vadd.f32 1e-05, %v334_v30 }
 0x326   :  { %v339_v35 = vadd.f32 1e-05, %v333_v32 }
 0x327   :  { %4935 = vrsqrt.f32 %v340_v34  ;;  %v329_v36 = vpop.xlane.xlu0 %328 }
 0x328   :  { %4937 = vrsqrt.f32 %v339_v35  ;;  %v335_v37 = vmul.f32 0.03125, %v329_v36 }
 0x32a   :  { %v4930_v38 = vpop.eup %4929  ;;  %v341_v39 = vadd.f32 1e-05, %v335_v37 }
 0x32b   :  { %v349_v41 = vmul.f32 %v4930_v38, %v5270_v51 }
 0x32c   :  { %v4932_v44 = vpop.eup %4931  ;;  %4939 = vrsqrt.f32 %v341_v39 }
 0x32d   :  { %v348_v45 = vmul.f32 %v4932_v44, %v5273_v53  ;;  %v359_v47 = vmul.f32 %v4072_v43, %v349_v41 }
 0x32f   :  { %v358_v49 = vmul.f32 %v4072_v43, %v348_v45  ;;  %v369_v55 = vadd.f32 %v4073_v48, %v359_v47 }
 0x330   :  { %v4934_v50 = vpop.eup %4933 }
 0x331   :  { %v368_v52 = vadd.f32 %v4073_v48, %v358_v49  ;;  %v350_v54 = vmul.f32 %v4934_v50, %v5281_v59  ;;  %v492_v50 = vld [vmem:[%s6470_s1] sm:$0xff] }
 0x333   :  { %4471 = vmatprep.mubr.msk.f32.mxu1 %vm170_vm2, %v368_v52  ;;  %v360_v51 = vmul.f32 %v4072_v43, %v350_v54 }
 0x334   :  { %v4936_v56 = vpop.eup %4935  ;;  %4472 = vmatmul.mubr.msk.f32.vlgmr.msra.gmra.mxu1 %vm170_vm2, %v369_v55 }
 0x335   :  { %v4938_v57 = vpop.eup %4937  ;;  %v370_v58 = vadd.f32 %v4073_v48, %v360_v51  ;;  %v352_v53 = vmul.f32 %v4936_v56, %v5287_v2  ;;  %v4074_v2 = vld [vmem:[%s6474_s5 + $0x8] ss:$0 sm:$0xff] }
 0x336   :  { %v351_v60 = vmul.f32 %v4938_v57, %v5291_v4  ;;  %v5150_v4 = vmov 0.0   ;;  %v493_v56 = vld [vmem:[%s6470_s1 + $0x8] sm:$0xff] }
 0x337   :  { %4474 = vmatprep.mubr.msk.f32.mxu1 %vm170_vm2, %v370_v58  ;;  %v362_v61 = vmul.f32 %v4072_v43, %v352_v53  ;;  %4480 = vmatprep.subr.mxu0 %v5150_v4 }
 0x338   :  { %v361_v62 = vmul.f32 %v4072_v43, %v351_v60  ;;  %4495 = vmatprep.subr.mxu1 %v5150_v4  ;;  %4486 = vmatprep.mubr.msk.f32.mxu0 %vm5153_vm3, %v5150_v4 }
 0x339   :  { %v4940_v63 = vpop.eup %4939  ;;  %v372_v0 = vadd.f32 %v4073_v48, %v362_v61 }
 0x33a   :  { %v371_v59 = vadd.f32 %v4073_v48, %v361_v62  ;;  %v353_v1 = vmul.f32 %v4940_v63, %v5299_v10  ;;  %v494_v62 = vld [vmem:[%s6470_s1 + $0x10] sm:$0xff] }
 0x33c   :  { %4475 = vmatmul.mubr.msk.f32.gmra.mxu1 %vm170_vm2, %v371_v59  ;;  %v363_v3 = vmul.f32 %v4072_v43, %v353_v1 }
 0x33d   :  { %4477 = vmatprep.mubr.msk.f32.mxu1 %vm170_vm2, %v372_v0 }
 0x33e   :  { %v373_v5 = vadd.f32 %v4073_v48, %v363_v3 }
 0x340   :  { %4478 = vmatmul.mubr.msk.f32.gmra.mxu1 %vm170_vm2, %v373_v5 }
 0x341   :  { %4501 = vmatprep.mubr.msk.f32.mxu1 %vm5153_vm3, %v5150_v4 }
 0x3f4   :  { %v4473_v6 = vpop.f32.mrf.mxu1 }
 0x3f5   :  { %v5356_v7 = vadd.f32 %v4473_v6, %v4074_v2 }
 0x3f6   :  { %v463_v8 = vpop.f32.mrf.mxu1 }
 0x3f7   :  { %500 = vrot.lane.b32.xlu0 %v5356_v7, %s5151_s7  ;;  %v464_v10 = vadd.f32 %v4074_v2, %v463_v8 }
 0x3fb   :  { %743 = vrot.lane.b32.xlu0 %v5356_v7, %s5152_s8 }
 0x3fc   :  { %v4476_v9 = vpop.f32.mrf.mxu1 }
 0x3fd   :  { %v5377_v19 = vadd.f32 %v4476_v9, %v4074_v2 }
 0x3fe   :  { %v473_v11 = vpop.f32.mrf.mxu1 }
 0x3ff   :  { %v474_v12 = vadd.f32 %v4074_v2, %v473_v11  ;;  %735 = vrot.lane.b32.xlu0 %v464_v10, %s5154_s9 }
 0x400   :  { %v4479_v13 = vpop.f32.mrf.mxu1 }
 0x401   :  { %502 = vrot.lane.b32.xlu1 %v474_v12, %s5151_s7  ;;  %v5372_v18 = vadd.f32 %v4479_v13, %v4074_v2 }
 0x402   :  { %v483_v20 = vpop.f32.mrf.mxu1 }
 0x403   :  { %737 = vrot.lane.b32.xlu0 %v5356_v7, %s5154_s9  ;;  %v5382_v21 = vadd.f32 %v4074_v2, %v483_v20 }
 0x405   :  { %498 = vrot.lane.b32.xlu1 %v464_v10, %s5151_s7 }
 0x407   :  { %739 = vrot.lane.b32.xlu0 %v474_v12, %s5154_s9 }
 0x409   :  { %745 = vrot.lane.b32.xlu1 %v474_v12, %s5152_s8 }
 0x40b   :  { %1243 = vrot.lane.b32.xlu0 %v5372_v18, %s5152_s8 }
 0x40d   :  { %741 = vrot.lane.b32.xlu1 %v464_v10, %s5152_s8 }
 0x40f   :  { %1239 = vrot.lane.b32.xlu0 %v5377_v19, %s5152_s8 }
 0x411   :  { %1002 = vrot.lane.b32.xlu1 %v5372_v18, %s5151_s7 }
 0x413   :  { %1235 = vrot.lane.b32.xlu0 %v5382_v21, %s5154_s9 }
 0x415   :  { %1000 = vrot.lane.b32.xlu1 %v5382_v21, %s5151_s7 }
 0x417   :  { %639 = vrot.lane.b32.xlu0 %v5356_v7, %s5155_s10 }
 0x419   :  { %998 = vrot.lane.b32.xlu1 %v5377_v19, %s5151_s7 }
 0x41b   :  { %880 = vrot.lane.b32.xlu0 %v5356_v7, %s5156_s11 }
 0x41d   :  { %1241 = vrot.lane.b32.xlu1 %v5382_v21, %s5152_s8 }
 0x421   :  { %1233 = vrot.lane.b32.xlu1 %v5377_v19, %s5154_s9 }
 0x425   :  { %1237 = vrot.lane.b32.xlu1 %v5372_v18, %s5154_s9 }
 0x429   :  { %641 = vrot.lane.b32.xlu1 %v474_v12, %s5155_s10 }
 0x42d   :  { %637 = vrot.lane.b32.xlu1 %v464_v10, %s5155_s10 }
 0x431   :  { %882 = vrot.lane.b32.xlu1 %v474_v12, %s5156_s11 }
 0x435   :  { %878 = vrot.lane.b32.xlu1 %v464_v10, %s5156_s11 }
 0x469   :  { %v501_v22 = vpop.permute.xlu0 %500 }
 0x46d   :  { %v744_v24 = vpop.permute.xlu0 %743 }
 0x471   :  { %v736_v28 = vpop.permute.xlu0 %735 }
 0x473   :  { %v503_v25 = vpop.permute.xlu1 %502 }
 0x474   :  { %4481 = vmatpush3.xpose.msk.msra.mxu0 %vm504_vm4, %v503_v25 }
 0x475   :  { %4482 = vmatprep.subr.mxu0 %v5150_v4  ;;  %v738_v30 = vpop.permute.xlu0 %737 }
 0x477   :  { %v499_v26 = vpop.permute.xlu1 %498 }
 0x478   :  { %4483 = vmatpush3.xpose.msk.msra.mxu0 %vm504_vm4, %v501_v22 }
 0x479   :  { %4484 = vmatprep.subr.mxu0 %v5150_v4  ;;  %v740_v34 = vpop.permute.xlu0 %739 }
 0x47b   :  { %v746_v29 = vpop.permute.xlu1 %745 }
 0x47c   :  { %4485 = vmatpush3.xpose.msk.msra.mxu0 %vm504_vm4, %v499_v26 }
 0x47d   :  { %4510 = vmatprep.subr.mxu0 %v5150_v4  ;;  %v1244_v36 = vpop.permute.xlu0 %1243 }
 0x47f   :  { %v742_v31 = vpop.permute.xlu1 %741  ;;  %4487 = vmatmul.mubr.msk.f32.vlgmr.msra.gmra.mxu0 %vm504_vm4, %v464_v10 }
 0x480   :  { %4511 = vmatpush3.xpose.msk.msra.mxu0 %vm504_vm4, %v746_v29  ;;  %4489 = vmatprep.mubr.msk.f32.mxu0 %vm5153_vm3, %v5150_v4 }
 0x481   :  { %4512 = vmatprep.subr.mxu0 %v5150_v4  ;;  %v1240_v39 = vpop.permute.xlu0 %1239 }
 0x483   :  { %v1003_v32 = vpop.permute.xlu1 %1002  ;;  %4490 = vmatmul.mubr.msk.f32.gmra.mxu0 %vm504_vm4, %v5356_v7 }
 0x484   :  { %4513 = vmatpush3.xpose.msk.msra.mxu0 %vm504_vm4, %v744_v24  ;;  %4492 = vmatprep.mubr.msk.f32.mxu0 %vm5153_vm3, %v5150_v4 }
 0x485   :  { %4514 = vmatprep.subr.mxu0 %v5150_v4  ;;  %v1236_v43 = vpop.permute.xlu0 %1235 }
 0x487   :  { %v1001_v35 = vpop.permute.xlu1 %1000  ;;  %4493 = vmatmul.mubr.msk.f32.gmra.mxu0 %vm504_vm4, %v474_v12 }
 0x488   :  { %4515 = vmatpush3.xpose.msk.msra.mxu0 %vm504_vm4, %v742_v31  ;;  %4516 = vmatprep.mubr.msk.f32.mxu0 %vm5153_vm3, %v5150_v4 }
 0x489   :  { %4540 = vmatprep.subr.mxu0 %v5150_v4  ;;  %v640_v47 = vpop.permute.xlu0 %639 }
 0x48b   :  { %v999_v37 = vpop.permute.xlu1 %998  ;;  %4517 = vmatmul.mubr.msk.f32.vlgmr.msra.gmra.mxu0 %vm504_vm4, %v736_v28  ;;  %v4099_v28 = vld [vmem:[%s6470_s1 + $0x18] sm:$0xff] }
 0x48c   :  { %4541 = vmatpush3.xpose.msk.msra.mxu0 %vm504_vm4, %v1003_v32  ;;  %4519 = vmatprep.mubr.msk.f32.mxu0 %vm5153_vm3, %v5150_v4 }
 0x48d   :  { %4542 = vmatprep.subr.mxu0 %v5150_v4 }
 0x48f   :  { %v1242_v38 = vpop.permute.xlu1 %1241  ;;  %4520 = vmatmul.mubr.msk.f32.gmra.mxu0 %vm504_vm4, %v738_v30 }
 0x490   :  { %4543 = vmatpush3.xpose.msk.msra.mxu0 %vm504_vm4, %v1001_v35  ;;  %4522 = vmatprep.mubr.msk.f32.mxu0 %vm5153_vm3, %v5150_v4  ;;  %v4100_v35 = vld [vmem:[%s6470_s1 + $0x20] sm:$0xff] }
 0x491   :  { %4544 = vmatprep.subr.mxu0 %v5150_v4 }
 0x493   :  { %v1234_v41 = vpop.permute.xlu1 %1233  ;;  %4523 = vmatmul.mubr.msk.f32.gmra.mxu0 %vm504_vm4, %v740_v34 }
 0x494   :  { %4545 = vmatpush3.xpose.msk.msra.mxu0 %vm504_vm4, %v999_v37  ;;  %4546 = vmatprep.mubr.msk.f32.mxu0 %vm5153_vm3, %v5150_v4 }
 0x495   :  { %4570 = vmatprep.subr.mxu0 %v5150_v4 }
 0x497   :  { %v1238_v44 = vpop.permute.xlu1 %1237  ;;  %4547 = vmatmul.mubr.msk.f32.vlgmr.msra.gmra.mxu0 %vm504_vm4, %v5377_v19 }
 0x498   :  { %4571 = vmatpush3.xpose.msk.msra.mxu0 %vm504_vm4, %v1244_v36  ;;  %4549 = vmatprep.mubr.msk.f32.mxu0 %vm5153_vm3, %v5150_v4 }
 0x499   :  { %4572 = vmatprep.subr.mxu0 %v5150_v4 }
 0x49b   :  { %v642_v45 = vpop.permute.xlu1 %641  ;;  %4550 = vmatmul.mubr.msk.f32.gmra.mxu0 %vm504_vm4, %v5382_v21 }
 0x49c   :  { %4496 = vmatpush3.msra.mxu1 %v642_v45  ;;  %4573 = vmatpush3.xpose.msk.msra.mxu0 %vm504_vm4, %v1242_v38 }
 0x49d   :  { %4497 = vmatprep.subr.mxu1 %v5150_v4  ;;  %4552 = vmatprep.mubr.msk.f32.mxu0 %vm5153_vm3, %v5150_v4 }
 0x49e   :  { %4498 = vmatpush3.msra.mxu1 %v640_v47  ;;  %4574 = vmatprep.subr.mxu0 %v5150_v4 }
 0x49f   :  { %v638_v48 = vpop.permute.xlu1 %637  ;;  %4499 = vmatprep.subr.mxu1 %v5150_v4  ;;  %4553 = vmatmul.mubr.msk.f32.gmra.mxu0 %vm504_vm4, %v5372_v18 }
 0x4a0   :  { %4500 = vmatpush3.msra.mxu1 %v638_v48  ;;  %4575 = vmatpush3.xpose.msk.msra.mxu0 %vm504_vm4, %v1240_v39 }
 0x4a1   :  { %4576 = vmatprep.mubr.msk.f32.mxu0 %vm5153_vm3, %v5150_v4  ;;  %4525 = vmatprep.subr.mxu1 %v5150_v4 }
 0x4a3   :  { %4577 = vmatmul.mubr.msk.f32.vlgmr.msra.gmra.mxu0 %vm504_vm4, %v1234_v41 }
 0x4a4   :  { %4579 = vmatprep.mubr.msk.f32.mxu0 %vm5153_vm3, %v5150_v4 }
 0x4a7   :  { %4580 = vmatmul.mubr.msk.f32.gmra.mxu0 %vm504_vm4, %v1236_v43  ;;  %v4101_v43 = vld [vmem:[%s6470_s1 + $0x28] sm:$0xff] }
 0x4a8   :  { %4582 = vmatprep.mubr.msk.f32.mxu0 %vm5153_vm3, %v5150_v4 }
 0x4ab   :  { %4583 = vmatmul.mubr.msk.f32.gmra.mxu0 %vm504_vm4, %v1238_v44 }
 0x53f   :  { %v583_v49 = vpop.f32.mrf.mxu0 }
 0x540   :  { %v597_v52 = vmul.f32 0.25, %v583_v49 }
 0x541   :  { %v4488_v54 = vpop.f32.mrf.mxu0 }
 0x542   :  { %v5473_v55 = vadd.f32 %v597_v52, %v492_v50 }
 0x543   :  { %v588_v51 = vpop.f32.mrf.mxu0 }
 0x544   :  { %v598_v57 = vmul.f32 0.25, %v588_v51  ;;  %v604_v58 = vsel %vm603_vm5, %v5473_v55, -inf }
 0x545   :  { %605 = vmax.xlane.f32.xlu0 %v604_v58  ;;  %v4491_v53 = vpop.f32.mrf.mxu0 }
 0x546   :  { %v5480_v60 = vadd.f32 %v598_v57, %v493_v56 }
 0x547   :  { %v593_v61 = vpop.f32.mrf.mxu0 }
 0x548   :  { %v599_v63 = vmul.f32 0.25, %v593_v61  ;;  %v607_v0 = vsel %vm603_vm5, %v5480_v60, -inf }
 0x549   :  { %608 = vmax.xlane.f32.xlu1 %v607_v0  ;;  %v4494_v59 = vpop.f32.mrf.mxu0 }
 0x54a   :  { %v5487_v1 = vadd.f32 %v599_v63, %v494_v62 }
 0x54b   :  { %v825_v3 = vpop.f32.mrf.mxu0 }
 0x54c   :  { %v839_v5 = vmul.f32 0.25, %v825_v3  ;;  %v610_v2 = vsel %vm603_vm5, %v5487_v1, -inf }
 0x54d   :  { %611 = vmax.xlane.f32.xlu0 %v610_v2  ;;  %v4518_v6 = vpop.f32.mrf.mxu0  ;;  %v5538_v2 = vpop.permute.xlu1 %882 }
 0x54e   :  { %v5491_v7 = vadd.f32 %v839_v5, %v492_v50  ;;  %v5540_v6 = vpop.permute.xlu0 %880 }
 0x54f   :  { %v830_v8 = vpop.f32.mrf.mxu0 }
 0x550   :  { %v840_v9 = vmul.f32 0.25, %v830_v8  ;;  %v845_v10 = vsel %vm603_vm5, %v5491_v7, -inf }
 0x551   :  { %846 = vmax.xlane.f32.xlu0 %v845_v10  ;;  %v4521_v11 = vpop.f32.mrf.mxu0  ;;  %v5542_v8 = vpop.permute.xlu1 %878 }
 0x552   :  { %v5495_v12 = vadd.f32 %v840_v9, %v493_v56 }
 0x553   :  { %v835_v13 = vpop.f32.mrf.mxu0 }
 0x554   :  { %v841_v20 = vmul.f32 0.25, %v835_v13  ;;  %v848_v22 = vsel %vm603_vm5, %v5495_v12, -inf }
 0x555   :  { %849 = vmax.xlane.f32.xlu1 %v848_v22  ;;  %v4524_v24 = vpop.f32.mrf.mxu0 }
 0x556   :  { %v5499_v25 = vadd.f32 %v841_v20, %v494_v62 }
 0x557   :  { %v1082_v26 = vpop.f32.mrf.mxu0 }
 0x558   :  { %v1096_v29 = vmul.f32 0.25, %v1082_v26  ;;  %v851_v30 = vsel %vm603_vm5, %v5499_v25, -inf }
 0x559   :  { %852 = vmax.xlane.f32.xlu0 %v851_v30  ;;  %v4548_v31 = vpop.f32.mrf.mxu0 }
 0x55a   :  { %v5506_v32 = vadd.f32 %v4099_v28, %v1096_v29 }
 0x55b   :  { %v1087_v34 = vpop.f32.mrf.mxu0 }
 0x55c   :  { %v1097_v36 = vmul.f32 0.25, %v1087_v34  ;;  %v1102_v37 = vsel %vm603_vm5, %v5506_v32, -inf }
 0x55d   :  { %1103 = vmax.xlane.f32.xlu1 %v1102_v37  ;;  %v4551_v38 = vpop.f32.mrf.mxu0 }
 0x55e   :  { %v5513_v39 = vadd.f32 %v4100_v35, %v1097_v36 }
 0x55f   :  { %v1092_v41 = vpop.f32.mrf.mxu0 }
 0x560   :  { %v1098_v44 = vmul.f32 0.25, %v1092_v41  ;;  %v1105_v45 = vsel %vm603_vm5, %v5513_v39, -inf }
 0x561   :  { %1106 = vmax.xlane.f32.xlu0 %v1105_v45  ;;  %v4554_v47 = vpop.f32.mrf.mxu0 }
 0x562   :  { %v5520_v48 = vadd.f32 %v4101_v43, %v1098_v44 }
 0x563   :  { %v1323_v49 = vpop.f32.mrf.mxu0 }
 0x564   :  { %v1337_v50 = vmul.f32 0.25, %v1323_v49  ;;  %v1108_v52 = vsel %vm603_vm5, %v5520_v48, -inf }
 0x565   :  { %1109 = vmax.xlane.f32.xlu1 %v1108_v52  ;;  %v4578_v54 = vpop.f32.mrf.mxu0 }
 0x566   :  { %v5524_v51 = vadd.f32 %v4099_v28, %v1337_v50 }
 0x567   :  { %v1328_v56 = vpop.f32.mrf.mxu0 }
 0x568   :  { %v1343_v57 = vsel %vm603_vm5, %v5524_v51, -inf  ;;  %v1338_v59 = vmul.f32 0.25, %v1328_v56 }
 0x569   :  { %1344 = vmax.xlane.f32.xlu0 %v1343_v57  ;;  %v4581_v58 = vpop.f32.mrf.mxu0 }
 0x56a   :  { %v5534_v3 = vadd.f32 %v4100_v35, %v1338_v59 }
 0x56b   :  { %v1333_v53 = vpop.f32.mrf.mxu0 }
 0x56c   :  { %v1339_v61 = vmul.f32 0.25, %v1333_v53  ;;  %v1346_v5 = vsel %vm603_vm5, %v5534_v3, -inf }
 0x56d   :  { %v4584_v62 = vpop.f32.mrf.mxu0 }
 0x56e   :  { %v5528_v63 = vadd.f32 %v4101_v43, %v1339_v61 }
 0x570   :  { %v1349_v0 = vsel %vm603_vm5, %v5528_v63, -inf }
 0x571   :  { %1350 = vmax.xlane.f32.xlu0 %v1349_v0 }
 0x576   :  { %1139 = vrot.lane.b32.xlu1 %v5372_v18, %s5155_s10 }
 0x59a   :  { %1347 = vmax.xlane.f32.xlu1 %v1346_v5 }
 0x5ce   :  { %v606_v9 = vpop.xlane.xlu0 %605 }
 0x5cf   :  { %v613_v10 = vsub.f32 %v5473_v55, %v606_v9 }
 0x5d1   :  { %v616_v11 = vmul.f32 1.442695, %v613_v10 }
 0x5d2   :  { %v609_v13 = vpop.xlane.xlu1 %608 }
 0x5d3   :  { %4941 = vpow2.f32 %v616_v11  ;;  %v614_v20 = vsub.f32 %v5480_v60, %v609_v13 }
 0x5d5   :  { %v618_v22 = vmul.f32 1.442695, %v614_v20 }
 0x5d6   :  { %v612_v24 = vpop.xlane.xlu0 %611 }
 0x5d7   :  { %4943 = vpow2.f32 %v618_v22  ;;  %v615_v26 = vsub.f32 %v5487_v1, %v612_v24 }
 0x5d9   :  { %v620_v28 = vmul.f32 1.442695, %v615_v26 }
 0x5da   :  { %v847_v29 = vpop.xlane.xlu0 %846 }
 0x5db   :  { %4945 = vpow2.f32 %v620_v28  ;;  %v854_v30 = vsub.f32 %v5491_v7, %v847_v29 }
 0x5dd   :  { %v857_v31 = vmul.f32 1.442695, %v854_v30 }
 0x5de   :  { %v850_v34 = vpop.xlane.xlu1 %849 }
 0x5df   :  { %4947 = vpow2.f32 %v857_v31  ;;  %v855_v55 = vsub.f32 %v5495_v12, %v850_v34 }
 0x5e0   :  { %v5549_v35 = vpop.eup %4941 }
 0x5e1   :  { %v859_v36 = vmul.f32 1.442695, %v855_v55  ;;  %v622_v60 = vsel %vm603_vm5, %v5549_v35, 0.0 }
 0x5e2   :  { %623 = vadd.xlane.f32.xlu1 %v622_v60  ;;  %v853_v45 = vpop.xlane.xlu0 %852 }
 0x5e3   :  { %4949 = vpow2.f32 %v859_v36  ;;  %v856_v49 = vsub.f32 %v5499_v25, %v853_v45 }
 0x5e4   :  { %v5553_v37 = vpop.eup %4943 }
 0x5e5   :  { %v625_v1 = vsel %vm603_vm5, %v5553_v37, 0.0  ;;  %v861_v54 = vmul.f32 1.442695, %v856_v49 }
 0x5e6   :  { %626 = vadd.xlane.f32.xlu0 %v625_v1  ;;  %v1104_v52 = vpop.xlane.xlu1 %1103 }
 0x5e7   :  { %v1111_v56 = vsub.f32 %v5506_v32, %v1104_v52  ;;  %4951 = vpow2.f32 %v861_v54 }
 0x5e8   :  { %v5557_v7 = vpop.eup %4945 }
 0x5e9   :  { %v628_v38 = vsel %vm603_vm5, %v5557_v7, 0.0  ;;  %v1114_v53 = vmul.f32 1.442695, %v1111_v56 }
 0x5ea   :  { %629 = vadd.xlane.f32.xlu1 %v628_v38  ;;  %v1107_v47 = vpop.xlane.xlu0 %1106 }
 0x5eb   :  { %v1112_v50 = vsub.f32 %v5513_v39, %v1107_v47 }
 0x5ec   :  { %v5561_v12 = vpop.eup %4947 }
 0x5ed   :  { %v863_v41 = vsel %vm603_vm5, %v5561_v12, 0.0  ;;  %v1116_v57 = vmul.f32 1.442695, %v1112_v50 }
 0x5ee   :  { %864 = vadd.xlane.f32.xlu0 %v863_v41  ;;  %v1110_v58 = vpop.xlane.xlu1 %1109 }
 0x5ef   :  { %4953 = vpow2.f32 %v1116_v57  ;;  %v1113_v61 = vsub.f32 %v5520_v48, %v1110_v58 }
 0x5f0   :  { %v5565_v43 = vpop.eup %4949  ;;  %4955 = vpow2.f32 %v1114_v53 }
 0x5f1   :  { %v866_v44 = vsel %vm603_vm5, %v5565_v43, 0.0  ;;  %v1118_v0 = vmul.f32 1.442695, %v1113_v61 }
 0x5f2   :  { %867 = vadd.xlane.f32.xlu1 %v866_v44  ;;  %v1345_v62 = vpop.xlane.xlu0 %1344  ;;  %v5580_v59 = vpop.permute.xlu1 %1139 }
 0x5f3   :  { %4957 = vpow2.f32 %v1118_v0 }
 0x5f4   :  { %v5582_v39 = vpop.eup %4951 }
 0x5f5   :  { %v869_v48 = vsel %vm603_vm5, %v5582_v39, 0.0 }
 0x5fa   :  { %v1351_v29 = vpop.xlane.xlu0 %1350 }
 0x5fb   :  { %v1354_v30 = vsub.f32 %v5528_v63, %v1351_v29 }
 0x5fc   :  { %v5584_v32 = vpop.eup %4953 }
 0x5fd   :  { %v1123_v11 = vsel %vm603_vm5, %v5584_v32, 0.0  ;;  %v1359_v31 = vmul.f32 1.442695, %v1354_v30 }
 0x603   :  { %1137 = vrot.lane.b32.xlu1 %v5382_v21, %s5155_s10 }
 0x604   :  { %1135 = vrot.lane.b32.xlu0 %v5377_v19, %s5155_s10 }
 0x608   :  { %1380 = vrot.lane.b32.xlu0 %v5372_v18, %s5156_s11  ;;  %v1352_v18 = vsub.f32 %v5524_v51, %v1345_v62  ;;  %v5591_v51 = vpop.eup %4955 }
 0x609   :  { %v1120_v13 = vsel %vm603_vm5, %v5591_v51, 0.0  ;;  %v5595_v20 = vpop.eup %4957 }
 0x60a   :  { %v1355_v25 = vmul.f32 1.442695, %v1352_v18 }
 0x60c   :  { %4959 = vpow2.f32 %v1355_v25 }
 0x619   :  { %v5599_v22 = vpop.eup %4959 }
 0x61a   :  { %v1361_v24 = vsel %vm603_vm5, %v5599_v22, 0.0 }
 0x623   :  { %v1348_v5 = vpop.xlane.xlu1 %1347 }
 0x624   :  { %v1353_v9 = vsub.f32 %v5534_v3, %v1348_v5  ;;  %v1126_v3 = vsel %vm603_vm5, %v5595_v20, 0.0 }
 0x626   :  { %v1357_v10 = vmul.f32 1.442695, %v1353_v9 }
 0x627   :  { %870 = vadd.xlane.f32.xlu0 %v869_v48  ;;  %1124 = vadd.xlane.f32.xlu1 %v1123_v11 }
 0x628   :  { %4961 = vpow2.f32 %v1357_v10 }
 0x629   :  { %4963 = vpow2.f32 %v1359_v31 }
 0x62b   :  { %1121 = vadd.xlane.f32.xlu0 %v1120_v13 }
 0x62f   :  { %1127 = vadd.xlane.f32.xlu0 %v1126_v3 }
 0x633   :  { %1362 = vadd.xlane.f32.xlu0 %v1361_v24 }
 0x635   :  { %v5603_v26 = vpop.eup %4961 }
 0x636   :  { %v1364_v28 = vsel %vm603_vm5, %v5603_v26, 0.0  ;;  %v5612_v34 = vpop.eup %4963 }
 0x637   :  { %1365 = vadd.xlane.f32.xlu1 %v1364_v28  ;;  %v1367_v55 = vsel %vm603_vm5, %v5612_v34, 0.0 }
 0x648   :  { %1376 = vrot.lane.b32.xlu1 %v5377_v19, %s5156_s11 }
 0x649   :  { %1378 = vrot.lane.b32.xlu0 %v5382_v21, %s5156_s11 }
 0x64c   :  { %1497 = vrot.lane.b32.xlu1 %v5313_v15, %s5157_s23 }
 0x650   :  { %1495 = vrot.lane.b32.xlu1 %v5320_v16, %s5157_s23 }
 0x668   :  { %1368 = vadd.xlane.f32.xlu0 %v1367_v55 }
 0x66b   :  { %v624_v36 = vpop.xlane.xlu1 %623 }
 0x66c   :  { %4965 = vrcp.f32 %v624_v36 }
 0x66f   :  { %v627_v60 = vpop.xlane.xlu0 %626 }
 0x670   :  { %4967 = vrcp.f32 %v627_v60 }
 0x673   :  { %v630_v1 = vpop.xlane.xlu1 %629 }
 0x674   :  { %4969 = vrcp.f32 %v630_v1 }
 0x677   :  { %v865_v19 = vpop.xlane.xlu0 %864 }
 0x678   :  { %4971 = vrcp.f32 %v865_v19 }
 0x679   :  { %v4966_v21 = vpop.eup %4965 }
 0x67a   :  { %v634_v38 = vmul.f32 %v4966_v21, %v5549_v35 }
 0x67b   :  { %v868_v63 = vpop.xlane.xlu1 %867  ;;  %v1136_v47 = vpop.permute.xlu0 %1135 }
 0x67c   :  { %4973 = vrcp.f32 %v868_v63  ;;  %4502 = vmatmul.mubr.msk.f32.vlgmr.msra.gmra.mxu1 %vm603_vm5, %v634_v38 }
 0x67d   :  { %v4968_v41 = vpop.eup %4967  ;;  %4526 = vmatpush3.msra.mxu1 %v5538_v2  ;;  %4504 = vmatprep.mubr.msk.f32.mxu1 %vm5153_vm3, %v5150_v4 }
 0x67e   :  { %4527 = vmatprep.subr.mxu1 %v5150_v4  ;;  %v635_v44 = vmul.f32 %v4968_v41, %v5553_v37  ;;  %1499 = vrot.lane.b32.xlu0 %v5308_v14, %s5157_s23 }
 0x67f   :  { %4528 = vmatpush3.msra.mxu1 %v5540_v6 }
 0x680   :  { %4529 = vmatprep.subr.mxu1 %v5150_v4  ;;  %4505 = vmatmul.mubr.msk.f32.gmra.mxu1 %vm603_vm5, %v635_v44 }
 0x681   :  { %v4970_v35 = vpop.eup %4969  ;;  %4530 = vmatpush3.msra.mxu1 %v5542_v8  ;;  %4507 = vmatprep.mubr.msk.f32.mxu1 %vm5153_vm3, %v5150_v4  ;;  %v1138_v8 = vpop.permute.xlu1 %1137 }
 0x682   :  { %v636_v2 = vmul.f32 %v4970_v35, %v5557_v7  ;;  %4555 = vmatprep.subr.mxu1 %v5150_v4  ;;  %1493 = vrot.lane.b32.xlu0 %v5327_v17, %s5157_s23 }
 0x684   :  { %4508 = vmatmul.mubr.msk.f32.gmra.mxu1 %vm603_vm5, %v636_v2 }
 0x685   :  { %v4972_v45 = vpop.eup %4971  ;;  %4531 = vmatprep.mubr.msk.f32.mxu1 %vm5153_vm3, %v5150_v4 }
 0x686   :  { %v875_v6 = vmul.f32 %v4972_v45, %v5561_v12  ;;  %v1381_v12 = vpop.permute.xlu0 %1380 }
 0x688   :  { %4532 = vmatmul.mubr.msk.f32.vlgmr.msra.gmra.mxu1 %vm603_vm5, %v875_v6 }
 0x689   :  { %v4974_v37 = vpop.eup %4973  ;;  %4556 = vmatpush3.msra.mxu1 %v5580_v59  ;;  %4534 = vmatprep.mubr.msk.f32.mxu1 %vm5153_vm3, %v5150_v4 }
 0x68a   :  { %4557 = vmatprep.subr.mxu1 %v5150_v4  ;;  %v876_v7 = vmul.f32 %v4974_v37, %v5565_v43 }
 0x68b   :  { %4558 = vmatpush3.msra.mxu1 %v1138_v8 }
 0x68c   :  { %4559 = vmatprep.subr.mxu1 %v5150_v4  ;;  %4535 = vmatmul.mubr.msk.f32.gmra.mxu1 %vm603_vm5, %v876_v7 }
 0x68d   :  { %4560 = vmatpush3.msra.mxu1 %v1136_v47  ;;  %4537 = vmatprep.mubr.msk.f32.mxu1 %vm5153_vm3, %v5150_v4 }
 0x68e   :  { %4585 = vmatprep.subr.mxu1 %v5150_v4 }
 0x6b0   :  { %v871_v49 = vpop.xlane.xlu0 %870  ;;  %v1125_v52 = vpop.xlane.xlu1 %1124 }
 0x6b1   :  { %4975 = vrcp.f32 %v871_v49 }
 0x6b4   :  { %v1122_v50 = vpop.xlane.xlu0 %1121 }
 0x6b5   :  { %4977 = vrcp.f32 %v1122_v50 }
 0x6b6   :  { %4979 = vrcp.f32 %v1125_v52 }
 0x6b8   :  { %v1128_v43 = vpop.xlane.xlu0 %1127 }
 0x6b9   :  { %4981 = vrcp.f32 %v1128_v43 }
 0x6bc   :  { %v1363_v54 = vpop.xlane.xlu0 %1362 }
 0x6bd   :  { %4983 = vrcp.f32 %v1363_v54 }
 0x6be   :  { %v4976_v56 = vpop.eup %4975 }
 0x6bf   :  { %v877_v57 = vmul.f32 %v4976_v56, %v5582_v39 }
 0x6c0   :  { %v1366_v58 = vpop.xlane.xlu1 %1365  ;;  %v1379_v14 = vpop.permute.xlu0 %1378 }
 0x6c1   :  { %4538 = vmatmul.mubr.msk.f32.gmra.mxu1 %vm603_vm5, %v877_v57  ;;  %4985 = vrcp.f32 %v1366_v58  ;;  %v4126_v58 = vld [vmem:[%s6474_s5 + $0x9] ss:$0 sm:$0xff] }
 0x6c2   :  { %v4978_v53 = vpop.eup %4977  ;;  %4561 = vmatprep.mubr.msk.f32.mxu1 %vm5153_vm3, %v5150_v4 }
 0x6c3   :  { %v1132_v61 = vmul.f32 %v4978_v53, %v5591_v51  ;;  %v4980_v62 = vpop.eup %4979 }
 0x6c4   :  { %v1133_v15 = vmul.f32 %v4980_v62, %v5584_v32  ;;  %v1377_v18 = vpop.permute.xlu1 %1376 }
 0x6c5   :  { %4562 = vmatmul.mubr.msk.f32.vlgmr.msra.gmra.mxu1 %vm603_vm5, %v1132_v61 }
 0x6c6   :  { %4586 = vmatpush3.msra.mxu1 %v1381_v12  ;;  %4564 = vmatprep.mubr.msk.f32.mxu1 %vm5153_vm3, %v5150_v4  ;;  %v4982_v0 = vpop.eup %4981 }
 0x6c7   :  { %4587 = vmatprep.subr.mxu1 %v5150_v4  ;;  %v1134_v16 = vmul.f32 %v4982_v0, %v5595_v20 }
 0x6c8   :  { %4588 = vmatpush3.msra.mxu1 %v1379_v14  ;;  %v1498_v10 = vpop.permute.xlu1 %1497 }
 0x6c9   :  { %4589 = vmatprep.subr.mxu1 %v5150_v4  ;;  %4565 = vmatmul.mubr.msk.f32.gmra.mxu1 %vm603_vm5, %v1133_v15 }
 0x6ca   :  { %4590 = vmatpush3.msra.mxu1 %v1377_v18  ;;  %4567 = vmatprep.mubr.msk.f32.mxu1 %vm5153_vm3, %v5150_v4  ;;  %v4984_v17 = vpop.eup %4983 }
 0x6cb   :  { %v1373_v25 = vmul.f32 %v4984_v17, %v5599_v22 }
 0x6cc   :  { %v1496_v11 = vpop.permute.xlu1 %1495 }
 0x6cd   :  { %4568 = vmatmul.mubr.msk.f32.gmra.mxu1 %vm603_vm5, %v1134_v16 }
 0x6ce   :  { %4591 = vmatprep.mubr.msk.f32.mxu1 %vm5153_vm3, %v5150_v4  ;;  %v4986_v59 = vpop.eup %4985 }
 0x6cf   :  { %v1374_v39 = vmul.f32 %v4986_v59, %v5603_v26 }
 0x6d1   :  { %4592 = vmatmul.mubr.msk.f32.vlgmr.msra.gmra.mxu1 %vm603_vm5, %v1373_v25 }
 0x6d2   :  { %4594 = vmatprep.mubr.msk.f32.mxu1 %vm5153_vm3, %v5150_v4 }
 0x6d5   :  { %4595 = vmatmul.mubr.msk.f32.gmra.mxu1 %vm603_vm5, %v1374_v39 }
 0x6d6   :  { %4597 = vmatprep.mubr.msk.f32.mxu1 %vm5153_vm3, %v5150_v4 }
 0x6f1   :  { %v1369_v32 = vpop.xlane.xlu0 %1368 }
 0x6f2   :  { %4987 = vrcp.f32 %v1369_v32 }
 0x6f5   :  { %v1500_v48 = vpop.permute.xlu0 %1499 }
 0x6f6   :  { %4600 = vmatprep.subr.mxu0 %v1500_v48 }
 0x6f7   :  { %4601 = vmatpush3.msra.mxu0 %v1500_v48 }
 0x6f8   :  { %4602 = vmatprep.subr.mxu0 %v1498_v10 }
 0x6f9   :  { %4603 = vmatpush3.msra.mxu0 %v1498_v10  ;;  %v1494_v13 = vpop.permute.xlu0 %1493 }
 0x6fa   :  { %4604 = vmatprep.subr.mxu0 %v1496_v11 }
 0x6fb   :  { %4605 = vmatpush3.msra.mxu0 %v1496_v11 }
 0x6fc   :  { %4606 = vmatprep.subr.mxu0 %v1494_v13 }
 0x6fd   :  { %4607 = vmatpush3.msra.mxu0 %v1494_v13 }
 0x6ff   :  { %v4988_v5 = vpop.eup %4987 }
 0x700   :  { %v1375_v9 = vmul.f32 %v4988_v5, %v5612_v34 }
 0x702   :  { %4598 = vmatmul.mubr.msk.f32.gmra.mxu1 %vm603_vm5, %v1375_v9 }
 0x73c   :  { %v721_v51 = vpop.f32.mrf.mxu1 }
 0x73e   :  { %v4503_v20 = vpop.f32.mrf.mxu1 }
 0x740   :  { %v726_v3 = vpop.f32.mrf.mxu1 }
 0x742   :  { %v4506_v22 = vpop.f32.mrf.mxu1 }
 0x744   :  { %v731_v24 = vpop.f32.mrf.mxu1 }
 0x746   :  { %v4509_v26 = vpop.f32.mrf.mxu1 }
 0x748   :  { %v962_v28 = vpop.f32.mrf.mxu1 }
 0x749   :  { %979 = vrot.lane.b32.xlu1 %v962_v28, %s5158_s24 }
 0x74a   :  { %v4533_v29 = vpop.f32.mrf.mxu1 }
 0x74c   :  { %v967_v30 = vpop.f32.mrf.mxu1 }
 0x74d   :  { %981 = vrot.lane.b32.xlu1 %v967_v30, %s5158_s24  ;;  %v1738_v30 = vld [vmem:[%s6472_s3 + $0x18] sm:$0xff] }
 0x74e   :  { %v4536_v31 = vpop.f32.mrf.mxu1  ;;  %4617 = vmatprep.subr.mxu1 %v1738_v30 }
 0x74f   :  { %v1737_v31 = vld [vmem:[%s6472_s3 + $0x10] sm:$0xff]  ;;  %4618 = vmatpush3.msra.mxu1 %v1738_v30  ;;  %v1923_v30 = vld [vmem:[%s6473_s4 + $0x60] sm:$0xff] }
 0x750   :  { %4619 = vmatprep.subr.mxu1 %v1737_v31 }
 0x751   :  { %4620 = vmatpush3.msra.mxu1 %v1737_v31  ;;  %v1922_v31 = vld [vmem:[%s6473_s4 + $0x58] sm:$0xff] }
 0x781   :  { %v972_v34 = vpop.f32.mrf.mxu1 }
 0x782   :  { %983 = vrot.lane.b32.xlu0 %v972_v34, %s5158_s24  ;;  %v1736_v34 = vld [vmem:[%s6472_s3 + $0x8] sm:$0xff] }
 0x783   :  { %v4539_v55 = vpop.f32.mrf.mxu1  ;;  %4621 = vmatprep.subr.mxu1 %v1736_v34 }
 0x784   :  { %v1735_v55 = vld [vmem:[%s6472_s3] sm:$0xff]  ;;  %4622 = vmatpush3.msra.mxu1 %v1736_v34  ;;  %v1921_v34 = vld [vmem:[%s6473_s4 + $0x50] sm:$0xff] }
 0x785   :  { %v1219_v36 = vpop.f32.mrf.mxu1  ;;  %4623 = vmatprep.subr.mxu1 %v1735_v55 }
 0x786   :  { %4624 = vmatpush3.msra.mxu1 %v1735_v55  ;;  %v1920_v55 = vld [vmem:[%s6473_s4 + $0x48] sm:$0xff] }
 0x787   :  { %v4563_v60 = vpop.f32.mrf.mxu1 }
 0x789   :  { %v1224_v1 = vpop.f32.mrf.mxu1 }
 0x78b   :  { %v4566_v19 = vpop.f32.mrf.mxu1 }
 0x78d   :  { %v1229_v21 = vpop.f32.mrf.mxu1 }
 0x78f   :  { %v4569_v38 = vpop.f32.mrf.mxu1 }
 0x791   :  { %v1460_v63 = vpop.f32.mrf.mxu1 }
 0x792   :  { %1477 = vrot.lane.b32.xlu1 %v1460_v63, %s5158_s24 }
 0x793   :  { %v4593_v41 = vpop.f32.mrf.mxu1 }
 0x795   :  { %v1465_v44 = vpop.f32.mrf.mxu1 }
 0x796   :  { %1479 = vrot.lane.b32.xlu0 %v1465_v44, %s5158_s24 }
 0x797   :  { %v4596_v35 = vpop.f32.mrf.mxu1 }
 0x7bb   :  { %v980_v2 = vpop.permute.xlu1 %979 }
 0x7bc   :  { %v988_v45 = vsel %vm504_vm4, %v721_v51, %v980_v2 }
 0x7bd   :  { %4608 = vmatprep.mubr.msk.f32.mxu0 %vm170_vm2, %v988_v45 }
 0x7bf   :  { %v982_v6 = vpop.permute.xlu1 %981 }
 0x7c0   :  { %v989_v37 = vsel %vm504_vm4, %v726_v3, %v982_v6 }
 0x7c1   :  { %4609 = vmatmul.mubr.msk.f32.vlgmr.msra.gmra.mxu0 %vm170_vm2, %v989_v37 }
 0x7c2   :  { %v1470_v8 = vpop.f32.mrf.mxu1 }
 0x7c3   :  { %1481 = vrot.lane.b32.xlu1 %v1470_v8, %s5158_s24 }
 0x7c4   :  { %v4599_v7 = vpop.f32.mrf.mxu1 }
 0x7f4   :  { %v984_v47 = vpop.permute.xlu0 %983 }
 0x7f5   :  { %v990_v12 = vsel %vm504_vm4, %v731_v24, %v984_v47 }
 0x7f6   :  { %4611 = vmatprep.mubr.msk.f32.mxu0 %vm170_vm2, %v990_v12 }
 0x804   :  { %v1478_v49 = vpop.permute.xlu1 %1477 }
 0x805   :  { %v1486_v50 = vsel %vm504_vm4, %v1219_v36, %v1478_v49 }
 0x806   :  { %4612 = vmatmul.mubr.msk.f32.gmra.mxu0 %vm170_vm2, %v1486_v50 }
 0x808   :  { %v1480_v52 = vpop.permute.xlu0 %1479 }
 0x809   :  { %v1487_v43 = vsel %vm504_vm4, %v1224_v1, %v1480_v52 }
 0x80a   :  { %4614 = vmatprep.mubr.msk.f32.mxu0 %vm170_vm2, %v1487_v43 }
 0x835   :  { %v1482_v54 = vpop.permute.xlu1 %1481 }
 0x836   :  { %v1488_v56 = vsel %vm504_vm4, %v1229_v21, %v1482_v54 }
 0x837   :  { %4615 = vmatmul.mubr.msk.f32.gmra.mxu0 %vm170_vm2, %v1488_v56 }
 0x881   :  { %v4610_v57 = vpop.f32.mrf.mxu0 }
 0x882   :  { %v1619_v53 = vadd.f32 %v4610_v57, %v5245_v23 }
 0x883   :  { %v1589_v61 = vpop.f32.mrf.mxu0 }
 0x884   :  { %v5704_v62 = vadd.f32 %v4126_v58, %v1619_v53  ;;  %v1618_v14 = vadd.f32 %v1589_v61, %v5249_v27 }
 0x886   :  { %v5707_v15 = vadd.f32 %v4126_v58, %v1618_v14  ;;  %v1640_v0 = vsel %vm170_vm2, %v5704_v62, 0.0  ;;  %v5768_v14 = vld [vmem:[%s6474_s5 + $0x6] ss:$0 sm:$0xff] }
 0x887   :  { %1641 = vadd.xlane.f32.xlu1 %v1640_v0 }
 0x888   :  { %v1637_v18 = vsel %vm170_vm2, %v5707_v15, 0.0 }
 0x889   :  { %1638 = vadd.xlane.f32.xlu0 %v1637_v18 }
 0x8c6   :  { %v4613_v16 = vpop.f32.mrf.mxu0 }
 0x8c7   :  { %v1621_v25 = vadd.f32 %v4613_v16, %v5259_v42 }
 0x8c8   :  { %v1599_v17 = vpop.f32.mrf.mxu0 }
 0x8c9   :  { %v1620_v23 = vadd.f32 %v1599_v17, %v5253_v33  ;;  %v5717_v39 = vadd.f32 %v4126_v58, %v1621_v25  ;;  %v5774_v17 = vld [vmem:[%s6474_s5 + $0x7] ss:$0 sm:$0xff] }
 0x8cb   :  { %v5715_v59 = vadd.f32 %v4126_v58, %v1620_v23  ;;  %v1646_v32 = vsel %vm170_vm2, %v5717_v39, 0.0 }
 0x8cd   :  { %v1643_v27 = vsel %vm170_vm2, %v5715_v59, 0.0 }
 0x8ce   :  { %1644 = vadd.xlane.f32.xlu0 %v1643_v27 }
 0x8d2   :  { %1647 = vadd.xlane.f32.xlu0 %v1646_v32 }
 0x8f7   :  { %v4616_v5 = vpop.f32.mrf.mxu0 }
 0x8f8   :  { %v1623_v9 = vadd.f32 %v4616_v5, %v5265_v46 }
 0x8f9   :  { %v1609_v10 = vpop.f32.mrf.mxu0 }
 0x8fa   :  { %v5724_v48 = vadd.f32 %v4126_v58, %v1623_v9  ;;  %v1622_v33 = vadd.f32 %v1609_v10, %v5257_v40 }
 0x8fc   :  { %v5727_v42 = vadd.f32 %v4126_v58, %v1622_v33  ;;  %v1652_v11 = vsel %vm170_vm2, %v5724_v48, 0.0 }
 0x8fd   :  { %1653 = vadd.xlane.f32.xlu0 %v1652_v11 }
 0x8fe   :  { %v1649_v51 = vsel %vm170_vm2, %v5727_v42, 0.0 }
 0x8ff   :  { %1650 = vadd.xlane.f32.xlu1 %v1649_v51 }
 0x910   :  { %v1642_v13 = vpop.xlane.xlu1 %1641 }
 0x911   :  { %v1656_v20 = vmul.f32 0.03125, %v1642_v13 }
 0x912   :  { %v1639_v3 = vpop.xlane.xlu0 %1638 }
 0x913   :  { %v1662_v46 = vsub.f32 %v5704_v62, %v1656_v20  ;;  %v1655_v22 = vmul.f32 0.03125, %v1639_v3 }
 0x915   :  { %v1661_v24 = vsub.f32 %v5707_v15, %v1655_v22  ;;  %v1668_v26 = vmul.f32 %v1662_v46, %v1662_v46 }
 0x917   :  { %v1676_v40 = vsel %vm170_vm2, %v1668_v26, 0.0  ;;  %v1667_v28 = vmul.f32 %v1661_v24, %v1661_v24  ;;  %v1926_v26 = vld [vmem:[%s6473_s4 + $0x78] sm:$0xff] }
 0x918   :  { %1677 = vadd.xlane.f32.xlu0 %v1676_v40  ;;  %4634 = vmatprep.subr.mxu0 %v1926_v26 }
 0x919   :  { %v1673_v29 = vsel %vm170_vm2, %v1667_v28, 0.0  ;;  %4635 = vmatpush3.msra.mxu0 %v1926_v26  ;;  %v1925_v28 = vld [vmem:[%s6473_s4 + $0x70] sm:$0xff] }
 0x91a   :  { %1674 = vadd.xlane.f32.xlu1 %v1673_v29  ;;  %4636 = vmatprep.subr.mxu0 %v1925_v28  ;;  %v1924_v29 = vld [vmem:[%s6473_s4 + $0x68] sm:$0xff] }
 0x91b   :  { %4637 = vmatpush3.msra.mxu0 %v1925_v28 }
 0x91c   :  { %4638 = vmatprep.subr.mxu0 %v1924_v29 }
 0x91d   :  { %4639 = vmatpush3.msra.mxu0 %v1924_v29 }
 0x91e   :  { %4640 = vmatprep.subr.mxu0 %v1923_v30 }
 0x91f   :  { %4641 = vmatpush3.msra.mxu0 %v1923_v30 }
 0x920   :  { %4642 = vmatprep.subr.mxu0 %v1922_v31 }
 0x921   :  { %4643 = vmatpush3.msra.mxu0 %v1922_v31 }
 0x922   :  { %4644 = vmatprep.subr.mxu0 %v1921_v34 }
 0x923   :  { %4645 = vmatpush3.msra.mxu0 %v1921_v34 }
 0x924   :  { %4646 = vmatprep.subr.mxu0 %v1920_v55 }
 0x925   :  { %4647 = vmatpush3.msra.mxu0 %v1920_v55 }
 0x957   :  { %v1645_v36 = vpop.xlane.xlu0 %1644 }
 0x958   :  { %v1657_v60 = vmul.f32 0.03125, %v1645_v36  ;;  %v1919_v36 = vld [vmem:[%s6473_s4 + $0x40] sm:$0xff] }
 0x959   :  { %4648 = vmatprep.subr.mxu0 %v1919_v36 }
 0x95a   :  { %v1663_v1 = vsub.f32 %v5715_v59, %v1657_v60  ;;  %4649 = vmatpush3.msra.mxu0 %v1919_v36  ;;  %v1918_v60 = vld [vmem:[%s6473_s4 + $0x38] sm:$0xff] }
 0x95b   :  { %v1648_v19 = vpop.xlane.xlu0 %1647  ;;  %4650 = vmatprep.subr.mxu0 %v1918_v60 }
 0x95c   :  { %v1658_v21 = vmul.f32 0.03125, %v1648_v19  ;;  %v1669_v38 = vmul.f32 %v1663_v1, %v1663_v1  ;;  %4651 = vmatpush3.msra.mxu0 %v1918_v60  ;;  %v1916_v19 = vld [vmem:[%s6473_s4 + $0x28] sm:$0xff] }
 0x95e   :  { %v1664_v63 = vsub.f32 %v5717_v39, %v1658_v21  ;;  %v1679_v41 = vsel %vm170_vm2, %v1669_v38, 0.0 }
 0x95f   :  { %1680 = vadd.xlane.f32.xlu1 %v1679_v41 }
 0x960   :  { %v1670_v44 = vmul.f32 %v1664_v63, %v1664_v63 }
 0x962   :  { %v1682_v35 = vsel %vm170_vm2, %v1670_v44, 0.0 }
 0x963   :  { %1683 = vadd.xlane.f32.xlu0 %v1682_v35 }
 0x986   :  { %v1654_v2 = vpop.xlane.xlu0 %1653 }
 0x987   :  { %v1660_v45 = vmul.f32 0.03125, %v1654_v2  ;;  %v1914_v2 = vld [vmem:[%s6473_s4 + $0x18] sm:$0xff] }
 0x988   :  { %v1651_v6 = vpop.xlane.xlu1 %1650 }
 0x989   :  { %v5754_v37 = vsub.f32 %v5724_v48, %v1660_v45  ;;  %v1659_v8 = vmul.f32 0.03125, %v1651_v6  ;;  %v1913_v6 = vld [vmem:[%s6473_s4 + $0x10] sm:$0xff] }
 0x98b   :  { %v5757_v7 = vsub.f32 %v5727_v42, %v1659_v8  ;;  %v1672_v47 = vmul.f32 %v5754_v37, %v5754_v37  ;;  %v1912_v8 = vld [vmem:[%s6473_s4 + $0x8] sm:$0xff] }
 0x98d   :  { %v1688_v12 = vsel %vm170_vm2, %v1672_v47, 0.0  ;;  %v1671_v49 = vmul.f32 %v5757_v7, %v5757_v7  ;;  %v1911_v47 = vld [vmem:[%s6473_s4] sm:$0xff] }
 0x98e   :  { %1689 = vadd.xlane.f32.xlu0 %v1688_v12 }
 0x98f   :  { %v1685_v50 = vsel %vm170_vm2, %v1671_v49, 0.0 }
 0x990   :  { %1686 = vadd.xlane.f32.xlu1 %v1685_v50 }
 0x9a1   :  { %v1678_v52 = vpop.xlane.xlu0 %1677 }
 0x9a2   :  { %v1692_v43 = vmul.f32 0.03125, %v1678_v52 }
 0x9a3   :  { %v1675_v54 = vpop.xlane.xlu1 %1674 }
 0x9a4   :  { %v1698_v56 = vadd.f32 1e-05, %v1692_v43  ;;  %v1691_v57 = vmul.f32 0.03125, %v1675_v54 }
 0x9a6   :  { %4989 = vrsqrt.f32 %v1698_v56  ;;  %v1697_v58 = vadd.f32 1e-05, %v1691_v57 }
 0x9a8   :  { %4991 = vrsqrt.f32 %v1697_v58  ;;  %v4129_v58 = vld [vmem:[%s6474_s5 + $0xa] ss:$0 sm:$0xff] }
 0x9b3   :  { %v4990_v53 = vpop.eup %4989 }
 0x9b4   :  { %v1710_v61 = vmul.f32 %v4990_v53, %v1662_v46 }
 0x9b5   :  { %v4992_v0 = vpop.eup %4991 }
 0x9b6   :  { %v1709_v18 = vmul.f32 %v4992_v0, %v1661_v24  ;;  %v1720_v16 = vmul.f32 %v5768_v14, %v1710_v61 }
 0x9b8   :  { %v1719_v25 = vmul.f32 %v5768_v14, %v1709_v18  ;;  %v1730_v27 = vadd.f32 %v5774_v17, %v1720_v16 }
 0x9ba   :  { %v1729_v23 = vadd.f32 %v5774_v17, %v1719_v25 }
 0x9bc   :  { %4625 = vmatprep.mubr.msk.f32.mxu1 %vm170_vm2, %v1729_v23 }
 0x9bd   :  { %4626 = vmatmul.mubr.msk.f32.vlgmr.msra.gmra.mxu1 %vm170_vm2, %v1730_v27 }
 0x9e8   :  { %v1681_v32 = vpop.xlane.xlu1 %1680 }
 0x9e9   :  { %v1693_v5 = vmul.f32 0.03125, %v1681_v32 }
 0x9eb   :  { %v1699_v9 = vadd.f32 1e-05, %v1693_v5 }
 0x9ec   :  { %v1684_v10 = vpop.xlane.xlu0 %1683 }
 0x9ed   :  { %4993 = vrsqrt.f32 %v1699_v9  ;;  %v1694_v33 = vmul.f32 0.03125, %v1684_v10 }
 0x9ef   :  { %v1700_v11 = vadd.f32 1e-05, %v1694_v33 }
 0x9f1   :  { %4995 = vrsqrt.f32 %v1700_v11 }
 0x9fa   :  { %v4994_v51 = vpop.eup %4993 }
 0x9fb   :  { %v1711_v13 = vmul.f32 %v4994_v51, %v1663_v1  ;;  %v1917_v1 = vld [vmem:[%s6473_s4 + $0x30] sm:$0xff] }
 0x9fc   :  { %4652 = vmatprep.subr.mxu0 %v1917_v1 }
 0x9fd   :  { %v1721_v20 = vmul.f32 %v5768_v14, %v1711_v13  ;;  %4653 = vmatpush3.msra.mxu0 %v1917_v1 }
 0x9fe   :  { %v4996_v3 = vpop.eup %4995  ;;  %4654 = vmatprep.subr.mxu0 %v1916_v19 }
 0x9ff   :  { %v1731_v46 = vadd.f32 %v5774_v17, %v1721_v20  ;;  %v1712_v22 = vmul.f32 %v4996_v3, %v1664_v63  ;;  %4655 = vmatpush3.msra.mxu0 %v1916_v19  ;;  %v1915_v63 = vld [vmem:[%s6473_s4 + $0x20] sm:$0xff] }
 0xa00   :  { %4656 = vmatprep.subr.mxu0 %v1915_v63 }
 0xa01   :  { %4628 = vmatprep.mubr.msk.f32.mxu1 %vm170_vm2, %v1731_v46  ;;  %v1722_v24 = vmul.f32 %v5768_v14, %v1712_v22  ;;  %4657 = vmatpush3.msra.mxu0 %v1915_v63 }
 0xa02   :  { %4658 = vmatprep.subr.mxu0 %v1914_v2 }
 0xa03   :  { %v1732_v40 = vadd.f32 %v5774_v17, %v1722_v24  ;;  %4659 = vmatpush3.msra.mxu0 %v1914_v2 }
 0xa04   :  { %4660 = vmatprep.subr.mxu0 %v1913_v6 }
 0xa05   :  { %4629 = vmatmul.mubr.msk.f32.gmra.mxu1 %vm170_vm2, %v1732_v40  ;;  %4661 = vmatpush3.msra.mxu0 %v1913_v6 }
 0xa06   :  { %4662 = vmatprep.subr.mxu0 %v1912_v8 }
 0xa07   :  { %4663 = vmatpush3.msra.mxu0 %v1912_v8 }
 0xa08   :  { %4664 = vmatprep.subr.mxu0 %v1911_v47 }
 0xa09   :  { %4665 = vmatpush3.msra.mxu0 %v1911_v47 }
 0xa0a   :  { %4722 = vmatprep.subr.mxu0 %v5150_v4 }
 0xa17   :  { %v1690_v21 = vpop.xlane.xlu0 %1689 }
 0xa18   :  { %v1696_v38 = vmul.f32 0.03125, %v1690_v21 }
 0xa19   :  { %v1687_v41 = vpop.xlane.xlu1 %1686 }
 0xa1a   :  { %v1702_v44 = vadd.f32 1e-05, %v1696_v38  ;;  %v1695_v35 = vmul.f32 0.03125, %v1687_v41 }
 0xa1c   :  { %4997 = vrsqrt.f32 %v1702_v44  ;;  %v1701_v45 = vadd.f32 1e-05, %v1695_v35 }
 0xa1e   :  { %4999 = vrsqrt.f32 %v1701_v45 }
 0xa29   :  { %v4998_v12 = vpop.eup %4997 }
 0xa2a   :  { %v1714_v49 = vmul.f32 %v4998_v12, %v5754_v37 }
 0xa2b   :  { %v5000_v50 = vpop.eup %4999 }
 0xa2c   :  { %v1713_v52 = vmul.f32 %v5000_v50, %v5757_v7  ;;  %v1724_v43 = vmul.f32 %v5768_v14, %v1714_v49 }
 0xa2e   :  { %v1723_v54 = vmul.f32 %v5768_v14, %v1713_v52  ;;  %v1734_v57 = vadd.f32 %v5774_v17, %v1724_v43 }
 0xa30   :  { %v1733_v56 = vadd.f32 %v5774_v17, %v1723_v54 }
 0xa32   :  { %4631 = vmatprep.mubr.msk.f32.mxu1 %vm170_vm2, %v1733_v56 }
 0xa33   :  { %4632 = vmatmul.mubr.msk.f32.gmra.mxu1 %vm170_vm2, %v1734_v57 }
 0xa7d   :  { %v4627_v37 = vpop.f32.mrf.mxu1 }
 0xa7e   :  { %v1834_v53 = vadd.f32 %v4627_v37, %v4129_v58 }
 0xa7f   :  { %v1828_v61 = vpop.f32.mrf.mxu1 }
 0xa80   :  { %v1858_v7 = vmul.f32 %v1834_v53, %v1834_v53  ;;  %v1829_v0 = vadd.f32 %v4129_v58, %v1828_v61 }
 0xa82   :  { %v1864_v18 = vmul.f32 %v1858_v7, %v1834_v53  ;;  %v1857_v16 = vmul.f32 %v1829_v0, %v1829_v0 }
 0xa84   :  { %v1870_v14 = vmul.f32 0.044715, %v1864_v18  ;;  %v1863_v25 = vmul.f32 %v1857_v16, %v1829_v0 }
 0xa86   :  { %v1876_v23 = vadd.f32 %v1870_v14, %v1834_v53  ;;  %v1869_v27 = vmul.f32 0.044715, %v1863_v25 }
 0xa88   :  { %v1882_v17 = vmul.f32 0.7978846, %v1876_v23  ;;  %v1875_v32 = vadd.f32 %v1869_v27, %v1829_v0  ;;  %v4136_v27 = vld [vmem:[%s6474_s5 + $0xb] ss:$0 sm:$0xff] }
 0xa8a   :  { %5001 = vtanh.f32 %v1882_v17  ;;  %v1881_v5 = vmul.f32 0.7978846, %v1875_v32 }
 0xa8c   :  { %5003 = vtanh.f32 %v1881_v5 }
 0xa97   :  { %v5002_v9 = vpop.eup %5001 }
 0xa98   :  { %v1894_v10 = vadd.f32 1.0, %v5002_v9 }
 0xa99   :  { %v5004_v33 = vpop.eup %5003 }
 0xa9a   :  { %v1893_v11 = vadd.f32 1.0, %v5004_v33  ;;  %v1900_v51 = vmul.f32 0.5, %v1894_v10 }
 0xa9c   :  { %v1899_v13 = vmul.f32 0.5, %v1893_v11  ;;  %v1906_v3 = vmul.f32 %v1900_v51, %v1834_v53 }
 0xa9e   :  { %v1905_v20 = vmul.f32 %v1899_v13, %v1829_v0 }
 0xaa0   :  { %4666 = vmatprep.mubr.f32.mxu0 %v1905_v20 }
 0xaa1   :  { %4667 = vmatmul.mubr.f32.vlgmr.msra.gmra.mxu0 %v1906_v3 }
 0xac5   :  { %v4630_v46 = vpop.f32.mrf.mxu1 }
 0xac6   :  { %v1844_v22 = vadd.f32 %v4630_v46, %v4129_v58 }
 0xac7   :  { %v1838_v24 = vpop.f32.mrf.mxu1 }
 0xac8   :  { %v1860_v26 = vmul.f32 %v1844_v22, %v1844_v22  ;;  %v1839_v40 = vadd.f32 %v4129_v58, %v1838_v24 }
 0xaca   :  { %v1866_v28 = vmul.f32 %v1860_v26, %v1844_v22  ;;  %v1859_v29 = vmul.f32 %v1839_v40, %v1839_v40 }
 0xacc   :  { %v1872_v30 = vmul.f32 0.044715, %v1866_v28  ;;  %v1865_v31 = vmul.f32 %v1859_v29, %v1839_v40 }
 0xace   :  { %v1878_v34 = vadd.f32 %v1872_v30, %v1844_v22  ;;  %v1871_v55 = vmul.f32 0.044715, %v1865_v31 }
 0xad0   :  { %v1884_v36 = vmul.f32 0.7978846, %v1878_v34  ;;  %v1877_v60 = vadd.f32 %v1871_v55, %v1839_v40 }
 0xad2   :  { %5005 = vtanh.f32 %v1884_v36  ;;  %v1883_v1 = vmul.f32 0.7978846, %v1877_v60 }
 0xad4   :  { %5007 = vtanh.f32 %v1883_v1 }
 0xadf   :  { %v5006_v19 = vpop.eup %5005 }
 0xae0   :  { %v1896_v21 = vadd.f32 1.0, %v5006_v19 }
 0xae1   :  { %v5008_v38 = vpop.eup %5007 }
 0xae2   :  { %v1895_v63 = vadd.f32 1.0, %v5008_v38  ;;  %v1902_v41 = vmul.f32 0.5, %v1896_v21  ;;  %v5889_v38 = vld [vmem:[%s6471_s2 + $0x38] sm:$0xff] }
 0xae3   :  { %4675 = vmatprep.subr.mxu1 %v5889_v38 }
 0xae4   :  { %v1901_v44 = vmul.f32 0.5, %v1895_v63  ;;  %v1908_v2 = vmul.f32 %v1902_v41, %v1844_v22  ;;  %v5894_v63 = vld [vmem:[%s6471_s2 + $0x30] sm:$0xff]  ;;  %4676 = vmatpush3.msra.mxu1 %v5889_v38  ;;  %v5901_v41 = vld [vmem:[%s6471_s2 + $0x28] sm:$0xff] }
 0xae5   :  { %4677 = vmatprep.subr.mxu1 %v5894_v63 }
 0xae6   :  { %v1907_v35 = vmul.f32 %v1901_v44, %v1839_v40  ;;  %4678 = vmatpush3.msra.mxu1 %v5894_v63  ;;  %v5908_v44 = vld [vmem:[%s6471_s2 + $0x20] sm:$0xff] }
 0xae7   :  { %4679 = vmatprep.subr.mxu1 %v5901_v41 }
 0xae8   :  { %4669 = vmatprep.mubr.f32.mxu0 %v1907_v35  ;;  %4680 = vmatpush3.msra.mxu1 %v5901_v41 }
 0xae9   :  { %4670 = vmatmul.mubr.f32.gmra.mxu0 %v1908_v2  ;;  %4681 = vmatprep.subr.mxu1 %v5908_v44 }
 0xaea   :  { %4682 = vmatpush3.msra.mxu1 %v5908_v44 }
 0xaeb   :  { %4692 = vmatprep.subr.mxu1 %v5150_v4 }
 0xaf3   :  { %v4633_v45 = vpop.f32.mrf.mxu1 }
 0xaf4   :  { %v1854_v6 = vadd.f32 %v4633_v45, %v4129_v58 }
 0xaf5   :  { %v1848_v8 = vpop.f32.mrf.mxu1 }
 0xaf6   :  { %v1862_v47 = vmul.f32 %v1854_v6, %v1854_v6  ;;  %v1849_v12 = vadd.f32 %v4129_v58, %v1848_v8 }
 0xaf8   :  { %v1868_v49 = vmul.f32 %v1862_v47, %v1854_v6  ;;  %v1861_v50 = vmul.f32 %v1849_v12, %v1849_v12 }
 0xafa   :  { %v1874_v52 = vmul.f32 0.044715, %v1868_v49  ;;  %v1867_v43 = vmul.f32 %v1861_v50, %v1849_v12 }
 0xafc   :  { %v1880_v54 = vadd.f32 %v1874_v52, %v1854_v6  ;;  %v1873_v56 = vmul.f32 0.044715, %v1867_v43 }
 0xafe   :  { %v1886_v57 = vmul.f32 0.7978846, %v1880_v54  ;;  %v1879_v37 = vadd.f32 %v1873_v56, %v1849_v12 }
 0xb00   :  { %5009 = vtanh.f32 %v1886_v57  ;;  %v1885_v53 = vmul.f32 0.7978846, %v1879_v37 }
 0xb02   :  { %5011 = vtanh.f32 %v1885_v53 }
 0xb0d   :  { %v5010_v61 = vpop.eup %5009 }
 0xb0e   :  { %v1898_v7 = vadd.f32 1.0, %v5010_v61 }
 0xb0f   :  { %v5012_v0 = vpop.eup %5011 }
 0xb10   :  { %v1897_v18 = vadd.f32 1.0, %v5012_v0  ;;  %v1904_v16 = vmul.f32 0.5, %v1898_v7 }
 0xb12   :  { %v1903_v14 = vmul.f32 0.5, %v1897_v18  ;;  %v1910_v23 = vmul.f32 %v1904_v16, %v1854_v6 }
 0xb14   :  { %v1909_v25 = vmul.f32 %v1903_v14, %v1849_v12 }
 0xb16   :  { %4672 = vmatprep.mubr.f32.mxu0 %v1909_v25 }
 0xb17   :  { %4673 = vmatmul.mubr.f32.gmra.mxu0 %v1910_v23 }
 0xb18   :  { %4728 = vmatprep.mubr.msk.f32.mxu0 %vm5153_vm3, %v5150_v4 }
 0xb61   :  { %v4668_v58 = vpop.f32.mrf.mxu0 }
 0xb62   :  { %v2023_v17 = vadd.f32 %v4668_v58, %v5704_v62 }
 0xb63   :  { %v1993_v32 = vpop.f32.mrf.mxu0 }
 0xb64   :  { %v5853_v5 = vadd.f32 %v4136_v27, %v2023_v17  ;;  %v2022_v9 = vadd.f32 %v1993_v32, %v5707_v15  ;;  %v4141_v32 = vld [vmem:[%s6474_s5 + $0xc] ss:$0 sm:$0xff] }
 0xb66   :  { %v5856_v10 = vadd.f32 %v4136_v27, %v2022_v9  ;;  %v2049_v33 = vsel %vm170_vm2, %v5853_v5, 0.0 }
 0xb67   :  { %2050 = vadd.xlane.f32.xlu0 %v2049_v33 }
 0xb68   :  { %v2046_v11 = vsel %vm170_vm2, %v5856_v10, 0.0 }
 0xb69   :  { %2047 = vadd.xlane.f32.xlu1 %v2046_v11 }
 0xba9   :  { %v4671_v51 = vpop.f32.mrf.mxu0 }
 0xbaa   :  { %v2025_v13 = vadd.f32 %v4671_v51, %v5717_v39 }
 0xbab   :  { %v2003_v20 = vpop.f32.mrf.mxu0 }
 0xbac   :  { %v5863_v62 = vadd.f32 %v4136_v27, %v2025_v13  ;;  %v2024_v3 = vadd.f32 %v2003_v20, %v5715_v59  ;;  %v4142_v13 = vld [vmem:[%s6474_s5 + $0xd] ss:$0 sm:$0xff] }
 0xbae   :  { %v5866_v46 = vadd.f32 %v4136_v27, %v2024_v3  ;;  %v2055_v15 = vsel %vm170_vm2, %v5863_v62, 0.0 }
 0xbaf   :  { %2056 = vadd.xlane.f32.xlu0 %v2055_v15 }
 0xbb0   :  { %v2052_v22 = vsel %vm170_vm2, %v5866_v46, 0.0 }
 0xbb1   :  { %2053 = vadd.xlane.f32.xlu1 %v2052_v22 }
 0xbd7   :  { %v4674_v24 = vpop.f32.mrf.mxu0 }
 0xbd8   :  { %v2027_v26 = vadd.f32 %v4674_v24, %v5724_v48 }
 0xbd9   :  { %v2013_v40 = vpop.f32.mrf.mxu0 }
 0xbda   :  { %v5873_v39 = vadd.f32 %v4136_v27, %v2027_v26  ;;  %v2026_v28 = vadd.f32 %v2013_v40, %v5727_v42 }
 0xbdc   :  { %v5876_v29 = vadd.f32 %v4136_v27, %v2026_v28  ;;  %v2061_v59 = vsel %vm170_vm2, %v5873_v39, 0.0 }
 0xbdd   :  { %2062 = vadd.xlane.f32.xlu0 %v2061_v59 }
 0xbde   :  { %v2058_v30 = vsel %vm170_vm2, %v5876_v29, 0.0 }
 0xbdf   :  { %2059 = vadd.xlane.f32.xlu1 %v2058_v30 }
 0xbf0   :  { %v2051_v31 = vpop.xlane.xlu0 %2050 }
 0xbf1   :  { %v2065_v34 = vmul.f32 0.03125, %v2051_v31 }
 0xbf2   :  { %v2048_v55 = vpop.xlane.xlu1 %2047 }
 0xbf3   :  { %v2071_v48 = vsub.f32 %v5853_v5, %v2065_v34  ;;  %v2064_v36 = vmul.f32 0.03125, %v2048_v55 }
 0xbf5   :  { %v2070_v60 = vsub.f32 %v5856_v10, %v2064_v36  ;;  %v2077_v1 = vmul.f32 %v2071_v48, %v2071_v48 }
 0xbf7   :  { %v2085_v42 = vsel %vm170_vm2, %v2077_v1, 0.0  ;;  %v2076_v19 = vmul.f32 %v2070_v60, %v2070_v60 }
 0xbf8   :  { %2086 = vadd.xlane.f32.xlu0 %v2085_v42 }
 0xbf9   :  { %v2082_v21 = vsel %vm170_vm2, %v2076_v19, 0.0 }
 0xbfa   :  { %2083 = vadd.xlane.f32.xlu1 %v2082_v21 }
 0xc38   :  { %v2057_v35 = vpop.xlane.xlu0 %2056 }
 0xc39   :  { %v2067_v2 = vmul.f32 0.03125, %v2057_v35 }
 0xc3a   :  { %v2054_v45 = vpop.xlane.xlu1 %2053 }
 0xc3b   :  { %v2073_v6 = vsub.f32 %v5863_v62, %v2067_v2  ;;  %v2066_v8 = vmul.f32 0.03125, %v2054_v45 }
 0xc3d   :  { %v2072_v47 = vsub.f32 %v5866_v46, %v2066_v8  ;;  %v2079_v12 = vmul.f32 %v2073_v6, %v2073_v6 }
 0xc3f   :  { %v2091_v49 = vsel %vm170_vm2, %v2079_v12, 0.0  ;;  %v2078_v50 = vmul.f32 %v2072_v47, %v2072_v47 }
 0xc40   :  { %2092 = vadd.xlane.f32.xlu0 %v2091_v49 }
 0xc41   :  { %v2088_v52 = vsel %vm170_vm2, %v2078_v50, 0.0 }
 0xc42   :  { %2089 = vadd.xlane.f32.xlu1 %v2088_v52 }
 0xc66   :  { %v2063_v43 = vpop.xlane.xlu0 %2062 }
 0xc67   :  { %v2069_v54 = vmul.f32 0.03125, %v2063_v43 }
 0xc68   :  { %v2060_v56 = vpop.xlane.xlu1 %2059 }
 0xc69   :  { %v2075_v57 = vsub.f32 %v5873_v39, %v2069_v54  ;;  %v2068_v37 = vmul.f32 0.03125, %v2060_v56  ;;  %v4143_v54 = vld [vmem:[%s6474_s5 + $0x10] ss:$0 sm:$0xff] }
 0xc6b   :  { %v2074_v53 = vsub.f32 %v5876_v29, %v2068_v37  ;;  %v2081_v61 = vmul.f32 %v2075_v57, %v2075_v57 }
 0xc6d   :  { %v2097_v7 = vsel %vm170_vm2, %v2081_v61, 0.0  ;;  %v2080_v0 = vmul.f32 %v2074_v53, %v2074_v53 }
 0xc6e   :  { %2098 = vadd.xlane.f32.xlu0 %v2097_v7 }
 0xc6f   :  { %v2094_v18 = vsel %vm170_vm2, %v2080_v0, 0.0 }
 0xc70   :  { %2095 = vadd.xlane.f32.xlu1 %v2094_v18 }
 0xc81   :  { %v2087_v16 = vpop.xlane.xlu0 %2086 }
 0xc82   :  { %v2101_v14 = vmul.f32 0.03125, %v2087_v16 }
 0xc83   :  { %v2084_v25 = vpop.xlane.xlu1 %2083 }
 0xc84   :  { %v2107_v23 = vadd.f32 1e-05, %v2101_v14  ;;  %v2100_v58 = vmul.f32 0.03125, %v2084_v25 }
 0xc86   :  { %5013 = vrsqrt.f32 %v2107_v23  ;;  %v2106_v27 = vadd.f32 1e-05, %v2100_v58 }
 0xc88   :  { %5015 = vrsqrt.f32 %v2106_v27 }
 0xc93   :  { %v5014_v17 = vpop.eup %5013 }
 0xc94   :  { %v2119_v9 = vmul.f32 %v5014_v17, %v2071_v48 }
 0xc95   :  { %v5016_v33 = vpop.eup %5015 }
 0xc96   :  { %v2118_v11 = vmul.f32 %v5016_v33, %v2070_v60  ;;  %v2129_v51 = vmul.f32 %v4141_v32, %v2119_v9 }
 0xc98   :  { %v2128_v20 = vmul.f32 %v4141_v32, %v2118_v11  ;;  %v2139_v15 = vadd.f32 %v4142_v13, %v2129_v51 }
 0xc9a   :  { %v2138_v3 = vadd.f32 %v4142_v13, %v2128_v20 }
 0xc9c   :  { %4683 = vmatprep.mubr.msk.f32.mxu1 %vm170_vm2, %v2138_v3 }
 0xc9d   :  { %4684 = vmatmul.mubr.msk.f32.vlgmr.msra.gmra.mxu1 %vm170_vm2, %v2139_v15 }
 0xcc9   :  { %v2093_v22 = vpop.xlane.xlu0 %2092 }
 0xcca   :  { %v2103_v24 = vmul.f32 0.03125, %v2093_v22 }
 0xccb   :  { %v2090_v26 = vpop.xlane.xlu1 %2089 }
 0xccc   :  { %v2109_v40 = vadd.f32 1e-05, %v2103_v24  ;;  %v2102_v28 = vmul.f32 0.03125, %v2090_v26 }
 0xcce   :  { %5017 = vrsqrt.f32 %v2109_v40  ;;  %v2108_v59 = vadd.f32 1e-05, %v2102_v28 }
 0xcd0   :  { %5019 = vrsqrt.f32 %v2108_v59 }
 0xcdb   :  { %v5018_v30 = vpop.eup %5017 }
 0xcdc   :  { %v2121_v31 = vmul.f32 %v5018_v30, %v2073_v6 }
 0xcdd   :  { %v5020_v34 = vpop.eup %5019 }
 0xcde   :  { %v2120_v55 = vmul.f32 %v5020_v34, %v2072_v47  ;;  %v2131_v48 = vmul.f32 %v4141_v32, %v2121_v31 }
 0xce0   :  { %v2130_v36 = vmul.f32 %v4141_v32, %v2120_v55  ;;  %v2141_v1 = vadd.f32 %v4142_v13, %v2131_v48 }
 0xce2   :  { %v2140_v60 = vadd.f32 %v4142_v13, %v2130_v36 }
 0xce4   :  { %4686 = vmatprep.mubr.msk.f32.mxu1 %vm170_vm2, %v2140_v60  ;;  %v5121_v60 = vld [vmem:[%s6470_s1] sm:$0xff] }
 0xce5   :  { %4687 = vmatmul.mubr.msk.f32.gmra.mxu1 %vm170_vm2, %v2141_v1 }
 0xcf7   :  { %v2099_v42 = vpop.xlane.xlu0 %2098 }
 0xcf8   :  { %v2105_v19 = vmul.f32 0.03125, %v2099_v42 }
 0xcf9   :  { %v2096_v21 = vpop.xlane.xlu1 %2095 }
 0xcfa   :  { %v2111_v35 = vadd.f32 1e-05, %v2105_v19  ;;  %v2104_v2 = vmul.f32 0.03125, %v2096_v21 }
 0xcfc   :  { %5021 = vrsqrt.f32 %v2111_v35  ;;  %v2110_v45 = vadd.f32 1e-05, %v2104_v2  ;;  %v5122_v2 = vld [vmem:[%s6470_s1 + $0x8] sm:$0xff] }
 0xcfe   :  { %5023 = vrsqrt.f32 %v2110_v45 }
 0xd09   :  { %v5022_v8 = vpop.eup %5021 }
 0xd0a   :  { %v2123_v6 = vmul.f32 %v5022_v8, %v2075_v57 }
 0xd0b   :  { %v5024_v12 = vpop.eup %5023 }
 0xd0c   :  { %v2122_v47 = vmul.f32 %v5024_v12, %v2074_v53  ;;  %v2133_v49 = vmul.f32 %v4141_v32, %v2123_v6 }
 0xd0e   :  { %v2132_v50 = vmul.f32 %v4141_v32, %v2122_v47  ;;  %v2143_v43 = vadd.f32 %v4142_v13, %v2133_v49 }
 0xd10   :  { %v2142_v52 = vadd.f32 %v4142_v13, %v2132_v50 }
 0xd12   :  { %4689 = vmatprep.mubr.msk.f32.mxu1 %vm170_vm2, %v2142_v52 }
 0xd13   :  { %4690 = vmatmul.mubr.msk.f32.gmra.mxu1 %vm170_vm2, %v2143_v43 }
 0xd14   :  { %4698 = vmatprep.mubr.msk.f32.mxu1 %vm5153_vm3, %v5150_v4 }
 0xd5d   :  { %v4685_v56 = vpop.f32.mrf.mxu1 }
 0xd5e   :  { %v5940_v37 = vadd.f32 %v4685_v56, %v4143_v54  ;;  %v5123_v56 = vld [vmem:[%s6470_s1 + $0x10] sm:$0xff] }
 0xd5f   :  { %v2233_v57 = vpop.f32.mrf.mxu1 }
 0xd60   :  { %2267 = vrot.lane.b32.xlu0 %v5940_v37, %s5151_s7  ;;  %v5946_v53 = vadd.f32 %v4143_v54, %v2233_v57 }
 0xd64   :  { %2508 = vrot.lane.b32.xlu0 %v5940_v37, %s5152_s8 }
 0xd68   :  { %2500 = vrot.lane.b32.xlu0 %v5946_v53, %s5154_s9 }
 0xd6c   :  { %2502 = vrot.lane.b32.xlu0 %v5940_v37, %s5154_s9 }
 0xda5   :  { %v4688_v61 = vpop.f32.mrf.mxu1 }
 0xda6   :  { %v5965_v25 = vadd.f32 %v4688_v61, %v4143_v54 }
 0xda7   :  { %v2243_v7 = vpop.f32.mrf.mxu1 }
 0xda8   :  { %v2244_v0 = vadd.f32 %v4143_v54, %v2243_v7 }
 0xdaa   :  { %2504 = vrot.lane.b32.xlu0 %v2244_v0, %s5154_s9  ;;  %2269 = vrot.lane.b32.xlu1 %v2244_v0, %s5151_s7 }
 0xdae   :  { %2265 = vrot.lane.b32.xlu1 %v5946_v53, %s5151_s7 }
 0xdb2   :  { %2510 = vrot.lane.b32.xlu1 %v2244_v0, %s5152_s8 }
 0xdb6   :  { %2506 = vrot.lane.b32.xlu1 %v5946_v53, %s5152_s8 }
 0xdd2   :  { %v2268_v27 = vpop.permute.xlu0 %2267 }
 0xdd3   :  { %v4691_v18 = vpop.f32.mrf.mxu1 }
 0xdd4   :  { %v5959_v16 = vadd.f32 %v4691_v18, %v4143_v54 }
 0xdd5   :  { %v2253_v14 = vpop.f32.mrf.mxu1 }
 0xdd6   :  { %3004 = vrot.lane.b32.xlu0 %v5959_v16, %s5152_s8  ;;  %2763 = vrot.lane.b32.xlu1 %v5959_v16, %s5151_s7  ;;  %v5967_v23 = vadd.f32 %v4143_v54, %v2253_v14  ;;  %v2509_v9 = vpop.permute.xlu0 %2508 }
 0xdda   :  { %3000 = vrot.lane.b32.xlu0 %v5965_v25, %s5152_s8  ;;  %2761 = vrot.lane.b32.xlu1 %v5967_v23, %s5151_s7  ;;  %v2501_v11 = vpop.permute.xlu0 %2500 }
 0xdde   :  { %2996 = vrot.lane.b32.xlu0 %v5967_v23, %s5154_s9  ;;  %2759 = vrot.lane.b32.xlu1 %v5965_v25, %s5151_s7  ;;  %v2503_v51 = vpop.permute.xlu0 %2502 }
 0xde2   :  { %2404 = vrot.lane.b32.xlu0 %v5940_v37, %s5155_s10  ;;  %3002 = vrot.lane.b32.xlu1 %v5967_v23, %s5152_s8 }
 0xde6   :  { %2994 = vrot.lane.b32.xlu1 %v5965_v25, %s5154_s9 }
 0xdea   :  { %2998 = vrot.lane.b32.xlu1 %v5959_v16, %s5154_s9 }
 0xdee   :  { %2406 = vrot.lane.b32.xlu1 %v2244_v0, %s5155_s10 }
 0xdf2   :  { %2402 = vrot.lane.b32.xlu1 %v5946_v53, %s5155_s10 }
 0xdf6   :  { %2647 = vrot.lane.b32.xlu1 %v2244_v0, %s5156_s11 }
 0xe1c   :  { %v2270_v58 = vpop.permute.xlu1 %2269  ;;  %v2505_v13 = vpop.permute.xlu0 %2504 }
 0xe1d   :  { %4693 = vmatpush3.xpose.msk.msra.mxu1 %vm504_vm4, %v2270_v58 }
 0xe1e   :  { %4694 = vmatprep.subr.mxu1 %v5150_v4 }
 0xe20   :  { %v2266_v17 = vpop.permute.xlu1 %2265 }
 0xe21   :  { %4695 = vmatpush3.xpose.msk.msra.mxu1 %vm504_vm4, %v2268_v27 }
 0xe22   :  { %4696 = vmatprep.subr.mxu1 %v5150_v4 }
 0xe24   :  { %v2511_v32 = vpop.permute.xlu1 %2510 }
 0xe25   :  { %4697 = vmatpush3.xpose.msk.msra.mxu1 %vm504_vm4, %v2266_v17  ;;  %4723 = vmatpush3.xpose.msk.msra.mxu0 %vm504_vm4, %v2511_v32 }
 0xe26   :  { %4724 = vmatprep.subr.mxu0 %v5150_v4  ;;  %4707 = vmatprep.subr.mxu1 %v5150_v4 }
 0xe28   :  { %4699 = vmatmul.mubr.msk.f32.vlgmr.msra.gmra.mxu1 %vm504_vm4, %v5946_v53  ;;  %v2507_v33 = vpop.permute.xlu1 %2506 }
 0xe29   :  { %4725 = vmatpush3.xpose.msk.msra.mxu0 %vm504_vm4, %v2509_v9  ;;  %4701 = vmatprep.mubr.msk.f32.mxu1 %vm5153_vm3, %v5150_v4 }
 0xe2a   :  { %4726 = vmatprep.subr.mxu0 %v5150_v4 }
 0xe2c   :  { %4702 = vmatmul.mubr.msk.f32.gmra.mxu1 %vm504_vm4, %v5940_v37 }
 0xe2d   :  { %4727 = vmatpush3.xpose.msk.msra.mxu0 %vm504_vm4, %v2507_v33  ;;  %4704 = vmatprep.mubr.msk.f32.mxu1 %vm5153_vm3, %v5150_v4 }
 0xe2e   :  { %4752 = vmatprep.subr.mxu0 %v5150_v4 }
 0xe30   :  { %4705 = vmatmul.mubr.msk.f32.gmra.mxu1 %vm504_vm4, %v2244_v0  ;;  %4729 = vmatmul.mubr.msk.f32.vlgmr.msra.gmra.mxu0 %vm504_vm4, %v2501_v11 }
 0xe31   :  { %4731 = vmatprep.mubr.msk.f32.mxu0 %vm5153_vm3, %v5150_v4  ;;  %4713 = vmatprep.mubr.msk.f32.mxu1 %vm5153_vm3, %v5150_v4 }
 0xe34   :  { %4732 = vmatmul.mubr.msk.f32.gmra.mxu0 %vm504_vm4, %v2503_v51 }
 0xe35   :  { %4734 = vmatprep.mubr.msk.f32.mxu0 %vm5153_vm3, %v5150_v4 }
 0xe38   :  { %4735 = vmatmul.mubr.msk.f32.gmra.mxu0 %vm504_vm4, %v2505_v13 }
 0xe39   :  { %4758 = vmatprep.mubr.msk.f32.mxu0 %vm5153_vm3, %v5150_v4 }
 0xe48   :  { %v2764_v20 = vpop.permute.xlu1 %2763  ;;  %v3005_v15 = vpop.permute.xlu0 %3004 }
 0xe49   :  { %4753 = vmatpush3.xpose.msk.msra.mxu0 %vm504_vm4, %v2764_v20  ;;  %v5124_v20 = vld [vmem:[%s6470_s1 + $0x18] sm:$0xff] }
 0xe4a   :  { %4754 = vmatprep.subr.mxu0 %v5150_v4 }
 0xe4c   :  { %v2762_v3 = vpop.permute.xlu1 %2761  ;;  %v3001_v26 = vpop.permute.xlu0 %3000 }
 0xe4d   :  { %4755 = vmatpush3.xpose.msk.msra.mxu0 %vm504_vm4, %v2762_v3 }
 0xe4e   :  { %4756 = vmatprep.subr.mxu0 %v5150_v4 }
 0xe50   :  { %v2760_v22 = vpop.permute.xlu1 %2759  ;;  %v2997_v28 = vpop.permute.xlu0 %2996 }
 0xe51   :  { %4757 = vmatpush3.xpose.msk.msra.mxu0 %vm504_vm4, %v2760_v22 }
 0xe52   :  { %4782 = vmatprep.subr.mxu0 %v5150_v4 }
 0xe54   :  { %v3003_v24 = vpop.permute.xlu1 %3002  ;;  %4759 = vmatmul.mubr.msk.f32.vlgmr.msra.gmra.mxu0 %vm504_vm4, %v5965_v25  ;;  %v2405_v31 = vpop.permute.xlu0 %2404 }
 0xe55   :  { %4783 = vmatpush3.xpose.msk.msra.mxu0 %vm504_vm4, %v3005_v15  ;;  %4761 = vmatprep.mubr.msk.f32.mxu0 %vm5153_vm3, %v5150_v4 }
 0xe56   :  { %4784 = vmatprep.subr.mxu0 %v5150_v4 }
 0xe58   :  { %v2995_v40 = vpop.permute.xlu1 %2994  ;;  %4762 = vmatmul.mubr.msk.f32.gmra.mxu0 %vm504_vm4, %v5967_v23 }
 0xe59   :  { %4785 = vmatpush3.xpose.msk.msra.mxu0 %vm504_vm4, %v3003_v24  ;;  %4764 = vmatprep.mubr.msk.f32.mxu0 %vm5153_vm3, %v5150_v4 }
 0xe5a   :  { %4786 = vmatprep.subr.mxu0 %v5150_v4 }
 0xe5c   :  { %v2999_v59 = vpop.permute.xlu1 %2998  ;;  %4765 = vmatmul.mubr.msk.f32.gmra.mxu0 %vm504_vm4, %v5959_v16 }
 0xe5d   :  { %4787 = vmatpush3.xpose.msk.msra.mxu0 %vm504_vm4, %v3001_v26  ;;  %4788 = vmatprep.mubr.msk.f32.mxu0 %vm5153_vm3, %v5150_v4 }
 0xe60   :  { %v2407_v30 = vpop.permute.xlu1 %2406  ;;  %4789 = vmatmul.mubr.msk.f32.vlgmr.msra.gmra.mxu0 %vm504_vm4, %v2995_v40  ;;  %v5125_v40 = vld [vmem:[%s6470_s1 + $0x20] sm:$0xff] }
 0xe61   :  { %4708 = vmatpush3.msra.mxu1 %v2407_v30  ;;  %4791 = vmatprep.mubr.msk.f32.mxu0 %vm5153_vm3, %v5150_v4 }
 0xe62   :  { %4709 = vmatprep.subr.mxu1 %v5150_v4 }
 0xe63   :  { %4710 = vmatpush3.msra.mxu1 %v2405_v31 }
 0xe64   :  { %v2403_v34 = vpop.permute.xlu1 %2402  ;;  %4711 = vmatprep.subr.mxu1 %v5150_v4  ;;  %4792 = vmatmul.mubr.msk.f32.gmra.mxu0 %vm504_vm4, %v2997_v28 }
 0xe65   :  { %4712 = vmatpush3.msra.mxu1 %v2403_v34  ;;  %4794 = vmatprep.mubr.msk.f32.mxu0 %vm5153_vm3, %v5150_v4 }
 0xe66   :  { %4737 = vmatprep.subr.mxu1 %v5150_v4 }
 0xe68   :  { %4795 = vmatmul.mubr.msk.f32.gmra.mxu0 %vm504_vm4, %v2999_v59 }
 0xee8   :  { %v2349_v55 = vpop.f32.mrf.mxu1 }
 0xee9   :  { %v2363_v48 = vmul.f32 0.25, %v2349_v55  ;;  %v5126_v55 = vld [vmem:[%s6470_s1 + $0x28] sm:$0xff] }
 0xeea   :  { %v4700_v36 = vpop.f32.mrf.mxu1 }
 0xeeb   :  { %v6057_v1 = vadd.f32 %v5121_v60, %v2363_v48 }
 0xeec   :  { %v2354_v42 = vpop.f32.mrf.mxu1 }
 0xeed   :  { %v2364_v19 = vmul.f32 0.25, %v2354_v42  ;;  %v2369_v21 = vsel %vm603_vm5, %v6057_v1, -inf }
 0xeee   :  { %2370 = vmax.xlane.f32.xlu0 %v2369_v21  ;;  %v4703_v35 = vpop.f32.mrf.mxu1 }
 0xeef   :  { %v6064_v45 = vadd.f32 %v5122_v2, %v2364_v19 }
 0xef0   :  { %v2359_v8 = vpop.f32.mrf.mxu1  ;;  %v2590_v6 = vpop.f32.mrf.mxu0 }
 0xef1   :  { %v2365_v12 = vmul.f32 0.25, %v2359_v8  ;;  %v2604_v47 = vmul.f32 0.25, %v2590_v6  ;;  %v2372_v49 = vsel %vm603_vm5, %v6064_v45, -inf }
 0xef2   :  { %2373 = vmax.xlane.f32.xlu1 %v2372_v49  ;;  %v4706_v50 = vpop.f32.mrf.mxu1  ;;  %v4730_v52 = vpop.f32.mrf.mxu0 }
 0xef3   :  { %v6068_v43 = vadd.f32 %v5121_v60, %v2604_v47  ;;  %v6073_v57 = vadd.f32 %v5123_v56, %v2365_v12 }
 0xef4   :  { %v2595_v54 = vpop.f32.mrf.mxu0 }
 0xef5   :  { %v2605_v61 = vmul.f32 0.25, %v2595_v54  ;;  %v2610_v7 = vsel %vm603_vm5, %v6068_v43, -inf  ;;  %v2375_v27 = vsel %vm603_vm5, %v6073_v57, -inf }
 0xef6   :  { %2611 = vmax.xlane.f32.xlu0 %v2610_v7  ;;  %v4733_v0 = vpop.f32.mrf.mxu0 }
 0xef7   :  { %v6077_v18 = vadd.f32 %v5122_v2, %v2605_v61 }
 0xef8   :  { %v2600_v14 = vpop.f32.mrf.mxu0 }
 0xef9   :  { %v2606_v58 = vmul.f32 0.25, %v2600_v14  ;;  %v2613_v17 = vsel %vm603_vm5, %v6077_v18, -inf }
 0xefa   :  { %2376 = vmax.xlane.f32.xlu0 %v2375_v27  ;;  %2614 = vmax.xlane.f32.xlu1 %v2613_v17  ;;  %v4736_v32 = vpop.f32.mrf.mxu0 }
 0xefb   :  { %v6083_v9 = vadd.f32 %v5123_v56, %v2606_v58 }
 0xefd   :  { %v2616_v33 = vsel %vm603_vm5, %v6083_v9, -inf }
 0xefe   :  { %2617 = vmax.xlane.f32.xlu0 %v2616_v33 }
 0xf14   :  { %v2843_v11 = vpop.f32.mrf.mxu0 }
 0xf15   :  { %v2857_v51 = vmul.f32 0.25, %v2843_v11 }
 0xf16   :  { %v4760_v13 = vpop.f32.mrf.mxu0 }
 0xf17   :  { %v6090_v3 = vadd.f32 %v5124_v20, %v2857_v51 }
 0xf18   :  { %v2848_v15 = vpop.f32.mrf.mxu0 }
 0xf19   :  { %v2858_v22 = vmul.f32 0.25, %v2848_v15  ;;  %v2863_v24 = vsel %vm603_vm5, %v6090_v3, -inf }
 0xf1a   :  { %2864 = vmax.xlane.f32.xlu1 %v2863_v24  ;;  %v4763_v26 = vpop.f32.mrf.mxu0 }
 0xf1b   :  { %v6097_v28 = vadd.f32 %v5125_v40, %v2858_v22 }
 0xf1c   :  { %v2853_v59 = vpop.f32.mrf.mxu0 }
 0xf1d   :  { %v2859_v30 = vmul.f32 0.25, %v2853_v59  ;;  %v2866_v31 = vsel %vm603_vm5, %v6097_v28, -inf }
 0xf1e   :  { %2867 = vmax.xlane.f32.xlu0 %v2866_v31  ;;  %v4766_v34 = vpop.f32.mrf.mxu0 }
 0xf1f   :  { %v6104_v48 = vadd.f32 %v5126_v55, %v2859_v30 }
 0xf20   :  { %v3084_v36 = vpop.f32.mrf.mxu0 }
 0xf21   :  { %v3098_v60 = vmul.f32 0.25, %v3084_v36  ;;  %v2869_v42 = vsel %vm603_vm5, %v6104_v48, -inf }
 0xf22   :  { %2870 = vmax.xlane.f32.xlu1 %v2869_v42  ;;  %v4790_v19 = vpop.f32.mrf.mxu0 }
 0xf23   :  { %v6108_v21 = vadd.f32 %v5124_v20, %v3098_v60 }
 0xf24   :  { %v3089_v35 = vpop.f32.mrf.mxu0 }
 0xf25   :  { %v3104_v2 = vsel %vm603_vm5, %v6108_v21, -inf  ;;  %v3099_v47 = vmul.f32 0.25, %v3089_v35 }
 0xf26   :  { %3105 = vmax.xlane.f32.xlu0 %v3104_v2  ;;  %v4793_v8 = vpop.f32.mrf.mxu0 }
 0xf27   :  { %v6118_v50 = vadd.f32 %v5125_v40, %v3099_v47 }
 0xf28   :  { %v3094_v6 = vpop.f32.mrf.mxu0 }
 0xf29   :  { %v3100_v49 = vmul.f32 0.25, %v3094_v6  ;;  %v3107_v54 = vsel %vm603_vm5, %v6118_v50, -inf }
 0xf2a   :  { %v4796_v12 = vpop.f32.mrf.mxu0 }
 0xf2b   :  { %v6120_v52 = vadd.f32 %v5126_v55, %v3100_v49 }
 0xf2d   :  { %v3110_v56 = vsel %vm603_vm5, %v6120_v52, -inf }
 0xf33   :  { %2643 = vrot.lane.b32.xlu1 %v5946_v53, %s5156_s11  ;;  %v6126_v53 = vpop.permute.xlu1 %2647 }
 0xf37   :  { %2900 = vrot.lane.b32.xlu1 %v5959_v16, %s5155_s10 }
 0xf3c   :  { %2645 = vrot.lane.b32.xlu0 %v5940_v37, %s5156_s11 }
 0xf5b   :  { %3108 = vmax.xlane.f32.xlu1 %v3107_v54  ;;  %3111 = vmax.xlane.f32.xlu0 %v3110_v56 }
 0xf77   :  { %v2371_v61 = vpop.xlane.xlu0 %2370 }
 0xf78   :  { %v2378_v7 = vsub.f32 %v6057_v1, %v2371_v61 }
 0xf7a   :  { %v2381_v37 = vmul.f32 1.442695, %v2378_v7 }
 0xf7b   :  { %v2374_v0 = vpop.xlane.xlu1 %2373 }
 0xf7c   :  { %5025 = vpow2.f32 %v2381_v37  ;;  %v2379_v14 = vsub.f32 %v6064_v45, %v2374_v0 }
 0xf7e   :  { %v2383_v17 = vmul.f32 1.442695, %v2379_v14 }
 0xf7f   :  { %v2612_v58 = vpop.xlane.xlu0 %2611 }
 0xf80   :  { %v2619_v27 = vsub.f32 %v6068_v43, %v2612_v58 }
 0xf82   :  { %v2622_v32 = vmul.f32 1.442695, %v2619_v27 }
 0xf83   :  { %v2615_v43 = vpop.xlane.xlu1 %2614  ;;  %v2377_v15 = vpop.xlane.xlu0 %2376 }
 0xf84   :  { %5027 = vpow2.f32 %v2622_v32  ;;  %v2620_v20 = vsub.f32 %v6077_v18, %v2615_v43  ;;  %v2380_v24 = vsub.f32 %v6073_v57, %v2377_v15 }
 0xf85   :  { %5029 = vpow2.f32 %v2383_v17 }
 0xf86   :  { %v2624_v22 = vmul.f32 1.442695, %v2620_v20  ;;  %v2385_v26 = vmul.f32 1.442695, %v2380_v24 }
 0xf87   :  { %v2618_v40 = vpop.xlane.xlu0 %2617 }
 0xf88   :  { %5031 = vpow2.f32 %v2624_v22  ;;  %v2621_v59 = vsub.f32 %v6083_v9, %v2618_v40 }
 0xf89   :  { %v6131_v33 = vpop.eup %5025  ;;  %5033 = vpow2.f32 %v2385_v26 }
 0xf8a   :  { %v2387_v11 = vsel %vm603_vm5, %v6131_v33, 0.0  ;;  %v2626_v31 = vmul.f32 1.442695, %v2621_v59 }
 0xf8b   :  { %2388 = vadd.xlane.f32.xlu1 %v2387_v11 }
 0xf8c   :  { %5035 = vpow2.f32 %v2626_v31 }
 0xf91   :  { %v6135_v51 = vpop.eup %5027 }
 0xf92   :  { %v2628_v1 = vsel %vm603_vm5, %v6135_v51, 0.0  ;;  %v6139_v13 = vpop.eup %5029 }
 0xf93   :  { %2629 = vadd.xlane.f32.xlu0 %v2628_v1  ;;  %v2390_v45 = vsel %vm603_vm5, %v6139_v13, 0.0 }
 0xf95   :  { %v6152_v57 = vpop.eup %5031 }
 0xf96   :  { %v2631_v9 = vsel %vm603_vm5, %v6152_v57, 0.0  ;;  %v6157_v2 = vpop.eup %5033 }
 0xf97   :  { %2391 = vadd.xlane.f32.xlu0 %v2390_v45  ;;  %v2393_v8 = vsel %vm603_vm5, %v6157_v2, 0.0 }
 0xf9c   :  { %2896 = vrot.lane.b32.xlu1 %v5965_v25, %s5155_s10 }
 0xfa3   :  { %v2865_v30 = vpop.xlane.xlu1 %2864 }
 0xfa4   :  { %v2872_v34 = vsub.f32 %v6090_v3, %v2865_v30 }
 0xfa6   :  { %v2875_v18 = vmul.f32 1.442695, %v2872_v34 }
 0xfa7   :  { %v2868_v55 = vpop.xlane.xlu0 %2867 }
 0xfa8   :  { %5037 = vpow2.f32 %v2875_v18  ;;  %v2873_v0 = vsub.f32 %v6097_v28, %v2868_v55 }
 0xfaa   :  { %v2877_v27 = vmul.f32 1.442695, %v2873_v0 }
 0xfab   :  { %v2871_v36 = vpop.xlane.xlu1 %2870 }
 0xfac   :  { %v2874_v60 = vsub.f32 %v6104_v48, %v2871_v36  ;;  %v6161_v48 = vpop.eup %5035 }
 0xfad   :  { %2898 = vrot.lane.b32.xlu0 %v5967_v23, %s5155_s10  ;;  %v2634_v6 = vsel %vm603_vm5, %v6161_v48, 0.0 }
 0xfae   :  { %v2879_v19 = vmul.f32 1.442695, %v2874_v60 }
 0xfaf   :  { %v3106_v42 = vpop.xlane.xlu0 %3105  ;;  %v2644_v61 = vpop.permute.xlu1 %2643 }
 0xfb0   :  { %v3113_v35 = vsub.f32 %v6108_v21, %v3106_v42  ;;  %5039 = vpow2.f32 %v2879_v19 }
 0xfb2   :  { %v3116_v3 = vmul.f32 1.442695, %v3113_v35 }
 0xfb3   :  { %v6179_v7 = vpop.permute.xlu1 %2900  ;;  %v2646_v37 = vpop.permute.xlu0 %2645 }
 0xfb4   :  { %5041 = vpow2.f32 %v3116_v3 }
 0xfb5   :  { %v6165_v12 = vpop.eup %5037  ;;  %5043 = vpow2.f32 %v2877_v27 }
 0xfb6   :  { %v2881_v21 = vsel %vm603_vm5, %v6165_v12, 0.0 }
 0xfbd   :  { %v6169_v47 = vpop.eup %5039 }
 0xfbe   :  { %v2887_v49 = vsel %vm603_vm5, %v6169_v47, 0.0 }
 0xfc0   :  { %2632 = vadd.xlane.f32.xlu1 %v2631_v9 }
 0xfc1   :  { %v6173_v54 = vpop.eup %5041 }
 0xfc2   :  { %v3122_v56 = vsel %vm603_vm5, %v6173_v54, 0.0  ;;  %v6184_v1 = vpop.eup %5043 }
 0xfc3   :  { %v2884_v28 = vsel %vm603_vm5, %v6184_v1, 0.0 }
 0xfc4   :  { %2394 = vadd.xlane.f32.xlu1 %v2393_v8 }
 0xfcc   :  { %2635 = vadd.xlane.f32.xlu0 %v2634_v6 }
 0xfd0   :  { %2882 = vadd.xlane.f32.xlu0 %v2881_v21 }
 0xfd4   :  { %2888 = vadd.xlane.f32.xlu0 %v2887_v49 }
 0xfd5   :  { %3141 = vrot.lane.b32.xlu1 %v5959_v16, %s5156_s11 }
 0xfd8   :  { %3123 = vadd.xlane.f32.xlu0 %v3122_v56 }
 0xfe4   :  { %v3109_v14 = vpop.xlane.xlu1 %3108  ;;  %v3112_v58 = vpop.xlane.xlu0 %3111 }
 0xfe5   :  { %v3114_v17 = vsub.f32 %v6118_v50, %v3109_v14  ;;  %v3115_v32 = vsub.f32 %v6120_v52, %v3112_v58 }
 0xfe7   :  { %v3120_v11 = vmul.f32 1.442695, %v3115_v32  ;;  %v3118_v16 = vmul.f32 1.442695, %v3114_v17 }
 0xfe9   :  { %5045 = vpow2.f32 %v3120_v11 }
 0xfea   :  { %5047 = vpow2.f32 %v3118_v16 }
 0xff6   :  { %v6186_v45 = vpop.eup %5045 }
 0xff7   :  { %v3128_v43 = vsel %vm603_vm5, %v6186_v45, 0.0  ;;  %v6192_v20 = vpop.eup %5047 }
 0xff8   :  { %3129 = vadd.xlane.f32.xlu0 %v3128_v43  ;;  %v3125_v50 = vsel %vm603_vm5, %v6192_v20, 0.0 }
 0xff9   :  { %2885 = vadd.xlane.f32.xlu1 %v2884_v28 }
 0xffd   :  { %3126 = vadd.xlane.f32.xlu1 %v3125_v50 }
0x100e   :  { %3137 = vrot.lane.b32.xlu1 %v5965_v25, %s5156_s11  ;;  %3139 = vrot.lane.b32.xlu0 %v5967_v23, %s5156_s11 }
0x1012   :  { %3260 = vrot.lane.b32.xlu0 %v5889_v38, %s5157_s23  ;;  %3258 = vrot.lane.b32.xlu1 %v5894_v63, %s5157_s23 }
0x1014   :  { %v2389_v52 = vpop.xlane.xlu1 %2388 }
0x1015   :  { %5049 = vrcp.f32 %v2389_v52 }
0x1016   :  { %3256 = vrot.lane.b32.xlu0 %v5901_v41, %s5157_s23 }
0x1018   :  { %v2897_v41 = vpop.permute.xlu1 %2896 }
0x101a   :  { %3254 = vrot.lane.b32.xlu0 %v5908_v44, %s5157_s23 }
0x101c   :  { %v2630_v15 = vpop.xlane.xlu0 %2629 }
0x1020   :  { %v2392_v22 = vpop.xlane.xlu0 %2391 }
0x1021   :  { %5051 = vrcp.f32 %v2392_v22 }
0x1022   :  { %v5050_v25 = vpop.eup %5049 }
0x1023   :  { %v2399_v23 = vmul.f32 %v5050_v25, %v6131_v33 }
0x1024   :  { %v2899_v33 = vpop.permute.xlu0 %2898 }
0x1025   :  { %4714 = vmatmul.mubr.msk.f32.vlgmr.msra.gmra.mxu1 %vm603_vm5, %v2399_v23 }
0x1026   :  { %4738 = vmatpush3.msra.mxu1 %v6126_v53  ;;  %4716 = vmatprep.mubr.msk.f32.mxu1 %vm5153_vm3, %v5150_v4 }
0x1027   :  { %4739 = vmatprep.subr.mxu1 %v5150_v4 }
0x1028   :  { %4740 = vmatpush3.msra.mxu1 %v2646_v37 }
0x1029   :  { %4741 = vmatprep.subr.mxu1 %v5150_v4 }
0x102a   :  { %4742 = vmatpush3.msra.mxu1 %v2644_v61 }
0x102b   :  { %4767 = vmatprep.subr.mxu1 %v5150_v4 }
0x102e   :  { %v5052_v38 = vpop.eup %5051 }
0x102f   :  { %v2400_v63 = vmul.f32 %v5052_v38, %v6139_v13 }
0x1031   :  { %4717 = vmatmul.mubr.msk.f32.gmra.mxu1 %vm603_vm5, %v2400_v63 }
0x1032   :  { %4719 = vmatprep.mubr.msk.f32.mxu1 %vm5153_vm3, %v5150_v4 }
0x1049   :  { %v2633_v44 = vpop.xlane.xlu1 %2632 }
0x104d   :  { %v2395_v53 = vpop.xlane.xlu1 %2394 }
0x104e   :  { %5053 = vrcp.f32 %v2395_v53 }
0x104f   :  { %5055 = vrcp.f32 %v2630_v15 }
0x1050   :  { %5057 = vrcp.f32 %v2633_v44 }
0x1051   :  { %v3142_v60 = vpop.permute.xlu1 %3141 }
0x1055   :  { %v2636_v24 = vpop.xlane.xlu0 %2635 }
0x1056   :  { %5059 = vrcp.f32 %v2636_v24 }
0x1059   :  { %v2883_v26 = vpop.xlane.xlu0 %2882 }
0x105a   :  { %5061 = vrcp.f32 %v2883_v26 }
0x105b   :  { %v5054_v40 = vpop.eup %5053 }
0x105c   :  { %v2401_v59 = vmul.f32 %v5054_v40, %v6157_v2  ;;  %v5056_v13 = vpop.eup %5055 }
0x105d   :  { %v2640_v30 = vmul.f32 %v5056_v13, %v6135_v51  ;;  %v5058_v31 = vpop.eup %5057 }
0x105e   :  { %4720 = vmatmul.mubr.msk.f32.gmra.mxu1 %vm603_vm5, %v2401_v59  ;;  %v2641_v34 = vmul.f32 %v5058_v31, %v6152_v57  ;;  %v2889_v57 = vpop.xlane.xlu0 %2888 }
0x105f   :  { %4743 = vmatprep.mubr.msk.f32.mxu1 %vm5153_vm3, %v5150_v4 }
0x1062   :  { %4744 = vmatmul.mubr.msk.f32.vlgmr.msra.gmra.mxu1 %vm603_vm5, %v2640_v30  ;;  %v3124_v42 = vpop.xlane.xlu0 %3123 }
0x1063   :  { %4768 = vmatpush3.msra.mxu1 %v6179_v7  ;;  %4746 = vmatprep.mubr.msk.f32.mxu1 %vm5153_vm3, %v5150_v4  ;;  %v5060_v55 = vpop.eup %5059 }
0x1064   :  { %4769 = vmatprep.subr.mxu1 %v5150_v4  ;;  %v2642_v51 = vmul.f32 %v5060_v55, %v6161_v48 }
0x1065   :  { %4770 = vmatpush3.msra.mxu1 %v2899_v33 }
0x1066   :  { %4771 = vmatprep.subr.mxu1 %v5150_v4  ;;  %4747 = vmatmul.mubr.msk.f32.gmra.mxu1 %vm603_vm5, %v2641_v34 }
0x1067   :  { %4772 = vmatpush3.msra.mxu1 %v2897_v41  ;;  %4749 = vmatprep.mubr.msk.f32.mxu1 %vm5153_vm3, %v5150_v4  ;;  %v5062_v36 = vpop.eup %5061 }
0x1068   :  { %4797 = vmatprep.subr.mxu1 %v5150_v4  ;;  %v2893_v18 = vmul.f32 %v5062_v36, %v6165_v12 }
0x106a   :  { %4750 = vmatmul.mubr.msk.f32.gmra.mxu1 %vm603_vm5, %v2642_v51 }
0x106b   :  { %4773 = vmatprep.mubr.msk.f32.mxu1 %vm5153_vm3, %v5150_v4 }
0x106e   :  { %4774 = vmatmul.mubr.msk.f32.vlgmr.msra.gmra.mxu1 %vm603_vm5, %v2893_v18 }
0x106f   :  { %4798 = vmatpush3.msra.mxu1 %v3142_v60  ;;  %4776 = vmatprep.mubr.msk.f32.mxu1 %vm5153_vm3, %v5150_v4 }
0x1070   :  { %4799 = vmatprep.subr.mxu1 %v5150_v4 }
0x1081   :  { %v3130_v19 = vpop.xlane.xlu0 %3129 }
0x1082   :  { %v2886_v35 = vpop.xlane.xlu1 %2885 }
0x1083   :  { %5063 = vrcp.f32 %v2886_v35 }
0x1084   :  { %5065 = vrcp.f32 %v2889_v57  ;;  %v4192_v57 = vld [vmem:[%s6474_s5 + $0x11] ss:$0 sm:$0xff] }
0x1085   :  { %v3140_v9 = vpop.permute.xlu0 %3139  ;;  %5067 = vrcp.f32 %v3124_v42 }
0x1086   :  { %v3127_v2 = vpop.xlane.xlu1 %3126  ;;  %4800 = vmatpush3.msra.mxu1 %v3140_v9 }
0x1087   :  { %4801 = vmatprep.subr.mxu1 %v5150_v4  ;;  %5069 = vrcp.f32 %v3127_v2 }
0x1088   :  { %5071 = vrcp.f32 %v3130_v19 }
0x108a   :  { %v3138_v3 = vpop.permute.xlu1 %3137 }
0x108b   :  { %4802 = vmatpush3.msra.mxu1 %v3138_v3 }
0x108e   :  { %v3259_v14 = vpop.permute.xlu1 %3258 }
0x1090   :  { %v5064_v8 = vpop.eup %5063 }
0x1091   :  { %v2894_v48 = vmul.f32 %v5064_v8, %v6184_v1  ;;  %v5066_v6 = vpop.eup %5065 }
0x1092   :  { %v2895_v12 = vmul.f32 %v5066_v6, %v6169_v47  ;;  %v5068_v21 = vpop.eup %5067 }
0x1093   :  { %4777 = vmatmul.mubr.msk.f32.gmra.mxu1 %vm603_vm5, %v2894_v48  ;;  %v3134_v49 = vmul.f32 %v5068_v21, %v6173_v54  ;;  %v3261_v54 = vpop.permute.xlu0 %3260 }
0x1094   :  { %4779 = vmatprep.mubr.msk.f32.mxu1 %vm5153_vm3, %v5150_v4  ;;  %v5070_v56 = vpop.eup %5069  ;;  %4812 = vmatprep.subr.mxu0 %v3261_v54 }
0x1095   :  { %v3135_v61 = vmul.f32 %v5070_v56, %v6192_v20  ;;  %v5072_v7 = vpop.eup %5071  ;;  %4813 = vmatpush3.msra.mxu0 %v3261_v54 }
0x1096   :  { %v3136_v47 = vmul.f32 %v5072_v7, %v6186_v45  ;;  %4814 = vmatprep.subr.mxu0 %v3259_v14 }
0x1097   :  { %4780 = vmatmul.mubr.msk.f32.gmra.mxu1 %vm603_vm5, %v2895_v12  ;;  %v3257_v58 = vpop.permute.xlu0 %3256  ;;  %4815 = vmatpush3.msra.mxu0 %v3259_v14 }
0x1098   :  { %4803 = vmatprep.mubr.msk.f32.mxu1 %vm5153_vm3, %v5150_v4  ;;  %4816 = vmatprep.subr.mxu0 %v3257_v58 }
0x1099   :  { %4817 = vmatpush3.msra.mxu0 %v3257_v58 }
0x109b   :  { %4804 = vmatmul.mubr.msk.f32.vlgmr.msra.gmra.mxu1 %vm603_vm5, %v3134_v49  ;;  %v3255_v32 = vpop.permute.xlu0 %3254 }
0x109c   :  { %4806 = vmatprep.mubr.msk.f32.mxu1 %vm5153_vm3, %v5150_v4  ;;  %4818 = vmatprep.subr.mxu0 %v3255_v32 }
0x109d   :  { %4819 = vmatpush3.msra.mxu0 %v3255_v32 }
0x109f   :  { %4807 = vmatmul.mubr.msk.f32.gmra.mxu1 %vm603_vm5, %v3135_v61 }
0x10a0   :  { %4809 = vmatprep.mubr.msk.f32.mxu1 %vm5153_vm3, %v5150_v4 }
0x10a3   :  { %4810 = vmatmul.mubr.msk.f32.gmra.mxu1 %vm603_vm5, %v3136_v47 }
0x10e5   :  { %v2486_v37 = vpop.f32.mrf.mxu1 }
0x10e7   :  { %v4715_v0 = vpop.f32.mrf.mxu1 }
0x10f1   :  { %v2491_v27 = vpop.f32.mrf.mxu1 }
0x10f3   :  { %v4718_v17 = vpop.f32.mrf.mxu1 }
0x111e   :  { %v2496_v4 = vpop.f32.mrf.mxu1 }
0x1120   :  { %v4721_v11 = vpop.f32.mrf.mxu1 }
0x1122   :  { %v2727_v16 = vpop.f32.mrf.mxu1 }
0x1123   :  { %2744 = vrot.lane.b32.xlu1 %v2727_v16, %s5158_s24 }
0x1124   :  { %v4745_v1 = vpop.f32.mrf.mxu1 }
0x1125   :  { %v4198_v1 = vld [vmem:[%s6472_s3 + $0x38] sm:$0xff] }
0x1126   :  { %v2732_v45 = vpop.f32.mrf.mxu1  ;;  %4829 = vmatprep.subr.mxu1 %v4198_v1 }
0x1127   :  { %2746 = vrot.lane.b32.xlu1 %v2732_v45, %s5158_s24  ;;  %v4197_v45 = vld [vmem:[%s6472_s3 + $0x30] sm:$0xff]  ;;  %4830 = vmatpush3.msra.mxu1 %v4198_v1 }
0x1128   :  { %v4748_v43 = vpop.f32.mrf.mxu1  ;;  %4831 = vmatprep.subr.mxu1 %v4197_v45 }
0x1129   :  { %v4196_v43 = vld [vmem:[%s6472_s3 + $0x28] sm:$0xff]  ;;  %4832 = vmatpush3.msra.mxu1 %v4197_v45 }
0x112a   :  { %v2737_v28 = vpop.f32.mrf.mxu1  ;;  %4833 = vmatprep.subr.mxu1 %v4196_v43 }
0x112b   :  { %2748 = vrot.lane.b32.xlu0 %v2737_v28, %s5158_s24  ;;  %v4195_v28 = vld [vmem:[%s6472_s3 + $0x20] sm:$0xff]  ;;  %4834 = vmatpush3.msra.mxu1 %v4196_v43 }
0x112c   :  { %v4751_v20 = vpop.f32.mrf.mxu1  ;;  %4835 = vmatprep.subr.mxu1 %v4195_v28 }
0x112d   :  { %4836 = vmatpush3.msra.mxu1 %v4195_v28 }
0x112e   :  { %v2980_v50 = vpop.f32.mrf.mxu1 }
0x1130   :  { %v4775_v52 = vpop.f32.mrf.mxu1 }
0x1153   :  { %v2985_v15 = vpop.f32.mrf.mxu1 }
0x1155   :  { %v4778_v22 = vpop.f32.mrf.mxu1 }
0x1157   :  { %v2990_v25 = vpop.f32.mrf.mxu1 }
0x1159   :  { %v4781_v23 = vpop.f32.mrf.mxu1 }
0x115b   :  { %v3221_v38 = vpop.f32.mrf.mxu1 }
0x115c   :  { %3238 = vrot.lane.b32.xlu1 %v3221_v38, %s5158_s24 }
0x115d   :  { %v4805_v63 = vpop.f32.mrf.mxu1 }
0x115f   :  { %v3226_v41 = vpop.f32.mrf.mxu1 }
0x1160   :  { %3240 = vrot.lane.b32.xlu0 %v3226_v41, %s5158_s24 }
0x1161   :  { %v4808_v44 = vpop.f32.mrf.mxu1 }
0x1163   :  { %v3231_v53 = vpop.f32.mrf.mxu1 }
0x1164   :  { %3242 = vrot.lane.b32.xlu1 %v3231_v53, %s5158_s24 }
0x1165   :  { %v4811_v33 = vpop.f32.mrf.mxu1 }
0x1195   :  { %v2745_v24 = vpop.permute.xlu1 %2744 }
0x1196   :  { %v2753_v26 = vsel %vm504_vm4, %v2486_v37, %v2745_v24 }
0x1197   :  { %4820 = vmatprep.mubr.msk.f32.mxu0 %vm170_vm2, %v2753_v26 }
0x1199   :  { %v2747_v40 = vpop.permute.xlu1 %2746 }
0x119a   :  { %v2754_v59 = vsel %vm504_vm4, %v2491_v27, %v2747_v40 }
0x119b   :  { %4821 = vmatmul.mubr.msk.f32.vlgmr.msra.gmra.mxu0 %vm170_vm2, %v2754_v59 }
0x119d   :  { %v2749_v13 = vpop.permute.xlu0 %2748 }
0x119e   :  { %v2755_v30 = vsel %vm504_vm4, %v2496_v4, %v2749_v13 }
0x119f   :  { %4823 = vmatprep.mubr.msk.f32.mxu0 %vm170_vm2, %v2755_v30 }
0x11ce   :  { %v3239_v31 = vpop.permute.xlu1 %3238 }
0x11cf   :  { %v3247_v34 = vsel %vm504_vm4, %v2980_v50, %v3239_v31 }
0x11d0   :  { %4824 = vmatmul.mubr.msk.f32.gmra.mxu0 %vm170_vm2, %v3247_v34 }
0x11d2   :  { %v3241_v55 = vpop.permute.xlu0 %3240 }
0x11d3   :  { %v3248_v51 = vsel %vm504_vm4, %v2985_v15, %v3241_v55 }
0x11d4   :  { %4826 = vmatprep.mubr.msk.f32.mxu0 %vm170_vm2, %v3248_v51 }
0x11d6   :  { %v3243_v36 = vpop.permute.xlu1 %3242 }
0x11d7   :  { %v3249_v18 = vsel %vm504_vm4, %v2990_v25, %v3243_v36 }
0x11d8   :  { %4827 = vmatmul.mubr.msk.f32.gmra.mxu0 %vm170_vm2, %v3249_v18 }
0x125b   :  { %v4822_v60 = vpop.f32.mrf.mxu0 }
0x125c   :  { %v3380_v42 = vadd.f32 %v4822_v60, %v5853_v5 }
0x125d   :  { %v3350_v19 = vpop.f32.mrf.mxu0 }
0x125e   :  { %v6286_v35 = vadd.f32 %v4192_v57, %v3380_v42  ;;  %v3379_v9 = vadd.f32 %v3350_v19, %v5856_v10  ;;  %v4193_v42 = vld [vmem:[%s6474_s5 + $0xe] ss:$0 sm:$0xff] }
0x1260   :  { %v6289_v2 = vadd.f32 %v4192_v57, %v3379_v9  ;;  %v3401_v3 = vsel %vm170_vm2, %v6286_v35, 0.0 }
0x1261   :  { %3402 = vadd.xlane.f32.xlu1 %v3401_v3 }
0x1262   :  { %v3398_v8 = vsel %vm170_vm2, %v6289_v2, 0.0 }
0x1263   :  { %3399 = vadd.xlane.f32.xlu0 %v3398_v8 }
0x1290   :  { %v4825_v48 = vpop.f32.mrf.mxu0 }
0x1291   :  { %v3382_v12 = vadd.f32 %v4825_v48, %v5863_v62  ;;  %v4194_v48 = vld [vmem:[%s6474_s5 + $0xf] ss:$0 sm:$0xff] }
0x1292   :  { %v3360_v6 = vpop.f32.mrf.mxu0 }
0x1293   :  { %v3381_v5 = vadd.f32 %v3360_v6, %v5866_v46  ;;  %v6299_v49 = vadd.f32 %v4192_v57, %v3382_v12 }
0x1295   :  { %v6297_v21 = vadd.f32 %v4192_v57, %v3381_v5  ;;  %v3407_v62 = vsel %vm170_vm2, %v6299_v49, 0.0 }
0x1297   :  { %v3404_v10 = vsel %vm170_vm2, %v6297_v21, 0.0 }
0x1298   :  { %3405 = vadd.xlane.f32.xlu0 %v3404_v10  ;;  %v4828_v56 = vpop.f32.mrf.mxu0 }
0x1299   :  { %v3384_v61 = vadd.f32 %v4828_v56, %v5873_v39 }
0x129a   :  { %v3370_v7 = vpop.f32.mrf.mxu0 }
0x129b   :  { %v6304_v47 = vadd.f32 %v4192_v57, %v3384_v61  ;;  %v3383_v37 = vadd.f32 %v3370_v7, %v5876_v29 }
0x129c   :  { %3408 = vadd.xlane.f32.xlu0 %v3407_v62 }
0x129d   :  { %v6309_v46 = vadd.f32 %v4192_v57, %v3383_v37  ;;  %v3413_v54 = vsel %vm170_vm2, %v6304_v47, 0.0 }
0x129f   :  { %v3410_v0 = vsel %vm170_vm2, %v6309_v46, 0.0 }
0x12a0   :  { %3414 = vadd.xlane.f32.xlu0 %v3413_v54  ;;  %3411 = vadd.xlane.f32.xlu1 %v3410_v0 }
0x12ea   :  { %v3403_v39 = vpop.xlane.xlu1 %3402 }
0x12eb   :  { %v3417_v14 = vmul.f32 0.03125, %v3403_v39 }
0x12ec   :  { %v3400_v58 = vpop.xlane.xlu0 %3399 }
0x12ed   :  { %v3423_v27 = vsub.f32 %v6286_v35, %v3417_v14  ;;  %v3416_v29 = vmul.f32 0.03125, %v3400_v58 }
0x12ef   :  { %v3422_v17 = vsub.f32 %v6289_v2, %v3416_v29  ;;  %v3429_v32 = vmul.f32 %v3423_v27, %v3423_v27 }
0x12f1   :  { %v3437_v4 = vsel %vm170_vm2, %v3429_v32, 0.0  ;;  %v3428_v11 = vmul.f32 %v3422_v17, %v3422_v17 }
0x12f2   :  { %3438 = vadd.xlane.f32.xlu0 %v3437_v4 }
0x12f3   :  { %v3434_v16 = vsel %vm170_vm2, %v3428_v11, 0.0 }
0x12f4   :  { %3435 = vadd.xlane.f32.xlu1 %v3434_v16 }
0x1321   :  { %v3406_v20 = vpop.xlane.xlu0 %3405 }
0x1322   :  { %v3418_v50 = vmul.f32 0.03125, %v3406_v20 }
0x1324   :  { %v3424_v52 = vsub.f32 %v6297_v21, %v3418_v50 }
0x1325   :  { %v3409_v15 = vpop.xlane.xlu0 %3408 }
0x1326   :  { %v3419_v22 = vmul.f32 0.03125, %v3409_v15  ;;  %v3430_v25 = vmul.f32 %v3424_v52, %v3424_v52 }
0x1328   :  { %v3425_v23 = vsub.f32 %v6299_v49, %v3419_v22  ;;  %v3440_v38 = vsel %vm170_vm2, %v3430_v25, 0.0 }
0x1329   :  { %v3412_v63 = vpop.xlane.xlu1 %3411  ;;  %3441 = vadd.xlane.f32.xlu1 %v3440_v38  ;;  %v3415_v41 = vpop.xlane.xlu0 %3414 }
0x132a   :  { %v3420_v44 = vmul.f32 0.03125, %v3412_v63  ;;  %v3421_v53 = vmul.f32 0.03125, %v3415_v41  ;;  %v3431_v33 = vmul.f32 %v3425_v23, %v3425_v23  ;;  %v4219_v63 = vld [vmem:[%s6473_s4 + $0xe8] sm:$0xff]  ;;  %v4218_v41 = vld [vmem:[%s6473_s4 + $0xe0] sm:$0xff] }
0x132c   :  { %v3426_v24 = vsub.f32 %v6309_v46, %v3420_v44  ;;  %v3427_v26 = vsub.f32 %v6304_v47, %v3421_v53  ;;  %v3443_v40 = vsel %vm170_vm2, %v3431_v33, 0.0  ;;  %v4217_v44 = vld [vmem:[%s6473_s4 + $0xd8] sm:$0xff]  ;;  %v4216_v53 = vld [vmem:[%s6473_s4 + $0xd0] sm:$0xff]  ;;  %v4215_v33 = vld [vmem:[%s6473_s4 + $0xc8] sm:$0xff] }
0x132d   :  { %3444 = vadd.xlane.f32.xlu0 %v3443_v40  ;;  %v4212_v40 = vld [vmem:[%s6473_s4 + $0xb0] sm:$0xff] }
0x132e   :  { %v3432_v59 = vmul.f32 %v3426_v24, %v3426_v24  ;;  %v3433_v13 = vmul.f32 %v3427_v26, %v3427_v26 }
0x1330   :  { %v3446_v30 = vsel %vm170_vm2, %v3432_v59, 0.0  ;;  %v3449_v31 = vsel %vm170_vm2, %v3433_v13, 0.0  ;;  %v4211_v59 = vld [vmem:[%s6473_s4 + $0xa8] sm:$0xff]  ;;  %v4210_v13 = vld [vmem:[%s6473_s4 + $0xa0] sm:$0xff] }
0x1331   :  { %3447 = vadd.xlane.f32.xlu1 %v3446_v30  ;;  %3450 = vadd.xlane.f32.xlu0 %v3449_v31  ;;  %v4209_v30 = vld [vmem:[%s6473_s4 + $0x98] sm:$0xff]  ;;  %v4208_v31 = vld [vmem:[%s6473_s4 + $0x90] sm:$0xff] }
0x137b   :  { %v3439_v34 = vpop.xlane.xlu0 %3438 }
0x137c   :  { %v3453_v55 = vmul.f32 0.03125, %v3439_v34  ;;  %v4207_v34 = vld [vmem:[%s6473_s4 + $0x88] sm:$0xff] }
0x137d   :  { %v3436_v51 = vpop.xlane.xlu1 %3435 }
0x137e   :  { %v3459_v36 = vadd.f32 1e-05, %v3453_v55  ;;  %v3452_v18 = vmul.f32 0.03125, %v3436_v51  ;;  %v4206_v55 = vld [vmem:[%s6473_s4 + $0x80] sm:$0xff]  ;;  %v4199_v51 = vld [vmem:[%s6474_s5 + $0x12] ss:$0 sm:$0xff] }
0x1380   :  { %5073 = vrsqrt.f32 %v3459_v36  ;;  %v3458_v60 = vadd.f32 1e-05, %v3452_v18 }
0x1382   :  { %5075 = vrsqrt.f32 %v3458_v60 }
0x138d   :  { %v5074_v57 = vpop.eup %5073 }
0x138e   :  { %v3471_v19 = vmul.f32 %v5074_v57, %v3423_v27 }
0x138f   :  { %v5076_v9 = vpop.eup %5075 }
0x1390   :  { %v3470_v3 = vmul.f32 %v5076_v9, %v3422_v17  ;;  %v3481_v8 = vmul.f32 %v4193_v42, %v3471_v19 }
0x1392   :  { %v3480_v6 = vmul.f32 %v4193_v42, %v3470_v3  ;;  %v3491_v5 = vadd.f32 %v4194_v48, %v3481_v8 }
0x1394   :  { %v3490_v12 = vadd.f32 %v4194_v48, %v3480_v6 }
0x1396   :  { %4837 = vmatprep.mubr.msk.f32.mxu1 %vm170_vm2, %v3490_v12 }
0x1397   :  { %4838 = vmatmul.mubr.msk.f32.vlgmr.msra.gmra.mxu1 %vm170_vm2, %v3491_v5 }
0x13b2   :  { %v3442_v10 = vpop.xlane.xlu1 %3441 }
0x13b3   :  { %v3454_v56 = vmul.f32 0.03125, %v3442_v10 }
0x13b5   :  { %v3460_v61 = vadd.f32 1e-05, %v3454_v56 }
0x13b6   :  { %v3445_v7 = vpop.xlane.xlu0 %3444 }
0x13b7   :  { %5077 = vrsqrt.f32 %v3460_v61  ;;  %v3455_v37 = vmul.f32 0.03125, %v3445_v7 }
0x13b9   :  { %v3461_v62 = vadd.f32 1e-05, %v3455_v37 }
0x13ba   :  { %v3448_v54 = vpop.xlane.xlu1 %3447  ;;  %v3451_v0 = vpop.xlane.xlu0 %3450 }
0x13bb   :  { %5079 = vrsqrt.f32 %v3461_v62  ;;  %v3456_v39 = vmul.f32 0.03125, %v3448_v54  ;;  %v3457_v14 = vmul.f32 0.03125, %v3451_v0 }
0x13bd   :  { %v3462_v58 = vadd.f32 1e-05, %v3456_v39  ;;  %v3463_v27 = vadd.f32 1e-05, %v3457_v14 }
0x13bf   :  { %5081 = vrsqrt.f32 %v3462_v58 }
0x13c0   :  { %5083 = vrsqrt.f32 %v3463_v27 }
0x13c4   :  { %v5078_v29 = vpop.eup %5077 }
0x13c5   :  { %v3472_v17 = vmul.f32 %v5078_v29, %v3424_v52  ;;  %v4221_v52 = vld [vmem:[%s6473_s4 + $0xf8] sm:$0xff] }
0x13c6   :  { %4846 = vmatprep.subr.mxu0 %v4221_v52 }
0x13c7   :  { %v3482_v32 = vmul.f32 %v4193_v42, %v3472_v17  ;;  %4847 = vmatpush3.msra.mxu0 %v4221_v52 }
0x13c8   :  { %v5080_v4 = vpop.eup %5079 }
0x13c9   :  { %v3492_v11 = vadd.f32 %v4194_v48, %v3482_v32  ;;  %v3473_v16 = vmul.f32 %v5080_v4, %v3425_v23  ;;  %v4220_v23 = vld [vmem:[%s6473_s4 + $0xf0] sm:$0xff] }
0x13ca   :  { %4848 = vmatprep.subr.mxu0 %v4220_v23 }
0x13cb   :  { %4840 = vmatprep.mubr.msk.f32.mxu1 %vm170_vm2, %v3492_v11  ;;  %v3483_v1 = vmul.f32 %v4193_v42, %v3473_v16  ;;  %4849 = vmatpush3.msra.mxu0 %v4220_v23 }
0x13cc   :  { %v5082_v45 = vpop.eup %5081  ;;  %4850 = vmatprep.subr.mxu0 %v4219_v63 }
0x13cd   :  { %v5084_v43 = vpop.eup %5083  ;;  %v3493_v28 = vadd.f32 %v4194_v48, %v3483_v1  ;;  %v3474_v20 = vmul.f32 %v5082_v45, %v3426_v24  ;;  %4851 = vmatpush3.msra.mxu0 %v4219_v63  ;;  %v4214_v24 = vld [vmem:[%s6473_s4 + $0xc0] sm:$0xff] }
0x13ce   :  { %v3475_v50 = vmul.f32 %v5084_v43, %v3427_v26  ;;  %4852 = vmatprep.subr.mxu0 %v4218_v41  ;;  %v4213_v26 = vld [vmem:[%s6473_s4 + $0xb8] sm:$0xff] }
0x13cf   :  { %4841 = vmatmul.mubr.msk.f32.gmra.mxu1 %vm170_vm2, %v3493_v28  ;;  %v3484_v15 = vmul.f32 %v4193_v42, %v3474_v20  ;;  %4853 = vmatpush3.msra.mxu0 %v4218_v41 }
0x13d0   :  { %v3485_v22 = vmul.f32 %v4193_v42, %v3475_v50  ;;  %4854 = vmatprep.subr.mxu0 %v4217_v44 }
0x13d1   :  { %v3494_v25 = vadd.f32 %v4194_v48, %v3484_v15  ;;  %4855 = vmatpush3.msra.mxu0 %v4217_v44 }
0x13d2   :  { %v3495_v38 = vadd.f32 %v4194_v48, %v3485_v22  ;;  %4856 = vmatprep.subr.mxu0 %v4216_v53 }
0x13d3   :  { %4843 = vmatprep.mubr.msk.f32.mxu1 %vm170_vm2, %v3494_v25  ;;  %4857 = vmatpush3.msra.mxu0 %v4216_v53 }
0x13d4   :  { %4844 = vmatmul.mubr.msk.f32.gmra.mxu1 %vm170_vm2, %v3495_v38  ;;  %4858 = vmatprep.subr.mxu0 %v4215_v33 }
0x13d5   :  { %4859 = vmatpush3.msra.mxu0 %v4215_v33 }
0x13d6   :  { %4860 = vmatprep.subr.mxu0 %v4214_v24 }
0x13d7   :  { %4861 = vmatpush3.msra.mxu0 %v4214_v24 }
0x13d8   :  { %4862 = vmatprep.subr.mxu0 %v4213_v26 }
0x13d9   :  { %4863 = vmatpush3.msra.mxu0 %v4213_v26 }
0x13da   :  { %4864 = vmatprep.subr.mxu0 %v4212_v40 }
0x13db   :  { %4865 = vmatpush3.msra.mxu0 %v4212_v40 }
0x13dc   :  { %4866 = vmatprep.subr.mxu0 %v4211_v59 }
0x13dd   :  { %4867 = vmatpush3.msra.mxu0 %v4211_v59 }
0x13de   :  { %4868 = vmatprep.subr.mxu0 %v4210_v13 }
0x13df   :  { %4869 = vmatpush3.msra.mxu0 %v4210_v13 }
0x13e0   :  { %4870 = vmatprep.subr.mxu0 %v4209_v30 }
0x13e1   :  { %4871 = vmatpush3.msra.mxu0 %v4209_v30 }
0x13e2   :  { %4872 = vmatprep.subr.mxu0 %v4208_v31 }
0x13e3   :  { %4873 = vmatpush3.msra.mxu0 %v4208_v31 }
0x13e4   :  { %4874 = vmatprep.subr.mxu0 %v4207_v34 }
0x13e5   :  { %4875 = vmatpush3.msra.mxu0 %v4207_v34 }
0x13e6   :  { %4876 = vmatprep.subr.mxu0 %v4206_v55 }
0x13e7   :  { %4877 = vmatpush3.msra.mxu0 %v4206_v55 }
0x1457   :  { %v4839_v36 = vpop.f32.mrf.mxu1 }
0x1458   :  { %v3596_v18 = vadd.f32 %v4839_v36, %v4199_v51 }
0x1459   :  { %v3590_v60 = vpop.f32.mrf.mxu1 }
0x145a   :  { %v3620_v57 = vmul.f32 %v3596_v18, %v3596_v18  ;;  %v3591_v42 = vadd.f32 %v4199_v51, %v3590_v60 }
0x145c   :  { %v3626_v19 = vmul.f32 %v3620_v57, %v3596_v18  ;;  %v3619_v9 = vmul.f32 %v3591_v42, %v3591_v42 }
0x145e   :  { %v3632_v3 = vmul.f32 0.044715, %v3626_v19  ;;  %v3625_v8 = vmul.f32 %v3619_v9, %v3591_v42 }
0x1460   :  { %v3638_v48 = vadd.f32 %v3632_v3, %v3596_v18  ;;  %v3631_v6 = vmul.f32 0.044715, %v3625_v8 }
0x1462   :  { %v3644_v12 = vmul.f32 0.7978846, %v3638_v48  ;;  %v3637_v5 = vadd.f32 %v3631_v6, %v3591_v42  ;;  %v4222_v48 = vld [vmem:[%s6474_s5 + $0x13] ss:$0 sm:$0xff] }
0x1464   :  { %5085 = vtanh.f32 %v3644_v12  ;;  %v3643_v10 = vmul.f32 0.7978846, %v3637_v5 }
0x1466   :  { %5087 = vtanh.f32 %v3643_v10 }
0x1471   :  { %v5086_v56 = vpop.eup %5085 }
0x1472   :  { %v3656_v61 = vadd.f32 1.0, %v5086_v56 }
0x1473   :  { %v5088_v7 = vpop.eup %5087 }
0x1474   :  { %v3655_v37 = vadd.f32 1.0, %v5088_v7  ;;  %v3662_v62 = vmul.f32 0.5, %v3656_v61 }
0x1476   :  { %v3661_v54 = vmul.f32 0.5, %v3655_v37  ;;  %v3668_v39 = vmul.f32 %v3662_v62, %v3596_v18 }
0x1478   :  { %v3667_v0 = vmul.f32 %v3661_v54, %v3591_v42 }
0x147a   :  { %4878 = vmatprep.mubr.f32.mxu0 %v3667_v0 }
0x147b   :  { %4879 = vmatmul.mubr.f32.vlgmr.msra.gmra.mxu0 %v3668_v39 }
0x148f   :  { %v4842_v14 = vpop.f32.mrf.mxu1 }
0x1490   :  { %v3606_v58 = vadd.f32 %v4842_v14, %v4199_v51 }
0x1491   :  { %v3600_v27 = vpop.f32.mrf.mxu1 }
0x1492   :  { %v3622_v29 = vmul.f32 %v3606_v58, %v3606_v58  ;;  %v3601_v17 = vadd.f32 %v4199_v51, %v3600_v27 }
0x1494   :  { %v3628_v32 = vmul.f32 %v3622_v29, %v3606_v58  ;;  %v3621_v4 = vmul.f32 %v3601_v17, %v3601_v17  ;;  %v4845_v11 = vpop.f32.mrf.mxu1 }
0x1495   :  { %v3616_v16 = vadd.f32 %v4845_v11, %v4199_v51 }
0x1496   :  { %v3634_v1 = vmul.f32 0.044715, %v3628_v32  ;;  %v3627_v45 = vmul.f32 %v3621_v4, %v3601_v17  ;;  %v3610_v43 = vpop.f32.mrf.mxu1 }
0x1497   :  { %v3624_v28 = vmul.f32 %v3616_v16, %v3616_v16  ;;  %v3611_v20 = vadd.f32 %v4199_v51, %v3610_v43 }
0x1498   :  { %v3640_v50 = vadd.f32 %v3634_v1, %v3606_v58  ;;  %v3633_v15 = vmul.f32 0.044715, %v3627_v45 }
0x1499   :  { %v3630_v22 = vmul.f32 %v3624_v28, %v3616_v16  ;;  %v3623_v25 = vmul.f32 %v3611_v20, %v3611_v20 }
0x149a   :  { %v3646_v38 = vmul.f32 0.7978846, %v3640_v50  ;;  %v3639_v52 = vadd.f32 %v3633_v15, %v3601_v17  ;;  %v3905_v15 = vld [vmem:[%s6474_s5 + $0x38] sm:$0xff] }
0x149b   :  { %v3636_v23 = vmul.f32 0.044715, %v3630_v22  ;;  %v3629_v63 = vmul.f32 %v3623_v25, %v3611_v20  ;;  %4887 = vmatprep.subr.mxu1 %v3905_v15  ;;  %v3904_v22 = vld [vmem:[%s6474_s5 + $0x30] sm:$0xff]  ;;  %v3903_v25 = vld [vmem:[%s6474_s5 + $0x28] sm:$0xff] }
0x149c   :  { %5089 = vtanh.f32 %v3646_v38  ;;  %v3645_v41 = vmul.f32 0.7978846, %v3639_v52  ;;  %4888 = vmatpush3.msra.mxu1 %v3905_v15  ;;  %v3902_v38 = vld [vmem:[%s6474_s5 + $0x20] sm:$0xff] }
0x149d   :  { %v3642_v44 = vadd.f32 %v3636_v23, %v3616_v16  ;;  %v3635_v53 = vmul.f32 0.044715, %v3629_v63  ;;  %4889 = vmatprep.subr.mxu1 %v3904_v22 }
0x149e   :  { %5091 = vtanh.f32 %v3645_v41  ;;  %4890 = vmatpush3.msra.mxu1 %v3904_v22 }
0x149f   :  { %v3648_v33 = vmul.f32 0.7978846, %v3642_v44  ;;  %v3641_v24 = vadd.f32 %v3635_v53, %v3611_v20  ;;  %4891 = vmatprep.subr.mxu1 %v3903_v25 }
0x14a0   :  { %4892 = vmatpush3.msra.mxu1 %v3903_v25 }
0x14a1   :  { %5093 = vtanh.f32 %v3648_v33  ;;  %v3647_v26 = vmul.f32 0.7978846, %v3641_v24  ;;  %4893 = vmatprep.subr.mxu1 %v3902_v38 }
0x14a2   :  { %4894 = vmatpush3.msra.mxu1 %v3902_v38 }
0x14a3   :  { %5095 = vtanh.f32 %v3647_v26 }
0x14a9   :  { %v5090_v40 = vpop.eup %5089 }
0x14aa   :  { %v3658_v59 = vadd.f32 1.0, %v5090_v40 }
0x14ab   :  { %v5092_v13 = vpop.eup %5091 }
0x14ac   :  { %v3657_v30 = vadd.f32 1.0, %v5092_v13  ;;  %v3664_v31 = vmul.f32 0.5, %v3658_v59 }
0x14ae   :  { %v5094_v34 = vpop.eup %5093  ;;  %v3663_v55 = vmul.f32 0.5, %v3657_v30  ;;  %v3670_v60 = vmul.f32 %v3664_v31, %v3606_v58 }
0x14af   :  { %v3660_v51 = vadd.f32 1.0, %v5094_v34 }
0x14b0   :  { %v5096_v36 = vpop.eup %5095  ;;  %v3669_v18 = vmul.f32 %v3663_v55, %v3601_v17 }
0x14b1   :  { %v3659_v57 = vadd.f32 1.0, %v5096_v36  ;;  %v3666_v42 = vmul.f32 0.5, %v3660_v51 }
0x14b2   :  { %4881 = vmatprep.mubr.f32.mxu0 %v3669_v18 }
0x14b3   :  { %4882 = vmatmul.mubr.f32.gmra.mxu0 %v3670_v60  ;;  %v3665_v19 = vmul.f32 0.5, %v3659_v57  ;;  %v3672_v3 = vmul.f32 %v3666_v42, %v3616_v16 }
0x14b5   :  { %v3671_v9 = vmul.f32 %v3665_v19, %v3611_v20 }
0x14b7   :  { %4884 = vmatprep.mubr.f32.mxu0 %v3671_v9 }
0x14b8   :  { %4885 = vmatmul.mubr.f32.gmra.mxu0 %v3672_v3 }
0x153b   :  { %v4880_v8 = vpop.f32.mrf.mxu0 }
0x153c   :  { %v3786_v6 = vadd.f32 %v4880_v8, %v6286_v35 }
0x153d   :  { %v3756_v12 = vpop.f32.mrf.mxu0 }
0x153e   :  { %v3797_v5 = vadd.f32 %v4222_v48, %v3786_v6  ;;  %v3785_v10 = vadd.f32 %v3756_v12, %v6289_v2  ;;  %v4223_v6 = vld [vmem:[%s6474_s5 + $0x2] ss:$0 sm:$0xff] }
0x1540   :  { %v3796_v56 = vadd.f32 %v4222_v48, %v3785_v10  ;;  %v3807_v61 = vsel %vm170_vm2, %v3797_v5, 0.0 }
0x1541   :  { %3808 = vadd.xlane.f32.xlu0 %v3807_v61  ;;  %v4224_v61 = vld [vmem:[%s6474_s5 + $0x3] ss:$0 sm:$0xff] }
0x1542   :  { %v3804_v7 = vsel %vm170_vm2, %v3796_v56, 0.0 }
0x1543   :  { %3805 = vadd.xlane.f32.xlu1 %v3804_v7 }
0x1573   :  { %v4883_v37 = vpop.f32.mrf.mxu0 }
0x1574   :  { %v3788_v62 = vadd.f32 %v4883_v37, %v6299_v49 }
0x1575   :  { %v3766_v54 = vpop.f32.mrf.mxu0 }
0x1576   :  { %v3799_v0 = vadd.f32 %v4222_v48, %v3788_v62  ;;  %v3787_v39 = vadd.f32 %v3766_v54, %v6297_v21 }
0x1578   :  { %v3798_v14 = vadd.f32 %v4222_v48, %v3787_v39  ;;  %v4886_v35 = vpop.f32.mrf.mxu0  ;;  %v3813_v58 = vsel %vm170_vm2, %v3799_v0, 0.0 }
0x1579   :  { %v3790_v2 = vadd.f32 %v4886_v35, %v6304_v47  ;;  %3814 = vadd.xlane.f32.xlu0 %v3813_v58 }
0x157a   :  { %v3776_v27 = vpop.f32.mrf.mxu0  ;;  %v3810_v29 = vsel %vm170_vm2, %v3798_v14, 0.0 }
0x157b   :  { %v3801_v17 = vadd.f32 %v4222_v48, %v3790_v2  ;;  %v3789_v32 = vadd.f32 %v3776_v27, %v6309_v46  ;;  %3811 = vadd.xlane.f32.xlu1 %v3810_v29 }
0x157d   :  { %v3800_v4 = vadd.f32 %v4222_v48, %v3789_v32  ;;  %v3819_v49 = vsel %vm170_vm2, %v3801_v17, 0.0 }
0x157e   :  { %3820 = vadd.xlane.f32.xlu0 %v3819_v49 }
0x157f   :  { %v3816_v21 = vsel %vm170_vm2, %v3800_v4, 0.0 }
0x1580   :  { %3817 = vadd.xlane.f32.xlu1 %v3816_v21 }
0x15ca   :  { %v3809_v11 = vpop.xlane.xlu0 %3808 }
0x15cb   :  { %v3823_v16 = vmul.f32 0.03125, %v3809_v11 }
0x15cc   :  { %v3806_v1 = vpop.xlane.xlu1 %3805 }
0x15cd   :  { %v3829_v45 = vsub.f32 %v3797_v5, %v3823_v16  ;;  %v3822_v47 = vmul.f32 0.03125, %v3806_v1 }
0x15cf   :  { %v3828_v43 = vsub.f32 %v3796_v56, %v3822_v47  ;;  %v3835_v28 = vmul.f32 %v3829_v45, %v3829_v45 }
0x15d1   :  { %v3843_v20 = vsel %vm170_vm2, %v3835_v28, 0.0  ;;  %v3834_v50 = vmul.f32 %v3828_v43, %v3828_v43 }
0x15d2   :  { %3844 = vadd.xlane.f32.xlu0 %v3843_v20 }
0x15d3   :  { %v3840_v46 = vsel %vm170_vm2, %v3834_v50, 0.0 }
0x15d4   :  { %3841 = vadd.xlane.f32.xlu1 %v3840_v46 }
0x1602   :  { %v3815_v52 = vpop.xlane.xlu0 %3814 }
0x1603   :  { %v3825_v23 = vmul.f32 0.03125, %v3815_v52  ;;  %v4225_v52 = vld [vmem:[%s6474_s5 + $0x14] ss:$0 sm:$0xff]  ;;  %s5159_s5 = smov [#allocation2]  }
0x1604   :  { %v3812_v63 = vpop.xlane.xlu1 %3811  ;;  %s4052_s27 = sshll.u32 %s5159_s5, 4  ;;  %s4053_s27 = int_to_ptr.vmem [resolvable:$true] %s4052_s27 }
0x1605   :  { %v3831_v41 = vsub.f32 %v3799_v0, %v3825_v23  ;;  %v3824_v44 = vmul.f32 0.03125, %v3812_v63  ;;  %s5127_s28 = scalar_lea.vmem %s4053_s27, 768  ;;  %p5132_p1 = scmp.lt.s32.totalorder %s4053_s27, %s4053_s27 }
0x1606   :  { %p5128_p0 = scmp.ne.s32.totalorder %s4053_s27, %s5127_s28  ;;  %p5133_p2 = scmp.lt.s32.totalorder %s5127_s28, %s5127_s28 }
0x1607   :  { %v3830_v53 = vsub.f32 %v3798_v14, %v3824_v44  ;;  %v3821_v33 = vpop.xlane.xlu0 %3820  ;;  %v3837_v24 = vmul.f32 %v3831_v41, %v3831_v41  ;;  %v4024_v44 = vlaneseq }
0x1608   :  { %v3827_v26 = vmul.f32 0.03125, %v3821_v33  ;;  %p5134_p3 = por %p5133_p2, %p5132_p1 }
0x1609   :  { %v3818_v40 = vpop.xlane.xlu1 %3817  ;;  %v3849_v59 = vsel %vm170_vm2, %v3837_v24, 0.0  ;;  %v3836_v13 = vmul.f32 %v3830_v53, %v3830_v53  ;;  %v4025_v33 = vand.u32 127, %v4024_v44 }
0x160a   :  { %v3833_v30 = vsub.f32 %v3801_v17, %v3827_v26  ;;  %v3826_v31 = vmul.f32 0.03125, %v3818_v40  ;;  %3850 = vadd.xlane.f32.xlu0 %v3849_v59  ;;  %p5135_p4 = pnand %p5134_p3, %p5128_p0 }
0x160b   :  { %v3846_v34 = vsel %vm170_vm2, %v3836_v13, 0.0  ;;  %vm4026_vm6 = vcmp.ge.s32.totalorder %v4025_v33, 5  ;;  %vm4027_vm7 = vcmp.lt.s32.totalorder %v4025_v33, 8 }
0x160c   :  { %v3832_v55 = vsub.f32 %v3800_v4, %v3826_v31  ;;  %3847 = vadd.xlane.f32.xlu1 %v3846_v34  ;;  %v3839_v51 = vmul.f32 %v3833_v30, %v3833_v30  ;;  %vm6450_vm8 = vmand %vm4026_vm6, %vm4027_vm7 }
0x160e   :  { %v3855_v36 = vsel %vm170_vm2, %v3839_v51, 0.0  ;;  %v3838_v18 = vmul.f32 %v3832_v55, %v3832_v55 }
0x160f   :  { %3856 = vadd.xlane.f32.xlu0 %v3855_v36 }
0x1610   :  { %v3852_v60 = vsel %vm170_vm2, %v3838_v18, 0.0 }
0x1611   :  { %3853 = vadd.xlane.f32.xlu1 %v3852_v60 }
0x165b   :  { %v3845_v57 = vpop.xlane.xlu0 %3844 }
0x165c   :  { %v3859_v42 = vmul.f32 0.03125, %v3845_v57 }
0x165d   :  { %v3842_v19 = vpop.xlane.xlu1 %3841 }
0x165e   :  { %v3865_v9 = vadd.f32 1e-05, %v3859_v42  ;;  %v3858_v3 = vmul.f32 0.03125, %v3842_v19 }
0x1660   :  { %5097 = vrsqrt.f32 %v3865_v9  ;;  %v3864_v8 = vadd.f32 1e-05, %v3858_v3 }
0x1662   :  { %5099 = vrsqrt.f32 %v3864_v8 }
0x166d   :  { %v5098_v48 = vpop.eup %5097 }
0x166e   :  { %v3877_v12 = vmul.f32 %v5098_v48, %v3829_v45 }
0x166f   :  { %v5100_v5 = vpop.eup %5099 }
0x1670   :  { %v3876_v10 = vmul.f32 %v5100_v5, %v3828_v43  ;;  %v3887_v56 = vmul.f32 %v4223_v6, %v3877_v12 }
0x1672   :  { %v3886_v7 = vmul.f32 %v4223_v6, %v3876_v10  ;;  %v3897_v62 = vadd.f32 %v4224_v61, %v3887_v56 }
0x1674   :  { %v3896_v37 = vadd.f32 %v4224_v61, %v3886_v7 }
0x1676   :  { %4895 = vmatprep.mubr.msk.f32.mxu1 %vm170_vm2, %v3896_v37 }
0x1677   :  { %4896 = vmatmul.mubr.msk.f32.vlgmr.msra.gmra.mxu1 %vm170_vm2, %v3897_v62 }
0x1693   :  { %v3851_v54 = vpop.xlane.xlu0 %3850 }
0x1694   :  { %v3861_v0 = vmul.f32 0.03125, %v3851_v54 }
0x1695   :  { %v3848_v39 = vpop.xlane.xlu1 %3847 }
0x1696   :  { %v3867_v14 = vadd.f32 1e-05, %v3861_v0  ;;  %v3860_v35 = vmul.f32 0.03125, %v3848_v39 }
0x1698   :  { %5101 = vrsqrt.f32 %v3867_v14  ;;  %v3866_v58 = vadd.f32 1e-05, %v3860_v35  ;;  %v3857_v2 = vpop.xlane.xlu0 %3856 }
0x1699   :  { %v3863_v27 = vmul.f32 0.03125, %v3857_v2 }
0x169a   :  { %5103 = vrsqrt.f32 %v3866_v58  ;;  %v3854_v29 = vpop.xlane.xlu1 %3853 }
0x169b   :  { %v3869_v17 = vadd.f32 1e-05, %v3863_v27  ;;  %v3862_v32 = vmul.f32 0.03125, %v3854_v29 }
0x169d   :  { %5105 = vrsqrt.f32 %v3869_v17  ;;  %v3868_v4 = vadd.f32 1e-05, %v3862_v32 }
0x169f   :  { %5107 = vrsqrt.f32 %v3868_v4 }
0x16a5   :  { %v5102_v49 = vpop.eup %5101 }
0x16a6   :  { %v3879_v21 = vmul.f32 %v5102_v49, %v3831_v41 }
0x16a7   :  { %v5104_v11 = vpop.eup %5103 }
0x16a8   :  { %v3878_v16 = vmul.f32 %v5104_v11, %v3830_v53  ;;  %v3889_v1 = vmul.f32 %v4223_v6, %v3879_v21 }
0x16aa   :  { %v5106_v45 = vpop.eup %5105  ;;  %v3888_v47 = vmul.f32 %v4223_v6, %v3878_v16  ;;  %v3899_v50 = vadd.f32 %v4224_v61, %v3889_v1 }
0x16ab   :  { %v3881_v43 = vmul.f32 %v5106_v45, %v3833_v30 }
0x16ac   :  { %v5108_v28 = vpop.eup %5107  ;;  %v3898_v20 = vadd.f32 %v4224_v61, %v3888_v47 }
0x16ad   :  { %v3880_v46 = vmul.f32 %v5108_v28, %v3832_v55  ;;  %v3891_v15 = vmul.f32 %v4223_v6, %v3881_v43 }
0x16ae   :  { %4898 = vmatprep.mubr.msk.f32.mxu1 %vm170_vm2, %v3898_v20 }
0x16af   :  { %4899 = vmatmul.mubr.msk.f32.gmra.mxu1 %vm170_vm2, %v3899_v50  ;;  %v3890_v22 = vmul.f32 %v4223_v6, %v3880_v46  ;;  %v3901_v38 = vadd.f32 %v4224_v61, %v3891_v15 }
0x16b1   :  { %v3900_v25 = vadd.f32 %v4224_v61, %v3890_v22 }
0x16b3   :  { %4901 = vmatprep.mubr.msk.f32.mxu1 %vm170_vm2, %v3900_v25 }
0x16b4   :  { %4902 = vmatmul.mubr.msk.f32.gmra.mxu1 %vm170_vm2, %v3901_v38 }
0x1737   :  { %v4897_v23 = vpop.f32.mrf.mxu1 }
0x1738   :  { %v4001_v63 = vadd.f32 %v4897_v23, %v4225_v52 }
0x1739   :  { %v3995_v41 = vpop.f32.mrf.mxu1 }
0x173a   :  { %5109 = vtanh.f32 %v4001_v63  ;;  %v3996_v53 = vadd.f32 %v4225_v52, %v3995_v41 }
0x173c   :  { %5111 = vtanh.f32 %v3996_v53 }
0x1747   :  { %v5110_v26 = vpop.eup %5109 }
0x1748   :  { %v4036_v40 = vsel %vm6450_vm8, %v5110_v26, %v4001_v63 }
0x1749   :  { %v5112_v59 = vpop.eup %5111  ;;  %4042 = vst [vmem:[#allocation2 + $0x8] sm:$0xff] %v4036_v40 }
0x174a   :  { %v4035_v13 = vsel %vm6450_vm8, %v5112_v59, %v3996_v53 }
0x174b   :  { %4041 = vst [vmem:[#allocation2] sm:$0xff] %v4035_v13 }
0x176f   :  { %v4900_v30 = vpop.f32.mrf.mxu1 }
0x1770   :  { %v4011_v31 = vadd.f32 %v4900_v30, %v4225_v52 }
0x1771   :  { %v4005_v34 = vpop.f32.mrf.mxu1 }
0x1772   :  { %5113 = vtanh.f32 %v4011_v31  ;;  %v4006_v55 = vadd.f32 %v4225_v52, %v4005_v34 }
0x1774   :  { %5115 = vtanh.f32 %v4006_v55  ;;  %v4903_v51 = vpop.f32.mrf.mxu1 }
0x1775   :  { %v4021_v36 = vadd.f32 %v4903_v51, %v4225_v52 }
0x1776   :  { %v4015_v18 = vpop.f32.mrf.mxu1 }
0x1777   :  { %5117 = vtanh.f32 %v4021_v36  ;;  %v4016_v60 = vadd.f32 %v4225_v52, %v4015_v18 }
0x1779   :  { %5119 = vtanh.f32 %v4016_v60 }
0x177f   :  { %v5114_v57 = vpop.eup %5113 }
0x1780   :  { %v4038_v42 = vsel %vm6450_vm8, %v5114_v57, %v4011_v31 }
0x1781   :  { %v5116_v19 = vpop.eup %5115  ;;  %4044 = vst [vmem:[#allocation2 + $0x18] sm:$0xff] %v4038_v42 }
0x1782   :  { %v4037_v9 = vsel %vm6450_vm8, %v5116_v19, %v4006_v55 }
0x1783   :  { %4043 = vst [vmem:[#allocation2 + $0x10] sm:$0xff] %v4037_v9 }
0x1784   :  { %v5118_v3 = vpop.eup %5117 }
0x1785   :  { %v4040_v8 = vsel %vm6450_vm8, %v5118_v3, %v4021_v36 }
0x1786   :  { %v5120_v48 = vpop.eup %5119  ;;  %4046 = vst [vmem:[#allocation2 + $0x28] sm:$0xff] %v4040_v8 }
0x1787   :  { %v4039_v6 = vsel %vm6450_vm8, %v5120_v48, %v4016_v60 }
0x1788   :  { %4045 = vst [vmem:[#allocation2 + $0x20] sm:$0xff] %v4039_v6 }
0x1789   :  { %5138 = shalt.err (!%p5135_p4)
}
0x178a   :  { %s5160_s2 = smov 128   ;;  %s5161_s3 = smov 8  }
0x178b   :  { %4058 = dma.vmem_to_hbm [thread:$0]  %s4053_s27, 768, %s6475_s6, [#allocation3], %s5160_s2, %s5160_s2, %s5161_s3  }
0x178c   :  { %5147 = dma.done.wait [#allocation3], 768  }
0x178d   :  { %5148 = vsyncadd [#allocation3], 4294966528 }
0x178e   :  { %4062 = vsyncpa [#allocation3], 1 }

</bundles_post_ra>
